<compile_context>
chip_gen: v7x
topology: tpu7x:2x2x1
jax: 0.10.0
libtpu: 0.0.40
codegen_flags: <defaults>
</compile_context>

<pallas_src>
import jax
import jax.numpy as jnp
import numpy as np
from jax.experimental import pallas as pl
from jax.experimental.pallas import tpu as pltpu


def _lenet_kernel(x_ref, a1_ref, b1_ref, p1e_ref, p1o_ref, s1e_ref, s1o_ref,
                  a2_ref, t2_ref, b2_ref, p2e_ref, p2o_ref, s2e_ref, s2o_ref,
                  wfc1_ref, efc1_ref, bfc1_ref, wfc2_ref, bfc2_ref,
                  wout_ref, bout_ref, out_ref, xs_ref):
    f32 = jnp.float32
    bf16 = jnp.bfloat16
    B = x_ref.shape[0]

    def mm(a, b):
        # bf16 MXU operands, f32 accumulation.
        return jnp.dot(a.astype(bf16), b.astype(bf16),
                       preferred_element_type=f32)

    # ---- conv1 RHS staging: xs[kw*28 + h, b*24 + ow] = x[b, h, ow + kw] ----
    for kw in range(5):
        for b in range(B):
            xs_ref[kw * 28:(kw + 1) * 28, b * 24:(b + 1) * 24] = \
                x_ref[b, :, kw:kw + 24]
    xs = xs_ref[...]                                           # (140, 24B)

    # ---- conv1 (1->6, k=5) + bias + ReLU: one (144,140)@(140,24B) matmul ---
    # rows = oc*24 + oh, lanes = b*24 + ow
    c1 = jnp.maximum(mm(a1_ref[...], xs) + b1_ref[...], 0.0)   # (144, 24B)

    # ---- pool1 (2x2 / stride 2): row then lane 0/1-selection matmuls -------
    r1 = jnp.maximum(mm(p1e_ref[...], c1), mm(p1o_ref[...], c1))   # (72, 24B)
    p1 = jnp.maximum(mm(r1, s1e_ref[...]), mm(r1, s1o_ref[...]))   # (72, 12B)
    # p1[c*12 + h, b*12 + w] = pooled1[b, c, h, w]

    # ---- conv2 (6->12, k=5) + bias + ReLU ----------------------------------
    # kw tap = lane shift/select matmul (T2_kw); (c, kh) contraction = host
    # Toeplitz matmul (A2_kw).  rows = oc*8 + oh, lanes = b*8 + ow.
    acc2 = None
    for kw in range(5):
        shifted = mm(p1, t2_ref[kw])                           # (72, 8B)
        term = mm(a2_ref[kw], shifted)                         # (96, 8B)
        acc2 = term if acc2 is None else acc2 + term
    c2 = jnp.maximum(acc2 + b2_ref[...], 0.0)                  # (96, 8B)

    # ---- pool2 (2x2 / stride 2) --------------------------------------------
    r2 = jnp.maximum(mm(p2e_ref[...], c2), mm(p2o_ref[...], c2))   # (48, 8B)
    p2 = jnp.maximum(mm(r2, s2e_ref[...]), mm(r2, s2o_ref[...]))   # (48, 4B)
    # p2[oc*4 + h, b*4 + w] = pooled2[b, oc, h, w]

    # ---- fc1 / fc2 / out, batched over B -----------------------------------
    # torch flatten order (oc*16 + h*4 + w) folded host-side into 4 per-w
    # (120, 48) weight slabs; E_w extracts the (48, B) column block for w.
    acc1 = None
    for w in range(4):
        cols = mm(p2, efc1_ref[w])                             # (48, B)
        term = mm(wfc1_ref[w], cols)                           # (120, B)
        acc1 = term if acc1 is None else acc1 + term
    h1 = jnp.maximum(acc1 + bfc1_ref[...], 0.0)                # (120, B)
    h2 = jnp.maximum(mm(wfc2_ref[...], h1) + bfc2_ref[...], 0.0)   # (60, B)
    out_ref[...] = mm(wout_ref[...], h2) + bout_ref[...]       # (10, B)


def init_params(key):
    ks = jax.random.split(key, 10)
    scale = 0.1
    return {
        "conv1_w": scale * jax.random.normal(ks[0], (6, 1, 5, 5), jnp.float32),
        "conv1_b": scale * jax.random.normal(ks[1], (6,), jnp.float32),
        "conv2_w": scale * jax.random.normal(ks[2], (12, 6, 5, 5), jnp.float32),
        "conv2_b": scale * jax.random.normal(ks[3], (12,), jnp.float32),
        "fc1_w": scale * jax.random.normal(ks[4], (120, 192), jnp.float32),
        "fc1_b": scale * jax.random.normal(ks[5], (120,), jnp.float32),
        "fc2_w": scale * jax.random.normal(ks[6], (60, 120), jnp.float32),
        "fc2_b": scale * jax.random.normal(ks[7], (60,), jnp.float32),
        "out_w": scale * jax.random.normal(ks[8], (10, 60), jnp.float32),
        "out_b": scale * jax.random.normal(ks[9], (10,), jnp.float32),
    }


def prepare_inputs(params, B):
    """One-time host-side re-layout: conv kernels -> Toeplitz matmul operands,
    pools -> 0/1 selection matrices, fc1 -> per-w slabs.  MXU operands bf16."""
    f32 = np.float32
    w1 = np.asarray(params["conv1_w"], f32)       # (6,1,5,5)
    b1 = np.asarray(params["conv1_b"], f32)
    w2 = np.asarray(params["conv2_w"], f32)       # (12,6,5,5)
    b2 = np.asarray(params["conv2_b"], f32)
    wfc1 = np.asarray(params["fc1_w"], f32)       # (120,192)
    bfc1 = np.asarray(params["fc1_b"], f32)
    wfc2 = np.asarray(params["fc2_w"], f32)
    bfc2 = np.asarray(params["fc2_b"], f32)
    wout = np.asarray(params["out_w"], f32)
    bout = np.asarray(params["out_b"], f32)

    # conv1 Toeplitz: A1[oc*24+oh, kw*28 + (oh+kh)] = w1[oc,0,kh,kw]
    A1 = np.zeros((144, 140), f32)
    for oc in range(6):
        for oh in range(24):
            for kh in range(5):
                for kw in range(5):
                    A1[oc * 24 + oh, kw * 28 + oh + kh] = w1[oc, 0, kh, kw]
    b1col = np.repeat(b1, 24).reshape(144, 1)

    # pool1 selectors (rows then lanes)
    P1e = np.zeros((72, 144), f32); P1o = np.zeros((72, 144), f32)
    for oc in range(6):
        for i in range(12):
            P1e[oc * 12 + i, oc * 24 + 2 * i] = 1.0
            P1o[oc * 12 + i, oc * 24 + 2 * i + 1] = 1.0
    S1e = np.zeros((24 * B, 12 * B), f32); S1o = np.zeros_like(S1e)
    for b in range(B):
        for j in range(12):
            S1e[b * 24 + 2 * j, b * 12 + j] = 1.0
            S1o[b * 24 + 2 * j + 1, b * 12 + j] = 1.0

    # conv2: per-kw Toeplitz over (c, kh) + per-kw lane shift/select
    A2 = np.zeros((5, 96, 72), f32)
    for kw in range(5):
        for oc in range(12):
            for oh in range(8):
                for c in range(6):
                    for kh in range(5):
                        A2[kw, oc * 8 + oh, c * 12 + oh + kh] = w2[oc, c, kh, kw]
    T2 = np.zeros((5, 12 * B, 8 * B), f32)
    for kw in range(5):
        for b in range(B):
            for ow in range(8):
                T2[kw, b * 12 + ow + kw, b * 8 + ow] = 1.0
    b2col = np.repeat(b2, 8).reshape(96, 1)

    # pool2 selectors
    P2e = np.zeros((48, 96), f32); P2o = np.zeros((48, 96), f32)
    for oc in range(12):
        for i in range(4):
            P2e[oc * 4 + i, oc * 8 + 2 * i] = 1.0
            P2o[oc * 4 + i, oc * 8 + 2 * i + 1] = 1.0
    S2e = np.zeros((8 * B, 4 * B), f32); S2o = np.zeros_like(S2e)
    for b in range(B):
        for j in range(4):
            S2e[b * 8 + 2 * j, b * 4 + j] = 1.0
            S2o[b * 8 + 2 * j + 1, b * 4 + j] = 1.0

    # fc1: (120, 192 = oc*16 + h*4 + w) -> 4 slabs (120, oc*4 + h), plus the
    # (4B, B) extractor that pulls column w of every batch element.
    Wr = wfc1.reshape(120, 12, 4, 4)
    Wfc1r = np.stack([Wr[:, :, :, w].reshape(120, 48) for w in range(4)], 0)
    E = np.zeros((4, 4 * B, B), f32)
    for w in range(4):
        for b in range(B):
            E[w, b * 4 + w, b] = 1.0

    bf = jnp.bfloat16
    return (
        jnp.asarray(A1, bf), jnp.asarray(b1col),
        jnp.asarray(P1e, bf), jnp.asarray(P1o, bf),
        jnp.asarray(S1e, bf), jnp.asarray(S1o, bf),
        jnp.asarray(A2, bf), jnp.asarray(T2, bf), jnp.asarray(b2col),
        jnp.asarray(P2e, bf), jnp.asarray(P2o, bf),
        jnp.asarray(S2e, bf), jnp.asarray(S2o, bf),
        jnp.asarray(Wfc1r, bf), jnp.asarray(E, bf),
        jnp.asarray(bfc1.reshape(120, 1)),
        jnp.asarray(wfc2, bf), jnp.asarray(bfc2.reshape(60, 1)),
        jnp.asarray(wout, bf), jnp.asarray(bout.reshape(10, 1)),
    )


def network_forward(prepped, x):
    # x: (B, 1, 28, 28) float32
    B = x.shape[0]
    x3 = x.reshape(B, 28, 28).astype(jnp.float32)      # C_in == 1
    vmem = pl.BlockSpec(memory_space=pltpu.MemorySpace.VMEM)
    out_t = pl.pallas_call(
        _lenet_kernel,
        out_shape=jax.ShapeDtypeStruct((10, B), jnp.float32),
        in_specs=[vmem] * (1 + len(prepped)),
        out_specs=vmem,
        scratch_shapes=[pltpu.VMEM((140, 24 * B), jnp.float32)],
    )(x3, *prepped)
    return out_t.T                                      # (B, 10)


def reference_forward(params, x):
    """Pure-JAX reference matching the PyTorch module (f32)."""
    dn = ("NCHW", "OIHW", "NCHW")
    t = jax.lax.conv_general_dilated(x, params["conv1_w"], (1, 1), "VALID",
                                     dimension_numbers=dn)
    t = jax.nn.relu(t + params["conv1_b"].reshape(1, 6, 1, 1))
    t = jax.lax.reduce_window(t, -jnp.inf, jax.lax.max,
                              (1, 1, 2, 2), (1, 1, 2, 2), "VALID")
    t = jax.lax.conv_general_dilated(t, params["conv2_w"], (1, 1), "VALID",
                                     dimension_numbers=dn)
    t = jax.nn.relu(t + params["conv2_b"].reshape(1, 12, 1, 1))
    t = jax.lax.reduce_window(t, -jnp.inf, jax.lax.max,
                              (1, 1, 2, 2), (1, 1, 2, 2), "VALID")
    t = t.reshape(t.shape[0], -1)
    t = jax.nn.relu(t @ params["fc1_w"].T + params["fc1_b"])
    t = jax.nn.relu(t @ params["fc2_w"].T + params["fc2_b"])
    return t @ params["out_w"].T + params["out_b"]


if __name__ == "__main__":
    key = jax.random.PRNGKey(0)
    pkey, xkey = jax.random.split(key)
    params = init_params(pkey)
    B = 2
    prepped = prepare_inputs(params, B)
    # Module implies a 1x28x28 (MNIST-style) input; small batch = 2.
    x = jax.random.normal(xkey, (B, 1, 28, 28), jnp.float32)

    fwd = jax.jit(network_forward)
    out = fwd(prepped, x)
    jax.block_until_ready(out)
    assert out.shape == (B, 10), out.shape

    ref = jax.jit(reference_forward)(params, x)
    # bf16 MXU operands (f32 accumulation) vs. the f32 reference.
    max_err = float(jnp.max(jnp.abs(out - ref)))
    assert max_err < 3e-2, f"kernel/reference mismatch, max abs err = {max_err}"

    print("KERNEL_OK")
</pallas_src>

<mosaic_0001>
module attributes {stable_mosaic.version = 11 : i64} {
  func.func @_lenet_kernel(%arg0: memref<2x28x28xf32, #tpu.memory_space<vmem>>, %arg1: memref<144x140xbf16, #tpu.memory_space<vmem>>, %arg2: memref<144x1xf32, #tpu.memory_space<vmem>>, %arg3: memref<72x144xbf16, #tpu.memory_space<vmem>>, %arg4: memref<72x144xbf16, #tpu.memory_space<vmem>>, %arg5: memref<48x24xbf16, #tpu.memory_space<vmem>>, %arg6: memref<48x24xbf16, #tpu.memory_space<vmem>>, %arg7: memref<5x96x72xbf16, #tpu.memory_space<vmem>>, %arg8: memref<5x24x16xbf16, #tpu.memory_space<vmem>>, %arg9: memref<96x1xf32, #tpu.memory_space<vmem>>, %arg10: memref<48x96xbf16, #tpu.memory_space<vmem>>, %arg11: memref<48x96xbf16, #tpu.memory_space<vmem>>, %arg12: memref<16x8xbf16, #tpu.memory_space<vmem>>, %arg13: memref<16x8xbf16, #tpu.memory_space<vmem>>, %arg14: memref<4x120x48xbf16, #tpu.memory_space<vmem>>, %arg15: memref<4x8x2xbf16, #tpu.memory_space<vmem>>, %arg16: memref<120x1xf32, #tpu.memory_space<vmem>>, %arg17: memref<60x120xbf16, #tpu.memory_space<vmem>>, %arg18: memref<60x1xf32, #tpu.memory_space<vmem>>, %arg19: memref<10x60xbf16, #tpu.memory_space<vmem>>, %arg20: memref<10x1xf32, #tpu.memory_space<vmem>>, %arg21: memref<10x2xf32, #tpu.memory_space<vmem>>, %arg22: memref<140x48xf32, #tpu.memory_space<vmem>>) attributes {dimension_semantics = [], scalar_prefetch = 0 : i64, scratch_operands = 1 : i64, tpu.core_type = #tpu.core_type<tc>} {
    %c0 = arith.constant 0 : index
    %c0_0 = arith.constant 0 : index
    %c0_1 = arith.constant 0 : index
    %0 = vector.load %arg0[%c0, %c0_0, %c0_1] : memref<2x28x28xf32, #tpu.memory_space<vmem>>, vector<1x28x24xf32>
    %1 = vector.shape_cast %0 : vector<1x28x24xf32> to vector<28x24xf32>
    %c0_2 = arith.constant 0 : index
    %c0_3 = arith.constant 0 : index
    %2 = vector.load %arg22[%c0_2, %c0_3] : memref<140x48xf32, #tpu.memory_space<vmem>>, vector<28x24xf32>
    tpu.vector_store %arg22[%c0_2, %c0_3], %1 {strides = array<i32>} : memref<140x48xf32, #tpu.memory_space<vmem>>, vector<28x24xf32>,
    %c1 = arith.constant 1 : index
    %c0_4 = arith.constant 0 : index
    %c0_5 = arith.constant 0 : index
    %3 = vector.load %arg0[%c1, %c0_4, %c0_5] : memref<2x28x28xf32, #tpu.memory_space<vmem>>, vector<1x28x24xf32>
    %4 = vector.shape_cast %3 : vector<1x28x24xf32> to vector<28x24xf32>
    %c0_6 = arith.constant 0 : index
    %c24 = arith.constant 24 : index
    %5 = vector.load %arg22[%c0_6, %c24] : memref<140x48xf32, #tpu.memory_space<vmem>>, vector<28x24xf32>
    tpu.vector_store %arg22[%c0_6, %c24], %4 {strides = array<i32>} : memref<140x48xf32, #tpu.memory_space<vmem>>, vector<28x24xf32>,
    %c0_7 = arith.constant 0 : index
    %c0_8 = arith.constant 0 : index
    %c1_9 = arith.constant 1 : index
    %6 = vector.load %arg0[%c0_7, %c0_8, %c1_9] : memref<2x28x28xf32, #tpu.memory_space<vmem>>, vector<1x28x24xf32>
    %7 = vector.shape_cast %6 : vector<1x28x24xf32> to vector<28x24xf32>
    %c28 = arith.constant 28 : index
    %c0_10 = arith.constant 0 : index
    %8 = vector.load %arg22[%c28, %c0_10] : memref<140x48xf32, #tpu.memory_space<vmem>>, vector<28x24xf32>
    tpu.vector_store %arg22[%c28, %c0_10], %7 {strides = array<i32>} : memref<140x48xf32, #tpu.memory_space<vmem>>, vector<28x24xf32>,
    %c1_11 = arith.constant 1 : index
    %c0_12 = arith.constant 0 : index
    %c1_13 = arith.constant 1 : index
    %9 = vector.load %arg0[%c1_11, %c0_12, %c1_13] : memref<2x28x28xf32, #tpu.memory_space<vmem>>, vector<1x28x24xf32>
    %10 = vector.shape_cast %9 : vector<1x28x24xf32> to vector<28x24xf32>
    %c28_14 = arith.constant 28 : index
    %c24_15 = arith.constant 24 : index
    %11 = vector.load %arg22[%c28_14, %c24_15] : memref<140x48xf32, #tpu.memory_space<vmem>>, vector<28x24xf32>
    tpu.vector_store %arg22[%c28_14, %c24_15], %10 {strides = array<i32>} : memref<140x48xf32, #tpu.memory_space<vmem>>, vector<28x24xf32>,
    %c0_16 = arith.constant 0 : index
    %c0_17 = arith.constant 0 : index
    %c2 = arith.constant 2 : index
    %12 = vector.load %arg0[%c0_16, %c0_17, %c2] : memref<2x28x28xf32, #tpu.memory_space<vmem>>, vector<1x28x24xf32>
    %13 = vector.shape_cast %12 : vector<1x28x24xf32> to vector<28x24xf32>
    %c56 = arith.constant 56 : index
    %c0_18 = arith.constant 0 : index
    %14 = vector.load %arg22[%c56, %c0_18] : memref<140x48xf32, #tpu.memory_space<vmem>>, vector<28x24xf32>
    tpu.vector_store %arg22[%c56, %c0_18], %13 {strides = array<i32>} : memref<140x48xf32, #tpu.memory_space<vmem>>, vector<28x24xf32>,
    %c1_19 = arith.constant 1 : index
    %c0_20 = arith.constant 0 : index
    %c2_21 = arith.constant 2 : index
    %15 = vector.load %arg0[%c1_19, %c0_20, %c2_21] : memref<2x28x28xf32, #tpu.memory_space<vmem>>, vector<1x28x24xf32>
    %16 = vector.shape_cast %15 : vector<1x28x24xf32> to vector<28x24xf32>
    %c56_22 = arith.constant 56 : index
    %c24_23 = arith.constant 24 : index
    %17 = vector.load %arg22[%c56_22, %c24_23] : memref<140x48xf32, #tpu.memory_space<vmem>>, vector<28x24xf32>
    tpu.vector_store %arg22[%c56_22, %c24_23], %16 {strides = array<i32>} : memref<140x48xf32, #tpu.memory_space<vmem>>, vector<28x24xf32>,
    %c0_24 = arith.constant 0 : index
    %c0_25 = arith.constant 0 : index
    %c3 = arith.constant 3 : index
    %18 = vector.load %arg0[%c0_24, %c0_25, %c3] : memref<2x28x28xf32, #tpu.memory_space<vmem>>, vector<1x28x24xf32>
    %19 = vector.shape_cast %18 : vector<1x28x24xf32> to vector<28x24xf32>
    %c84 = arith.constant 84 : index
    %c0_26 = arith.constant 0 : index
    %20 = vector.load %arg22[%c84, %c0_26] : memref<140x48xf32, #tpu.memory_space<vmem>>, vector<28x24xf32>
    tpu.vector_store %arg22[%c84, %c0_26], %19 {strides = array<i32>} : memref<140x48xf32, #tpu.memory_space<vmem>>, vector<28x24xf32>,
    %c1_27 = arith.constant 1 : index
    %c0_28 = arith.constant 0 : index
    %c3_29 = arith.constant 3 : index
    %21 = vector.load %arg0[%c1_27, %c0_28, %c3_29] : memref<2x28x28xf32, #tpu.memory_space<vmem>>, vector<1x28x24xf32>
    %22 = vector.shape_cast %21 : vector<1x28x24xf32> to vector<28x24xf32>
    %c84_30 = arith.constant 84 : index
    %c24_31 = arith.constant 24 : index
    %23 = vector.load %arg22[%c84_30, %c24_31] : memref<140x48xf32, #tpu.memory_space<vmem>>, vector<28x24xf32>
    tpu.vector_store %arg22[%c84_30, %c24_31], %22 {strides = array<i32>} : memref<140x48xf32, #tpu.memory_space<vmem>>, vector<28x24xf32>,
    %c0_32 = arith.constant 0 : index
    %c0_33 = arith.constant 0 : index
    %c4 = arith.constant 4 : index
    %24 = vector.load %arg0[%c0_32, %c0_33, %c4] : memref<2x28x28xf32, #tpu.memory_space<vmem>>, vector<1x28x24xf32>
    %25 = vector.shape_cast %24 : vector<1x28x24xf32> to vector<28x24xf32>
    %c112 = arith.constant 112 : index
    %c0_34 = arith.constant 0 : index
    %26 = vector.load %arg22[%c112, %c0_34] : memref<140x48xf32, #tpu.memory_space<vmem>>, vector<28x24xf32>
    tpu.vector_store %arg22[%c112, %c0_34], %25 {strides = array<i32>} : memref<140x48xf32, #tpu.memory_space<vmem>>, vector<28x24xf32>,
    %c1_35 = arith.constant 1 : index
    %c0_36 = arith.constant 0 : index
    %c4_37 = arith.constant 4 : index
    %27 = vector.load %arg0[%c1_35, %c0_36, %c4_37] : memref<2x28x28xf32, #tpu.memory_space<vmem>>, vector<1x28x24xf32>
    %28 = vector.shape_cast %27 : vector<1x28x24xf32> to vector<28x24xf32>
    %c112_38 = arith.constant 112 : index
    %c24_39 = arith.constant 24 : index
    %29 = vector.load %arg22[%c112_38, %c24_39] : memref<140x48xf32, #tpu.memory_space<vmem>>, vector<28x24xf32>
    tpu.vector_store %arg22[%c112_38, %c24_39], %28 {strides = array<i32>} : memref<140x48xf32, #tpu.memory_space<vmem>>, vector<28x24xf32>,
    %c0_40 = arith.constant 0 : index
    %c0_41 = arith.constant 0 : index
    %30 = vector.load %arg22[%c0_40, %c0_41] : memref<140x48xf32, #tpu.memory_space<vmem>>, vector<140x48xf32>
    %c0_42 = arith.constant 0 : index
    %c0_43 = arith.constant 0 : index
    %31 = vector.load %arg1[%c0_42, %c0_43] : memref<144x140xbf16, #tpu.memory_space<vmem>>, vector<144x140xbf16>
    %32 = arith.truncf %30 : vector<140x48xf32> to vector<140x48xbf16>
    %cst = arith.constant dense<0.000000e+00> : vector<144x48xf32>
    %33 = tpu.matmul %31, %32, %cst {dimension_numbers = #tpu.dot_dimension_numbers<[1], [0], [0], [1], [0, 0, 1, 1], [], []>} : vector<144x140xbf16>, vector<140x48xbf16>, vector<144x48xf32> -> vector<144x48xf32>
    %c0_44 = arith.constant 0 : index
    %c0_45 = arith.constant 0 : index
    %34 = vector.load %arg2[%c0_44, %c0_45] : memref<144x1xf32, #tpu.memory_space<vmem>>, vector<144x1xf32>
    %35 = vector.broadcast %34 : vector<144x1xf32> to vector<144x48xf32>
    %36 = arith.addf %33, %35 : vector<144x48xf32>
    %cst_46 = arith.constant 0.000000e+00 : f32
    %37 = vector.broadcast %cst_46 : f32 to vector<144x48xf32>
    %38 = arith.maximumf %36, %37 : vector<144x48xf32>
    %c0_47 = arith.constant 0 : index
    %c0_48 = arith.constant 0 : index
    %39 = vector.load %arg3[%c0_47, %c0_48] : memref<72x144xbf16, #tpu.memory_space<vmem>>, vector<72x144xbf16>
    %40 = arith.truncf %38 : vector<144x48xf32> to vector<144x48xbf16>
    %cst_49 = arith.constant dense<0.000000e+00> : vector<72x48xf32>
    %41 = tpu.matmul %39, %40, %cst_49 {dimension_numbers = #tpu.dot_dimension_numbers<[1], [0], [0], [1], [0, 0, 1, 1], [], []>} : vector<72x144xbf16>, vector<144x48xbf16>, vector<72x48xf32> -> vector<72x48xf32>
    %c0_50 = arith.constant 0 : index
    %c0_51 = arith.constant 0 : index
    %42 = vector.load %arg4[%c0_50, %c0_51] : memref<72x144xbf16, #tpu.memory_space<vmem>>, vector<72x144xbf16>
    %43 = arith.truncf %38 : vector<144x48xf32> to vector<144x48xbf16>
    %cst_52 = arith.constant dense<0.000000e+00> : vector<72x48xf32>
    %44 = tpu.matmul %42, %43, %cst_52 {dimension_numbers = #tpu.dot_dimension_numbers<[1], [0], [0], [1], [0, 0, 1, 1], [], []>} : vector<72x144xbf16>, vector<144x48xbf16>, vector<72x48xf32> -> vector<72x48xf32>
    %45 = arith.maximumf %41, %44 : vector<72x48xf32>
    %c0_53 = arith.constant 0 : index
    %c0_54 = arith.constant 0 : index
    %46 = vector.load %arg5[%c0_53, %c0_54] : memref<48x24xbf16, #tpu.memory_space<vmem>>, vector<48x24xbf16>
    %47 = arith.truncf %45 : vector<72x48xf32> to vector<72x48xbf16>
    %cst_55 = arith.constant dense<0.000000e+00> : vector<72x24xf32>
    %48 = tpu.matmul %47, %46, %cst_55 {dimension_numbers = #tpu.dot_dimension_numbers<[1], [0], [0], [1], [0, 0, 1, 1], [], []>} : vector<72x48xbf16>, vector<48x24xbf16>, vector<72x24xf32> -> vector<72x24xf32>
    %c0_56 = arith.constant 0 : index
    %c0_57 = arith.constant 0 : index
    %49 = vector.load %arg6[%c0_56, %c0_57] : memref<48x24xbf16, #tpu.memory_space<vmem>>, vector<48x24xbf16>
    %50 = arith.truncf %45 : vector<72x48xf32> to vector<72x48xbf16>
    %cst_58 = arith.constant dense<0.000000e+00> : vector<72x24xf32>
    %51 = tpu.matmul %50, %49, %cst_58 {dimension_numbers = #tpu.dot_dimension_numbers<[1], [0], [0], [1], [0, 0, 1, 1], [], []>} : vector<72x48xbf16>, vector<48x24xbf16>, vector<72x24xf32> -> vector<72x24xf32>
    %52 = arith.maximumf %48, %51 : vector<72x24xf32>
    %c0_59 = arith.constant 0 : index
    %c0_60 = arith.constant 0 : index
    %c0_61 = arith.constant 0 : index
    %53 = vector.load %arg8[%c0_59, %c0_60, %c0_61] : memref<5x24x16xbf16, #tpu.memory_space<vmem>>, vector<1x24x16xbf16>
    %54 = vector.shape_cast %53 : vector<1x24x16xbf16> to vector<24x16xbf16>
    %55 = arith.truncf %52 : vector<72x24xf32> to vector<72x24xbf16>
    %cst_62 = arith.constant dense<0.000000e+00> : vector<72x16xf32>
    %56 = tpu.matmul %55, %54, %cst_62 {dimension_numbers = #tpu.dot_dimension_numbers<[1], [0], [0], [1], [0, 0, 1, 1], [], []>} : vector<72x24xbf16>, vector<24x16xbf16>, vector<72x16xf32> -> vector<72x16xf32>
    %c0_63 = arith.constant 0 : index
    %c0_64 = arith.constant 0 : index
    %c0_65 = arith.constant 0 : index
    %57 = vector.load %arg7[%c0_63, %c0_64, %c0_65] : memref<5x96x72xbf16, #tpu.memory_space<vmem>>, vector<1x96x72xbf16>
    %58 = vector.shape_cast %57 : vector<1x96x72xbf16> to vector<96x72xbf16>
    %59 = arith.truncf %56 : vector<72x16xf32> to vector<72x16xbf16>
    %cst_66 = arith.constant dense<0.000000e+00> : vector<96x16xf32>
    %60 = tpu.matmul %58, %59, %cst_66 {dimension_numbers = #tpu.dot_dimension_numbers<[1], [0], [0], [1], [0, 0, 1, 1], [], []>} : vector<96x72xbf16>, vector<72x16xbf16>, vector<96x16xf32> -> vector<96x16xf32>
    %c1_67 = arith.constant 1 : index
    %c0_68 = arith.constant 0 : index
    %c0_69 = arith.constant 0 : index
    %61 = vector.load %arg8[%c1_67, %c0_68, %c0_69] : memref<5x24x16xbf16, #tpu.memory_space<vmem>>, vector<1x24x16xbf16>
    %62 = vector.shape_cast %61 : vector<1x24x16xbf16> to vector<24x16xbf16>
    %63 = arith.truncf %52 : vector<72x24xf32> to vector<72x24xbf16>
    %cst_70 = arith.constant dense<0.000000e+00> : vector<72x16xf32>
    %64 = tpu.matmul %63, %62, %cst_70 {dimension_numbers = #tpu.dot_dimension_numbers<[1], [0], [0], [1], [0, 0, 1, 1], [], []>} : vector<72x24xbf16>, vector<24x16xbf16>, vector<72x16xf32> -> vector<72x16xf32>
    %c1_71 = arith.constant 1 : index
    %c0_72 = arith.constant 0 : index
    %c0_73 = arith.constant 0 : index
    %65 = vector.load %arg7[%c1_71, %c0_72, %c0_73] : memref<5x96x72xbf16, #tpu.memory_space<vmem>>, vector<1x96x72xbf16>
    %66 = vector.shape_cast %65 : vector<1x96x72xbf16> to vector<96x72xbf16>
    %67 = arith.truncf %64 : vector<72x16xf32> to vector<72x16xbf16>
    %cst_74 = arith.constant dense<0.000000e+00> : vector<96x16xf32>
    %68 = tpu.matmul %66, %67, %cst_74 {dimension_numbers = #tpu.dot_dimension_numbers<[1], [0], [0], [1], [0, 0, 1, 1], [], []>} : vector<96x72xbf16>, vector<72x16xbf16>, vector<96x16xf32> -> vector<96x16xf32>
    %69 = arith.addf %60, %68 : vector<96x16xf32>
    %c2_75 = arith.constant 2 : index
    %c0_76 = arith.constant 0 : index
    %c0_77 = arith.constant 0 : index
    %70 = vector.load %arg8[%c2_75, %c0_76, %c0_77] : memref<5x24x16xbf16, #tpu.memory_space<vmem>>, vector<1x24x16xbf16>
    %71 = vector.shape_cast %70 : vector<1x24x16xbf16> to vector<24x16xbf16>
    %72 = arith.truncf %52 : vector<72x24xf32> to vector<72x24xbf16>
    %cst_78 = arith.constant dense<0.000000e+00> : vector<72x16xf32>
    %73 = tpu.matmul %72, %71, %cst_78 {dimension_numbers = #tpu.dot_dimension_numbers<[1], [0], [0], [1], [0, 0, 1, 1], [], []>} : vector<72x24xbf16>, vector<24x16xbf16>, vector<72x16xf32> -> vector<72x16xf32>
    %c2_79 = arith.constant 2 : index
    %c0_80 = arith.constant 0 : index
    %c0_81 = arith.constant 0 : index
    %74 = vector.load %arg7[%c2_79, %c0_80, %c0_81] : memref<5x96x72xbf16, #tpu.memory_space<vmem>>, vector<1x96x72xbf16>
    %75 = vector.shape_cast %74 : vector<1x96x72xbf16> to vector<96x72xbf16>
    %76 = arith.truncf %73 : vector<72x16xf32> to vector<72x16xbf16>
    %cst_82 = arith.constant dense<0.000000e+00> : vector<96x16xf32>
    %77 = tpu.matmul %75, %76, %cst_82 {dimension_numbers = #tpu.dot_dimension_numbers<[1], [0], [0], [1], [0, 0, 1, 1], [], []>} : vector<96x72xbf16>, vector<72x16xbf16>, vector<96x16xf32> -> vector<96x16xf32>
    %78 = arith.addf %69, %77 : vector<96x16xf32>
    %c3_83 = arith.constant 3 : index
    %c0_84 = arith.constant 0 : index
    %c0_85 = arith.constant 0 : index
    %79 = vector.load %arg8[%c3_83, %c0_84, %c0_85] : memref<5x24x16xbf16, #tpu.memory_space<vmem>>, vector<1x24x16xbf16>
    %80 = vector.shape_cast %79 : vector<1x24x16xbf16> to vector<24x16xbf16>
    %81 = arith.truncf %52 : vector<72x24xf32> to vector<72x24xbf16>
    %cst_86 = arith.constant dense<0.000000e+00> : vector<72x16xf32>
    %82 = tpu.matmul %81, %80, %cst_86 {dimension_numbers = #tpu.dot_dimension_numbers<[1], [0], [0], [1], [0, 0, 1, 1], [], []>} : vector<72x24xbf16>, vector<24x16xbf16>, vector<72x16xf32> -> vector<72x16xf32>
    %c3_87 = arith.constant 3 : index
    %c0_88 = arith.constant 0 : index
    %c0_89 = arith.constant 0 : index
    %83 = vector.load %arg7[%c3_87, %c0_88, %c0_89] : memref<5x96x72xbf16, #tpu.memory_space<vmem>>, vector<1x96x72xbf16>
    %84 = vector.shape_cast %83 : vector<1x96x72xbf16> to vector<96x72xbf16>
    %85 = arith.truncf %82 : vector<72x16xf32> to vector<72x16xbf16>
    %cst_90 = arith.constant dense<0.000000e+00> : vector<96x16xf32>
    %86 = tpu.matmul %84, %85, %cst_90 {dimension_numbers = #tpu.dot_dimension_numbers<[1], [0], [0], [1], [0, 0, 1, 1], [], []>} : vector<96x72xbf16>, vector<72x16xbf16>, vector<96x16xf32> -> vector<96x16xf32>
    %87 = arith.addf %78, %86 : vector<96x16xf32>
    %c4_91 = arith.constant 4 : index
    %c0_92 = arith.constant 0 : index
    %c0_93 = arith.constant 0 : index
    %88 = vector.load %arg8[%c4_91, %c0_92, %c0_93] : memref<5x24x16xbf16, #tpu.memory_space<vmem>>, vector<1x24x16xbf16>
    %89 = vector.shape_cast %88 : vector<1x24x16xbf16> to vector<24x16xbf16>
    %90 = arith.truncf %52 : vector<72x24xf32> to vector<72x24xbf16>
    %cst_94 = arith.constant dense<0.000000e+00> : vector<72x16xf32>
    %91 = tpu.matmul %90, %89, %cst_94 {dimension_numbers = #tpu.dot_dimension_numbers<[1], [0], [0], [1], [0, 0, 1, 1], [], []>} : vector<72x24xbf16>, vector<24x16xbf16>, vector<72x16xf32> -> vector<72x16xf32>
    %c4_95 = arith.constant 4 : index
    %c0_96 = arith.constant 0 : index
    %c0_97 = arith.constant 0 : index
    %92 = vector.load %arg7[%c4_95, %c0_96, %c0_97] : memref<5x96x72xbf16, #tpu.memory_space<vmem>>, vector<1x96x72xbf16>
    %93 = vector.shape_cast %92 : vector<1x96x72xbf16> to vector<96x72xbf16>
    %94 = arith.truncf %91 : vector<72x16xf32> to vector<72x16xbf16>
    %cst_98 = arith.constant dense<0.000000e+00> : vector<96x16xf32>
    %95 = tpu.matmul %93, %94, %cst_98 {dimension_numbers = #tpu.dot_dimension_numbers<[1], [0], [0], [1], [0, 0, 1, 1], [], []>} : vector<96x72xbf16>, vector<72x16xbf16>, vector<96x16xf32> -> vector<96x16xf32>
    %96 = arith.addf %87, %95 : vector<96x16xf32>
    %c0_99 = arith.constant 0 : index
    %c0_100 = arith.constant 0 : index
    %97 = vector.load %arg9[%c0_99, %c0_100] : memref<96x1xf32, #tpu.memory_space<vmem>>, vector<96x1xf32>
    %98 = vector.broadcast %97 : vector<96x1xf32> to vector<96x16xf32>
    %99 = arith.addf %96, %98 : vector<96x16xf32>
    %cst_101 = arith.constant 0.000000e+00 : f32
    %100 = vector.broadcast %cst_101 : f32 to vector<96x16xf32>
    %101 = arith.maximumf %99, %100 : vector<96x16xf32>
    %c0_102 = arith.constant 0 : index
    %c0_103 = arith.constant 0 : index
    %102 = vector.load %arg10[%c0_102, %c0_103] : memref<48x96xbf16, #tpu.memory_space<vmem>>, vector<48x96xbf16>
    %103 = arith.truncf %101 : vector<96x16xf32> to vector<96x16xbf16>
    %cst_104 = arith.constant dense<0.000000e+00> : vector<48x16xf32>
    %104 = tpu.matmul %102, %103, %cst_104 {dimension_numbers = #tpu.dot_dimension_numbers<[1], [0], [0], [1], [0, 0, 1, 1], [], []>} : vector<48x96xbf16>, vector<96x16xbf16>, vector<48x16xf32> -> vector<48x16xf32>
    %c0_105 = arith.constant 0 : index
    %c0_106 = arith.constant 0 : index
    %105 = vector.load %arg11[%c0_105, %c0_106] : memref<48x96xbf16, #tpu.memory_space<vmem>>, vector<48x96xbf16>
    %106 = arith.truncf %101 : vector<96x16xf32> to vector<96x16xbf16>
    %cst_107 = arith.constant dense<0.000000e+00> : vector<48x16xf32>
    %107 = tpu.matmul %105, %106, %cst_107 {dimension_numbers = #tpu.dot_dimension_numbers<[1], [0], [0], [1], [0, 0, 1, 1], [], []>} : vector<48x96xbf16>, vector<96x16xbf16>, vector<48x16xf32> -> vector<48x16xf32>
    %108 = arith.maximumf %104, %107 : vector<48x16xf32>
    %c0_108 = arith.constant 0 : index
    %c0_109 = arith.constant 0 : index
    %109 = vector.load %arg12[%c0_108, %c0_109] : memref<16x8xbf16, #tpu.memory_space<vmem>>, vector<16x8xbf16>
    %110 = arith.truncf %108 : vector<48x16xf32> to vector<48x16xbf16>
    %cst_110 = arith.constant dense<0.000000e+00> : vector<48x8xf32>
    %111 = tpu.matmul %110, %109, %cst_110 {dimension_numbers = #tpu.dot_dimension_numbers<[1], [0], [0], [1], [0, 0, 1, 1], [], []>} : vector<48x16xbf16>, vector<16x8xbf16>, vector<48x8xf32> -> vector<48x8xf32>
    %c0_111 = arith.constant 0 : index
    %c0_112 = arith.constant 0 : index
    %112 = vector.load %arg13[%c0_111, %c0_112] : memref<16x8xbf16, #tpu.memory_space<vmem>>, vector<16x8xbf16>
    %113 = arith.truncf %108 : vector<48x16xf32> to vector<48x16xbf16>
    %cst_113 = arith.constant dense<0.000000e+00> : vector<48x8xf32>
    %114 = tpu.matmul %113, %112, %cst_113 {dimension_numbers = #tpu.dot_dimension_numbers<[1], [0], [0], [1], [0, 0, 1, 1], [], []>} : vector<48x16xbf16>, vector<16x8xbf16>, vector<48x8xf32> -> vector<48x8xf32>
    %115 = arith.maximumf %111, %114 : vector<48x8xf32>
    %c0_114 = arith.constant 0 : index
    %c0_115 = arith.constant 0 : index
    %c0_116 = arith.constant 0 : index
    %116 = vector.load %arg15[%c0_114, %c0_115, %c0_116] : memref<4x8x2xbf16, #tpu.memory_space<vmem>>, vector<1x8x2xbf16>
    %117 = vector.shape_cast %116 : vector<1x8x2xbf16> to vector<8x2xbf16>
    %118 = arith.truncf %115 : vector<48x8xf32> to vector<48x8xbf16>
    %cst_117 = arith.constant dense<0.000000e+00> : vector<48x2xf32>
    %119 = tpu.matmul %118, %117, %cst_117 {dimension_numbers = #tpu.dot_dimension_numbers<[1], [0], [0], [1], [0, 0, 1, 1], [], []>} : vector<48x8xbf16>, vector<8x2xbf16>, vector<48x2xf32> -> vector<48x2xf32>
    %c0_118 = arith.constant 0 : index
    %c0_119 = arith.constant 0 : index
    %c0_120 = arith.constant 0 : index
    %120 = vector.load %arg14[%c0_118, %c0_119, %c0_120] : memref<4x120x48xbf16, #tpu.memory_space<vmem>>, vector<1x120x48xbf16>
    %121 = vector.shape_cast %120 : vector<1x120x48xbf16> to vector<120x48xbf16>
    %122 = arith.truncf %119 : vector<48x2xf32> to vector<48x2xbf16>
    %cst_121 = arith.constant dense<0.000000e+00> : vector<120x2xf32>
    %123 = tpu.matmul %121, %122, %cst_121 {dimension_numbers = #tpu.dot_dimension_numbers<[1], [0], [0], [1], [0, 0, 1, 1], [], []>} : vector<120x48xbf16>, vector<48x2xbf16>, vector<120x2xf32> -> vector<120x2xf32>
    %c1_122 = arith.constant 1 : index
    %c0_123 = arith.constant 0 : index
    %c0_124 = arith.constant 0 : index
    %124 = vector.load %arg15[%c1_122, %c0_123, %c0_124] : memref<4x8x2xbf16, #tpu.memory_space<vmem>>, vector<1x8x2xbf16>
    %125 = vector.shape_cast %124 : vector<1x8x2xbf16> to vector<8x2xbf16>
    %126 = arith.truncf %115 : vector<48x8xf32> to vector<48x8xbf16>
    %cst_125 = arith.constant dense<0.000000e+00> : vector<48x2xf32>
    %127 = tpu.matmul %126, %125, %cst_125 {dimension_numbers = #tpu.dot_dimension_numbers<[1], [0], [0], [1], [0, 0, 1, 1], [], []>} : vector<48x8xbf16>, vector<8x2xbf16>, vector<48x2xf32> -> vector<48x2xf32>
    %c1_126 = arith.constant 1 : index
    %c0_127 = arith.constant 0 : index
    %c0_128 = arith.constant 0 : index
    %128 = vector.load %arg14[%c1_126, %c0_127, %c0_128] : memref<4x120x48xbf16, #tpu.memory_space<vmem>>, vector<1x120x48xbf16>
    %129 = vector.shape_cast %128 : vector<1x120x48xbf16> to vector<120x48xbf16>
    %130 = arith.truncf %127 : vector<48x2xf32> to vector<48x2xbf16>
    %cst_129 = arith.constant dense<0.000000e+00> : vector<120x2xf32>
    %131 = tpu.matmul %129, %130, %cst_129 {dimension_numbers = #tpu.dot_dimension_numbers<[1], [0], [0], [1], [0, 0, 1, 1], [], []>} : vector<120x48xbf16>, vector<48x2xbf16>, vector<120x2xf32> -> vector<120x2xf32>
    %132 = arith.addf %123, %131 : vector<120x2xf32>
    %c2_130 = arith.constant 2 : index
    %c0_131 = arith.constant 0 : index
    %c0_132 = arith.constant 0 : index
    %133 = vector.load %arg15[%c2_130, %c0_131, %c0_132] : memref<4x8x2xbf16, #tpu.memory_space<vmem>>, vector<1x8x2xbf16>
    %134 = vector.shape_cast %133 : vector<1x8x2xbf16> to vector<8x2xbf16>
    %135 = arith.truncf %115 : vector<48x8xf32> to vector<48x8xbf16>
    %cst_133 = arith.constant dense<0.000000e+00> : vector<48x2xf32>
    %136 = tpu.matmul %135, %134, %cst_133 {dimension_numbers = #tpu.dot_dimension_numbers<[1], [0], [0], [1], [0, 0, 1, 1], [], []>} : vector<48x8xbf16>, vector<8x2xbf16>, vector<48x2xf32> -> vector<48x2xf32>
    %c2_134 = arith.constant 2 : index
    %c0_135 = arith.constant 0 : index
    %c0_136 = arith.constant 0 : index
    %137 = vector.load %arg14[%c2_134, %c0_135, %c0_136] : memref<4x120x48xbf16, #tpu.memory_space<vmem>>, vector<1x120x48xbf16>
    %138 = vector.shape_cast %137 : vector<1x120x48xbf16> to vector<120x48xbf16>
    %139 = arith.truncf %136 : vector<48x2xf32> to vector<48x2xbf16>
    %cst_137 = arith.constant dense<0.000000e+00> : vector<120x2xf32>
    %140 = tpu.matmul %138, %139, %cst_137 {dimension_numbers = #tpu.dot_dimension_numbers<[1], [0], [0], [1], [0, 0, 1, 1], [], []>} : vector<120x48xbf16>, vector<48x2xbf16>, vector<120x2xf32> -> vector<120x2xf32>
    %141 = arith.addf %132, %140 : vector<120x2xf32>
    %c3_138 = arith.constant 3 : index
    %c0_139 = arith.constant 0 : index
    %c0_140 = arith.constant 0 : index
    %142 = vector.load %arg15[%c3_138, %c0_139, %c0_140] : memref<4x8x2xbf16, #tpu.memory_space<vmem>>, vector<1x8x2xbf16>
    %143 = vector.shape_cast %142 : vector<1x8x2xbf16> to vector<8x2xbf16>
    %144 = arith.truncf %115 : vector<48x8xf32> to vector<48x8xbf16>
    %cst_141 = arith.constant dense<0.000000e+00> : vector<48x2xf32>
    %145 = tpu.matmul %144, %143, %cst_141 {dimension_numbers = #tpu.dot_dimension_numbers<[1], [0], [0], [1], [0, 0, 1, 1], [], []>} : vector<48x8xbf16>, vector<8x2xbf16>, vector<48x2xf32> -> vector<48x2xf32>
    %c3_142 = arith.constant 3 : index
    %c0_143 = arith.constant 0 : index
    %c0_144 = arith.constant 0 : index
    %146 = vector.load %arg14[%c3_142, %c0_143, %c0_144] : memref<4x120x48xbf16, #tpu.memory_space<vmem>>, vector<1x120x48xbf16>
    %147 = vector.shape_cast %146 : vector<1x120x48xbf16> to vector<120x48xbf16>
    %148 = arith.truncf %145 : vector<48x2xf32> to vector<48x2xbf16>
    %cst_145 = arith.constant dense<0.000000e+00> : vector<120x2xf32>
    %149 = tpu.matmul %147, %148, %cst_145 {dimension_numbers = #tpu.dot_dimension_numbers<[1], [0], [0], [1], [0, 0, 1, 1], [], []>} : vector<120x48xbf16>, vector<48x2xbf16>, vector<120x2xf32> -> vector<120x2xf32>
    %150 = arith.addf %141, %149 : vector<120x2xf32>
    %c0_146 = arith.constant 0 : index
    %c0_147 = arith.constant 0 : index
    %151 = vector.load %arg16[%c0_146, %c0_147] : memref<120x1xf32, #tpu.memory_space<vmem>>, vector<120x1xf32>
    %152 = vector.broadcast %151 : vector<120x1xf32> to vector<120x2xf32>
    %153 = arith.addf %150, %152 : vector<120x2xf32>
    %cst_148 = arith.constant 0.000000e+00 : f32
    %154 = vector.broadcast %cst_148 : f32 to vector<120x2xf32>
    %155 = arith.maximumf %153, %154 : vector<120x2xf32>
    %c0_149 = arith.constant 0 : index
    %c0_150 = arith.constant 0 : index
    %156 = vector.load %arg17[%c0_149, %c0_150] : memref<60x120xbf16, #tpu.memory_space<vmem>>, vector<60x120xbf16>
    %157 = arith.truncf %155 : vector<120x2xf32> to vector<120x2xbf16>
    %cst_151 = arith.constant dense<0.000000e+00> : vector<60x2xf32>
    %158 = tpu.matmul %156, %157, %cst_151 {dimension_numbers = #tpu.dot_dimension_numbers<[1], [0], [0], [1], [0, 0, 1, 1], [], []>} : vector<60x120xbf16>, vector<120x2xbf16>, vector<60x2xf32> -> vector<60x2xf32>
    %c0_152 = arith.constant 0 : index
    %c0_153 = arith.constant 0 : index
    %159 = vector.load %arg18[%c0_152, %c0_153] : memref<60x1xf32, #tpu.memory_space<vmem>>, vector<60x1xf32>
    %160 = vector.broadcast %159 : vector<60x1xf32> to vector<60x2xf32>
    %161 = arith.addf %158, %160 : vector<60x2xf32>
    %cst_154 = arith.constant 0.000000e+00 : f32
    %162 = vector.broadcast %cst_154 : f32 to vector<60x2xf32>
    %163 = arith.maximumf %161, %162 : vector<60x2xf32>
    %c0_155 = arith.constant 0 : index
    %c0_156 = arith.constant 0 : index
    %164 = vector.load %arg19[%c0_155, %c0_156] : memref<10x60xbf16, #tpu.memory_space<vmem>>, vector<10x60xbf16>
    %165 = arith.truncf %163 : vector<60x2xf32> to vector<60x2xbf16>
    %cst_157 = arith.constant dense<0.000000e+00> : vector<10x2xf32>
    %166 = tpu.matmul %164, %165, %cst_157 {dimension_numbers = #tpu.dot_dimension_numbers<[1], [0], [0], [1], [0, 0, 1, 1], [], []>} : vector<10x60xbf16>, vector<60x2xbf16>, vector<10x2xf32> -> vector<10x2xf32>
    %c0_158 = arith.constant 0 : index
    %c0_159 = arith.constant 0 : index
    %167 = vector.load %arg20[%c0_158, %c0_159] : memref<10x1xf32, #tpu.memory_space<vmem>>, vector<10x1xf32>
    %168 = vector.broadcast %167 : vector<10x1xf32> to vector<10x2xf32>
    %169 = arith.addf %166, %168 : vector<10x2xf32>
    %c0_160 = arith.constant 0 : index
    %c0_161 = arith.constant 0 : index
    %170 = vector.load %arg21[%c0_160, %c0_161] : memref<10x2xf32, #tpu.memory_space<vmem>>, vector<10x2xf32>
    tpu.vector_store %arg21[%c0_160, %c0_161], %169 {strides = array<i32>} : memref<10x2xf32, #tpu.memory_space<vmem>>, vector<10x2xf32>,
    return
  }
}

</mosaic_0001>

<bundles_post_ra>
// kernel: network_forward.1
= control target key start
LH: loop header
LB: loop body
LE: loop exit
PB: predicated region body
PF: predicated region fallthrough
CT: control target
= control target key end

     0   :  { %vm73_vm0 = vcmask 195584   ;;  %s5655_s28 = smov 127   ;;  %s5656_s29 = smov 24   ;;  %v5657_v6 = vmov 0   ;;  %vm77_vm1 = vcmask 191488   ;;  %vm532_vm2 = vcmask 97280   ;;  %s6851_s0 = inlined_call_operand.vmem [shape: f32[2,28,28], index: 0, kind: input, shape index: {}]   ;;  %s6852_s1 = inlined_call_operand.vmem [shape: bf16[144,140], index: 1, kind: input, shape index: {}]   ;;  %s6853_s2 = inlined_call_operand.vmem [shape: f32[144,1], index: 2, kind: input, shape index: {}]   ;;  %s6854_s9 = inlined_call_operand.vmem [shape: f32[96,1], index: 9, kind: input, shape index: {}]   ;;  %s6855_s16 = inlined_call_operand.vmem [shape: f32[120,1], index: 16, kind: input, shape index: {}]   ;;  %s6856_s18 = inlined_call_operand.vmem [shape: f32[60,1], index: 18, kind: input, shape index: {}]   ;;  %s6857_s20 = inlined_call_operand.vmem [shape: f32[10,1], index: 20, kind: input, shape index: {}]   ;;  %s6858_s3 = inlined_call_operand.vmem [shape: bf16[72,144], index: 3, kind: input, shape index: {}]   ;;  %s6859_s4 = inlined_call_operand.vmem [shape: bf16[72,144], index: 4, kind: input, shape index: {}]   ;;  %s6860_s5 = inlined_call_operand.vmem [shape: bf16[48,24], index: 5, kind: input, shape index: {}]   ;;  %s6861_s6 = inlined_call_operand.vmem [shape: bf16[48,24], index: 6, kind: input, shape index: {}]   ;;  %s6862_s8 = inlined_call_operand.vmem [shape: bf16[5,24,16], index: 8, kind: input, shape index: {}]   ;;  %s6863_s7 = inlined_call_operand.vmem [shape: bf16[5,96,72], index: 7, kind: input, shape index: {}]   ;;  %s6864_s10 = inlined_call_operand.vmem [shape: bf16[48,96], index: 10, kind: input, shape index: {}]   ;;  %s6865_s11 = inlined_call_operand.vmem [shape: bf16[48,96], index: 11, kind: input, shape index: {}]   ;;  %s6866_s12 = inlined_call_operand.vmem [shape: bf16[16,8], index: 12, kind: input, shape index: {}]   ;;  %s6867_s13 = inlined_call_operand.vmem [shape: bf16[16,8], index: 13, kind: input, shape index: {}]   ;;  %s6868_s15 = inlined_call_operand.vmem [shape: bf16[4,8,2], index: 15, kind: input, shape index: {}]   ;;  %s6869_s14 = inlined_call_operand.vmem [shape: bf16[4,120,48], index: 14, kind: input, shape index: {}]   ;;  %s6870_s17 = inlined_call_operand.vmem [shape: bf16[60,120], index: 17, kind: input, shape index: {}]   ;;  %s6871_s19 = inlined_call_operand.vmem [shape: bf16[10,60], index: 19, kind: input, shape index: {}]   ;;  %s6872_s21 = inlined_call_operand.vmem [shape: f32[10,2], index: 21, kind: output, shape index: {}]  }
   0x1   :  { %6879 = sst [smem:[#allocation3_spill]] %s6851_s0  ;;  %564 = vmatprep.subr.bf16.mxu0 %v5657_v6  ;;  %5508 = vset.pattern.permute.xlu1 %v5657_v6  ;;  %s5658_s0 = smov 23   ;;  %vm100_vm3 = vcmask 392384   ;;  %vm104_vm4 = vcmask 388288   ;;  %vm560_vm5 = vcmask 1045504   ;;  %vm747_vm6 = vcmask 130048  }
   0x2   :  { %6880 = sst [smem:[#allocation4_spill]] %s6852_s1  ;;  %s6885_s26 = sld [smem:[#allocation3_spill]]  ;;  %5507 = vset.pattern.permute.xlu0 %v5657_v6  ;;  %763 = vmatprep.subr.bf16.mxu1 %v5657_v6  ;;  %vm5666_vm7 = vmmov 0   ;;  %vm1011_vm8 = vcmask 392192   ;;  %vm1236_vm9 = vcmask 1043456   ;;  %vm1465_vm10 = vcmask 588800  }
   0x3   :  { %6881 = sst [smem:[#allocation5_spill]] %s6853_s2  ;;  %s5661_s2 = smov 125   ;;  %vm2573_vm11 = vcmask 785408   ;;  %vm2885_vm12 = vcmask 64512   ;;  %vm4082_vm13 = vcmask 982016   ;;  %vm4194_vm14 = vcmask 490496  }
   0x4   :  { %6882 = sst [smem:[#allocation6_spill]] %s6854_s9  ;;  %s5662_s27 = smov 21   ;;  %vm4242_vm15 = vcmask 15360  }
   0x5   :  { %6883 = sst [smem:[#allocation7_spill]] %s6855_s16  ;;  %s5664_s22 = smov 20  }
   0x6   :  { %6884 = sst [smem:[#allocation8_spill]] %s6856_s18  ;;  %s5659_s18 = smov 126  }
   0x7   :  { %s6886_s25 = sld [smem:[#allocation4_spill]]  ;;  %s6889_s24 = sld [smem:[#allocation7_spill]] }
   0x8   :  { %v106_v0 = vld [vmem:[%s6885_s26] sm:$0xff]  ;;  %v5787_v2 = vld [vmem:[%s6885_s26 + $0x30] sm:$0xff]  ;;  %v4251_v3 = vld [vmem:[%s6885_s26 + $0x28] sm:$0xff]  ;;  %s6890_s16 = sld [smem:[#allocation8_spill]] }
   0x9   :  { %v4250_v1 = vld [vmem:[%s6885_s26 + $0x20] sm:$0xff]  ;;  %114 = vrot.lane.b32.xlu1 %v106_v0, %s5655_s28  ;;  %74 = vst.msk [vmem:[#allocation2] sm:$0xff] %vm73_vm0, %v106_v0  ;;  %v108_v4 = vld [vmem:[%s6885_s26 + $0x10] sm:$0xff]  ;;  %v107_v5 = vld [vmem:[%s6885_s26 + $0x8] sm:$0xff] }
   0xa   :  { %88 = vrot.lane.b32.xlu0 %v4250_v1, %s5656_s29  ;;  %76 = vst.msk [vmem:[#allocation2 + $0x10] sm:$0xff] %vm73_vm0, %v108_v4  ;;  %75 = vst.msk [vmem:[#allocation2 + $0x8] sm:$0xff] %vm73_vm0, %v107_v5  ;;  %v4253_v7 = vld [vmem:[%s6885_s26 + $0x38] sm:$0xf] }
   0xb   :  { %v72_v8 = vld [vmem:[%s6885_s26 + $0x18] sm:$0xf] }
   0xc   :  { %78 = vst.msk [vmem:[#allocation2 + $0x18] sm:$0xf] %vm77_vm1, %v72_v8  ;;  %v109_v9 = vld [vmem:[%s6885_s26 + $0x18] sm:$0xf] }
   0xd   :  { %92 = vrot.lane.b32.xlu1 %v5787_v2, %s5656_s29  ;;  %v4257_v10 = vld [vmem:[%s6885_s26 + $0x38] sm:$0xf]  ;;  %v5511_v17 = vld [vmem:[%s6886_s25 + $0x4] ss:$8 sps:$4 sm:$0xff]  }
   0xe   :  { %90 = vrot.lane.b32.xlu0 %v4251_v3, %s5656_s29  ;;  %v157_v11 = vld [vmem:[%s6885_s26 + $0x18] sm:$0xf]  ;;  %4288 = vmatprep.mubr.msk.bf16.mxu0 %vm532_vm2, %v5511_v17 }
   0xf   :  { %v4261_v12 = vld [vmem:[%s6885_s26 + $0x38] sm:$0xf] }
  0x10   :  { %v205_v13 = vld [vmem:[%s6885_s26 + $0x18] sm:$0xf] }
  0x11   :  { %138 = vrot.lane.b32.xlu1 %v4250_v1, %s5658_s0  ;;  %v4265_v14 = vld [vmem:[%s6885_s26 + $0x38] sm:$0xf] }
  0x12   :  { %94 = vrot.lane.b32.xlu0 %v4253_v7, %s5656_s29  ;;  %s5660_s29 = smov 22   ;;  %v253_v15 = vld [vmem:[%s6885_s26 + $0x18] sm:$0xf] }
  0x13   :  { %v4269_v16 = vld [vmem:[%s6885_s26 + $0x38] sm:$0xf] }
  0x15   :  { %118 = vrot.lane.b32.xlu1 %v108_v4, %s5655_s28 }
  0x16   :  { %116 = vrot.lane.b32.xlu0 %v107_v5, %s5655_s28 }
  0x19   :  { %142 = vrot.lane.b32.xlu1 %v5787_v2, %s5658_s0 }
  0x1a   :  { %140 = vrot.lane.b32.xlu0 %v4251_v3, %s5658_s0 }
  0x1d   :  { %162 = vrot.lane.b32.xlu1 %v106_v0, %s5659_s18 }
  0x1e   :  { %120 = vrot.lane.b32.xlu0 %v109_v9, %s5655_s28  ;;  %s6888_s28 = sld [smem:[#allocation6_spill]]  ;;  %v3879_v9 = vld [vmem:[%s6889_s24 + $0x8] sm:$0xff] }
  0x21   :  { %186 = vrot.lane.b32.xlu1 %v4250_v1, %s5660_s29 }
  0x22   :  { %144 = vrot.lane.b32.xlu0 %v4257_v10, %s5658_s0  ;;  %s6887_s0 = sld [smem:[#allocation5_spill]]  ;;  %v3880_v10 = vld [vmem:[%s6889_s24 + $0x10] sm:$0xff] }
  0x24   :  { %v2450_v36 = vld [vmem:[%s6888_s28] sm:$0xff]  ;;  %v2452_v39 = vld [vmem:[%s6888_s28 + $0x10] sm:$0xff]  ;;  %v2451_v40 = vld [vmem:[%s6888_s28 + $0x8] sm:$0xff] }
  0x25   :  { %166 = vrot.lane.b32.xlu1 %v108_v4, %s5659_s18  ;;  %v2453_v43 = vld [vmem:[%s6888_s28 + $0x18] sm:$0xff]  ;;  %v2454_v44 = vld [vmem:[%s6888_s28 + $0x20] sm:$0xff]  ;;  %v2456_v47 = vld [vmem:[%s6888_s28 + $0x30] sm:$0xff] }
  0x26   :  { %164 = vrot.lane.b32.xlu0 %v107_v5, %s5659_s18  ;;  %v2455_v48 = vld [vmem:[%s6888_s28 + $0x28] sm:$0xff]  ;;  %v2457_v54 = vld [vmem:[%s6888_s28 + $0x38] sm:$0xff]  ;;  %v2458_v55 = vld [vmem:[%s6888_s28 + $0x40] sm:$0xff] }
  0x27   :  { %v2460_v61 = vld [vmem:[%s6888_s28 + $0x50] sm:$0xff]  ;;  %v2459_v62 = vld [vmem:[%s6888_s28 + $0x48] sm:$0xff] }
  0x28   :  { %v344_v18 = vld [vmem:[%s6887_s0 + $0x8] sm:$0xff]  ;;  %v343_v19 = vld [vmem:[%s6887_s0] sm:$0xff]  ;;  %v345_v20 = vld [vmem:[%s6887_s0 + $0x10] sm:$0xff] }
  0x29   :  { %190 = vrot.lane.b32.xlu1 %v5787_v2, %s5660_s29  ;;  %v347_v21 = vld [vmem:[%s6887_s0 + $0x20] sm:$0xff]  ;;  %v346_v22 = vld [vmem:[%s6887_s0 + $0x18] sm:$0xff]  ;;  %v348_v23 = vld [vmem:[%s6887_s0 + $0x28] sm:$0xff] }
  0x2a   :  { %188 = vrot.lane.b32.xlu0 %v4251_v3, %s5660_s29  ;;  %v349_v24 = vld [vmem:[%s6887_s0 + $0x30] sm:$0xff]  ;;  %v351_v25 = vld [vmem:[%s6887_s0 + $0x40] sm:$0xff]  ;;  %v350_v26 = vld [vmem:[%s6887_s0 + $0x38] sm:$0xff] }
  0x2b   :  { %v352_v27 = vld [vmem:[%s6887_s0 + $0x48] sm:$0xff]  ;;  %v353_v28 = vld [vmem:[%s6887_s0 + $0x50] sm:$0xff]  ;;  %v355_v29 = vld [vmem:[%s6887_s0 + $0x60] sm:$0xff] }
  0x2c   :  { %v354_v30 = vld [vmem:[%s6887_s0 + $0x58] sm:$0xff]  ;;  %v356_v31 = vld [vmem:[%s6887_s0 + $0x68] sm:$0xff]  ;;  %v357_v32 = vld [vmem:[%s6887_s0 + $0x70] sm:$0xff] }
  0x2d   :  { %210 = vrot.lane.b32.xlu1 %v106_v0, %s5661_s2  ;;  %v359_v33 = vld [vmem:[%s6887_s0 + $0x80] sm:$0xff]  ;;  %v358_v34 = vld [vmem:[%s6887_s0 + $0x78] sm:$0xff]  ;;  %v360_v35 = vld [vmem:[%s6887_s0 + $0x88] sm:$0xff] }
  0x2e   :  { %168 = vrot.lane.b32.xlu0 %v157_v11, %s5659_s18  ;;  %s5663_s18 = smov 124  }
  0x31   :  { %192 = vrot.lane.b32.xlu1 %v4261_v12, %s5660_s29 }
  0x32   :  { %212 = vrot.lane.b32.xlu0 %v107_v5, %s5661_s2 }
  0x35   :  { %236 = vrot.lane.b32.xlu1 %v4251_v3, %s5662_s27 }
  0x36   :  { %234 = vrot.lane.b32.xlu0 %v4250_v1, %s5662_s27 }
  0x39   :  { %216 = vrot.lane.b32.xlu1 %v205_v13, %s5661_s2  ;;  %v3881_v13 = vld [vmem:[%s6889_s24 + $0x18] sm:$0xff] }
  0x3a   :  { %214 = vrot.lane.b32.xlu0 %v108_v4, %s5661_s2 }
  0x3d   :  { %240 = vrot.lane.b32.xlu1 %v4265_v14, %s5662_s27  ;;  %v3882_v14 = vld [vmem:[%s6889_s24 + $0x20] sm:$0xff] }
  0x3e   :  { %238 = vrot.lane.b32.xlu0 %v5787_v2, %s5662_s27 }
  0x41   :  { %260 = vrot.lane.b32.xlu1 %v107_v5, %s5663_s18 }
  0x42   :  { %258 = vrot.lane.b32.xlu0 %v106_v0, %s5663_s18 }
  0x45   :  { %284 = vrot.lane.b32.xlu1 %v4251_v3, %s5664_s22 }
  0x46   :  { %282 = vrot.lane.b32.xlu0 %v4250_v1, %s5664_s22  ;;  %v2461_v1 = vld [vmem:[%s6888_s28 + $0x58] sm:$0xff] }
  0x49   :  { %264 = vrot.lane.b32.xlu1 %v253_v15, %s5663_s18 }
  0x4a   :  { %262 = vrot.lane.b32.xlu0 %v108_v4, %s5663_s18 }
  0x4d   :  { %288 = vrot.lane.b32.xlu1 %v4269_v16, %s5664_s22 }
  0x4e   :  { %286 = vrot.lane.b32.xlu0 %v5787_v2, %s5664_s22  ;;  %v3878_v2 = vld [vmem:[%s6889_s24] sm:$0xff] }
  0x51   :  { %368 = vperm.xlu1 %5508, %v344_v18  }
  0x52   :  { %363 = vperm.xlu0 %5507, %v343_v19  }
  0x55   :  { %373 = vperm.xlu1 %5508, %v345_v20   ;;  %v3883_v20 = vld [vmem:[%s6889_s24 + $0x28] sm:$0xff] }
  0x56   :  { %378 = vperm.xlu0 %5507, %v346_v22  }
  0x59   :  { %383 = vperm.xlu1 %5508, %v347_v21   ;;  %v3884_v21 = vld [vmem:[%s6889_s24 + $0x30] sm:$0xff] }
  0x5a   :  { %388 = vperm.xlu0 %5507, %v348_v23  }
  0x5d   :  { %393 = vperm.xlu1 %5508, %v349_v24   ;;  %v3885_v24 = vld [vmem:[%s6889_s24 + $0x38] sm:$0xff] }
  0x5e   :  { %398 = vperm.xlu0 %5507, %v350_v26  }
  0x61   :  { %403 = vperm.xlu1 %5508, %v351_v25   ;;  %v3886_v25 = vld [vmem:[%s6889_s24 + $0x40] sm:$0xff] }
  0x62   :  { %408 = vperm.xlu0 %5507, %v352_v27  }
  0x65   :  { %413 = vperm.xlu1 %5508, %v353_v28  }
  0x66   :  { %418 = vperm.xlu0 %5507, %v354_v30  }
  0x69   :  { %423 = vperm.xlu1 %5508, %v355_v29  }
  0x6a   :  { %428 = vperm.xlu0 %5507, %v356_v31   ;;  %v3887_v31 = vld [vmem:[%s6889_s24 + $0x48] sm:$0xff] }
  0x6d   :  { %433 = vperm.xlu1 %5508, %v357_v32   ;;  %v3888_v32 = vld [vmem:[%s6889_s24 + $0x50] sm:$0xff] }
  0x6e   :  { %438 = vperm.xlu0 %5507, %v358_v34  }
  0x71   :  { %443 = vperm.xlu1 %5508, %v359_v33  }
  0x72   :  { %448 = vperm.xlu0 %5507, %v360_v35   ;;  %v3889_v35 = vld [vmem:[%s6889_s24 + $0x58] sm:$0xff] }
  0x75   :  { %2464 = vperm.xlu1 %5508, %v2450_v36   ;;  %v3890_v36 = vld [vmem:[%s6889_s24 + $0x60] sm:$0xff] }
  0x76   :  { %2469 = vperm.xlu0 %5507, %v2451_v40   ;;  %v3892_v40 = vld [vmem:[%s6889_s24 + $0x70] sm:$0xff] }
  0x79   :  { %2474 = vperm.xlu1 %5508, %v2452_v39   ;;  %v3891_v39 = vld [vmem:[%s6889_s24 + $0x68] sm:$0xff] }
  0x7a   :  { %2479 = vperm.xlu0 %5507, %v2453_v43  }
  0x7b   :  { %v115_v37 = vpop.permute.xlu1 %114 }
  0x7c   :  { %v89_v38 = vpop.permute.xlu0 %88  ;;  %126 = vst.msk [vmem:[#allocation2 + $0x1c] sm:$0xff] %vm73_vm0, %v115_v37 }
  0x7d   :  { %101 = vst.msk [vmem:[#allocation2] sm:$0xff] %vm100_vm3, %v89_v38  ;;  %2484 = vperm.xlu1 %5508, %v2454_v44  }
  0x7e   :  { %2489 = vperm.xlu0 %5507, %v2455_v48  }
  0x7f   :  { %v93_v41 = vpop.permute.xlu1 %92 }
  0x80   :  { %v91_v42 = vpop.permute.xlu0 %90  ;;  %103 = vst.msk [vmem:[#allocation2 + $0x10] sm:$0xff] %vm100_vm3, %v93_v41 }
  0x81   :  { %102 = vst.msk [vmem:[#allocation2 + $0x8] sm:$0xff] %vm100_vm3, %v91_v42  ;;  %2494 = vperm.xlu1 %5508, %v2456_v47   ;;  %v4015_v47 = vld [vmem:[%s6890_s16 + $0x8] sm:$0xff] }
  0x82   :  { %2499 = vperm.xlu0 %5507, %v2457_v54  }
  0x83   :  { %v139_v45 = vpop.permute.xlu1 %138 }
  0x84   :  { %v95_v46 = vpop.permute.xlu0 %94  ;;  %150 = vst.msk [vmem:[#allocation2 + $0x1c] sm:$0xff] %vm100_vm3, %v139_v45  ;;  %v298_v51 = vld [vmem:[#allocation2] sm:$0xff] }
  0x85   :  { %105 = vst.msk [vmem:[#allocation2 + $0x18] sm:$0xf] %vm104_vm4, %v95_v46  ;;  %2504 = vperm.xlu1 %5508, %v2458_v55   ;;  %v4014_v46 = vld [vmem:[%s6890_s16] sm:$0xff] }
  0x86   :  { %2509 = vperm.xlu0 %5507, %v2459_v62   ;;  %v4021_v62 = vld [vmem:[%s6890_s16 + $0x38] sm:$0xf] }
  0x87   :  { %v119_v49 = vpop.permute.xlu1 %118  ;;  %v300_v58 = vld [vmem:[#allocation2 + $0x10] sm:$0xff] }
  0x88   :  { %v117_v50 = vpop.permute.xlu0 %116  ;;  %v299_v52 = vld [vmem:[#allocation2 + $0x8] sm:$0xff]  ;;  %128 = vst.msk [vmem:[#allocation2 + $0x2c] sm:$0xff] %vm73_vm0, %v119_v49 }
  0x89   :  { %127 = vst.msk [vmem:[#allocation2 + $0x24] sm:$0xff] %vm73_vm0, %v117_v50  ;;  %v334_v53 = vpack.c.bf16 %v299_v52, %v298_v51  ;;  %2514 = vperm.xlu1 %5508, %v2460_v61   ;;  %v4016_v50 = vld [vmem:[%s6890_s16 + $0x10] sm:$0xff]  ;;  %v4017_v51 = vld [vmem:[%s6890_s16 + $0x18] sm:$0xff] }
  0x8a   :  { %2519 = vperm.xlu0 %5507, %v2461_v1   ;;  %v4020_v61 = vld [vmem:[%s6890_s16 + $0x30] sm:$0xff] }
  0x8b   :  { %565 = vmatpush1.bf16.msra.mxu0 %v334_v53  ;;  %v143_v56 = vpop.permute.xlu1 %142 }
  0x8c   :  { %v141_v57 = vpop.permute.xlu0 %140  ;;  %566 = vmatprep.subr.bf16.mxu0 %v5657_v6  ;;  %v301_v59 = vld [vmem:[#allocation2 + $0x18] sm:$0xff]  ;;  %152 = vst.msk [vmem:[#allocation2 + $0x2c] sm:$0xff] %vm100_vm3, %v143_v56 }
  0x8d   :  { %151 = vst.msk [vmem:[#allocation2 + $0x24] sm:$0xff] %vm100_vm3, %v141_v57  ;;  %v335_v60 = vpack.c.bf16 %v301_v59, %v300_v58  ;;  %3895 = vperm.xlu1 %5508, %v3878_v2   ;;  %v4018_v57 = vld [vmem:[%s6890_s16 + $0x20] sm:$0xff]  ;;  %v4019_v58 = vld [vmem:[%s6890_s16 + $0x28] sm:$0xff] }
  0x8e   :  { %3900 = vperm.xlu0 %5507, %v3879_v9  }
  0x8f   :  { %567 = vmatpush1.bf16.msra.mxu0 %v335_v60  ;;  %v163_v63 = vpop.permute.xlu1 %162 }
  0x90   :  { %v121_v0 = vpop.permute.xlu0 %120  ;;  %568 = vmatprep.subr.bf16.mxu0 %v5657_v6  ;;  %174 = vst.msk [vmem:[#allocation2 + $0x38] sm:$0xff] %vm73_vm0, %v163_v63 }
  0x91   :  { %129 = vst.msk [vmem:[#allocation2 + $0x34] sm:$0xf] %vm77_vm1, %v121_v0  ;;  %3905 = vperm.xlu1 %5508, %v3880_v10  }
  0x92   :  { %3910 = vperm.xlu0 %5507, %v3881_v13   ;;  %v5514_v13 = vld [vmem:[%s6886_s25 + $0x10] ss:$8 sps:$4 sm:$0xff]  }
  0x93   :  { %v187_v3 = vpop.permute.xlu1 %186 }
  0x94   :  { %v145_v4 = vpop.permute.xlu0 %144  ;;  %v302_v5 = vld [vmem:[#allocation2 + $0x20] sm:$0xff]  ;;  %v303_v7 = vld [vmem:[#allocation2 + $0x28] sm:$0xff]  ;;  %198 = vst.msk [vmem:[#allocation2 + $0x38] sm:$0xff] %vm100_vm3, %v187_v3 }
  0x95   :  { %153 = vst.msk [vmem:[#allocation2 + $0x34] sm:$0xf] %vm104_vm4, %v145_v4  ;;  %v336_v8 = vpack.c.bf16 %v303_v7, %v302_v5  ;;  %3915 = vperm.xlu1 %5508, %v3882_v14   ;;  %v4177_v4 = vld [vmem:[%s6857_s20] sm:$0xff]  ;;  %v4178_v5 = vld [vmem:[%s6857_s20 + $0x8] sm:$0x3] }
  0x96   :  { %3920 = vperm.xlu0 %5507, %v3883_v20   ;;  %v5515_v14 = vld [vmem:[%s6886_s25 + $0x24] ss:$8 sps:$4 sm:$0xff]   ;;  %v5524_v20 = vld [vmem:[%s6886_s25 + $0x54] ss:$8 sps:$4 sm:$0xff]  }
  0x97   :  { %569 = vmatpush1.bf16.msra.mxu0 %v336_v8  ;;  %v167_v11 = vpop.permute.xlu1 %166 }
  0x98   :  { %v165_v12 = vpop.permute.xlu0 %164  ;;  %570 = vmatprep.subr.bf16.mxu0 %v5657_v6  ;;  %176 = vst.msk [vmem:[#allocation2 + $0x48] sm:$0xff] %vm73_vm0, %v167_v11  ;;  %v5509_v11 = vld [vmem:[%s6886_s25] ss:$8 sps:$4 sm:$0xff]  }
  0x99   :  { %175 = vst.msk [vmem:[#allocation2 + $0x40] sm:$0xff] %vm73_vm0, %v165_v12  ;;  %3925 = vperm.xlu1 %5508, %v3884_v21   ;;  %v5512_v12 = vld [vmem:[%s6886_s25 + $0x14] ss:$8 sps:$4 sm:$0xff]   ;;  %v5526_v21 = vld [vmem:[%s6886_s25 + $0x50] ss:$8 sps:$4 sm:$0xff]  }
  0x9a   :  { %3930 = vperm.xlu0 %5507, %v3885_v24   ;;  %v5530_v24 = vld [vmem:[%s6886_s25 + $0x74] ss:$8 sps:$4 sm:$0xff]  }
  0x9b   :  { %v191_v15 = vpop.permute.xlu1 %190  ;;  %v305_v18 = vld [vmem:[#allocation2 + $0x38] sm:$0xff] }
  0x9c   :  { %v189_v16 = vpop.permute.xlu0 %188  ;;  %v304_v17 = vld [vmem:[#allocation2 + $0x30] sm:$0xff]  ;;  %200 = vst.msk [vmem:[#allocation2 + $0x48] sm:$0xff] %vm100_vm3, %v191_v15  ;;  %v5517_v15 = vld [vmem:[%s6886_s25 + $0x20] ss:$8 sps:$4 sm:$0xff]  }
  0x9d   :  { %199 = vst.msk [vmem:[#allocation2 + $0x40] sm:$0xff] %vm100_vm3, %v189_v16  ;;  %v337_v19 = vpack.c.bf16 %v305_v18, %v304_v17  ;;  %3935 = vperm.xlu1 %5508, %v3886_v25   ;;  %v5518_v16 = vld [vmem:[%s6886_s25 + $0x34] ss:$8 sps:$4 sm:$0xff]   ;;  %v5520_v17 = vld [vmem:[%s6886_s25 + $0x30] ss:$8 sps:$4 sm:$0xff]  }
  0x9e   :  { %3940 = vperm.xlu0 %5507, %v3887_v31   ;;  %v5521_v18 = vld [vmem:[%s6886_s25 + $0x44] ss:$8 sps:$4 sm:$0xff]   ;;  %v5532_v25 = vld [vmem:[%s6886_s25 + $0x70] ss:$8 sps:$4 sm:$0xff]  }
  0x9f   :  { %571 = vmatpush1.bf16.msra.mxu0 %v337_v19  ;;  %v211_v22 = vpop.permute.xlu1 %210  ;;  %v5523_v19 = vld [vmem:[%s6886_s25 + $0x40] ss:$8 sps:$4 sm:$0xff]  }
  0xa0   :  { %v169_v23 = vpop.permute.xlu0 %168  ;;  %572 = vmatprep.subr.bf16.mxu0 %v5657_v6  ;;  %222 = vst.msk [vmem:[#allocation2 + $0x54] sm:$0xff] %vm73_vm0, %v211_v22  ;;  %v5527_v22 = vld [vmem:[%s6886_s25 + $0x64] ss:$8 sps:$4 sm:$0xff]  }
  0xa1   :  { %177 = vst.msk [vmem:[#allocation2 + $0x50] sm:$0xf] %vm77_vm1, %v169_v23  ;;  %3945 = vperm.xlu1 %5508, %v3888_v32   ;;  %v5529_v23 = vld [vmem:[%s6886_s25 + $0x60] ss:$8 sps:$4 sm:$0xff]  }
  0xa2   :  { %3950 = vperm.xlu0 %5507, %v3889_v35  }
  0xa3   :  { %v193_v26 = vpop.permute.xlu1 %192  ;;  %v307_v29 = vld [vmem:[#allocation2 + $0x48] sm:$0xff] }
  0xa4   :  { %v213_v27 = vpop.permute.xlu0 %212  ;;  %v306_v28 = vld [vmem:[#allocation2 + $0x40] sm:$0xff]  ;;  %201 = vst.msk [vmem:[#allocation2 + $0x50] sm:$0xf] %vm104_vm4, %v193_v26 }
  0xa5   :  { %223 = vst.msk [vmem:[#allocation2 + $0x5c] sm:$0xff] %vm73_vm0, %v213_v27  ;;  %v338_v30 = vpack.c.bf16 %v307_v29, %v306_v28  ;;  %3955 = vperm.xlu1 %5508, %v3890_v36   ;;  %v5533_v26 = vld [vmem:[%s6886_s25 + $0x84] ss:$8 sps:$4 sm:$0xff]   ;;  %v5535_v27 = vld [vmem:[%s6886_s25 + $0x80] ss:$8 sps:$4 sm:$0xff]  }
  0xa6   :  { %3960 = vperm.xlu0 %5507, %v3891_v39   ;;  %v5538_v28 = vld [vmem:[%s6858_s3 + $0x4] ss:$8 sps:$4 sm:$0xff]  }
  0xa7   :  { %573 = vmatpush1.bf16.msra.mxu0 %v338_v30  ;;  %v237_v33 = vpop.permute.xlu1 %236  ;;  %4307 = vmatprep.mubr.msk.bf16.mxu1 %vm747_vm6, %v5538_v28 }
  0xa8   :  { %v235_v34 = vpop.permute.xlu0 %234  ;;  %574 = vmatprep.subr.bf16.mxu0 %v5657_v6  ;;  %247 = vst.msk [vmem:[#allocation2 + $0x5c] sm:$0xff] %vm100_vm3, %v237_v33 }
  0xa9   :  { %246 = vst.msk [vmem:[#allocation2 + $0x54] sm:$0xff] %vm100_vm3, %v235_v34  ;;  %3965 = vperm.xlu1 %5508, %v3892_v40  }
  0xaa   :  { %4024 = vperm.xlu0 %5507, %v4014_v46  }
  0xab   :  { %v217_v37 = vpop.permute.xlu1 %216 }
  0xac   :  { %v215_v38 = vpop.permute.xlu0 %214  ;;  %225 = vst.msk [vmem:[#allocation2 + $0x6c] sm:$0xf] %vm77_vm1, %v217_v37 }
  0xad   :  { %224 = vst.msk [vmem:[#allocation2 + $0x64] sm:$0xff] %vm73_vm0, %v215_v38  ;;  %4029 = vperm.xlu1 %5508, %v4015_v47  }
  0xae   :  { %4034 = vperm.xlu0 %5507, %v4016_v50  }
  0xaf   :  { %v241_v41 = vpop.permute.xlu1 %240 }
  0xb0   :  { %v239_v42 = vpop.permute.xlu0 %238  ;;  %v308_v43 = vld [vmem:[#allocation2 + $0x50] sm:$0xff]  ;;  %v309_v44 = vld [vmem:[#allocation2 + $0x58] sm:$0xff]  ;;  %249 = vst.msk [vmem:[#allocation2 + $0x6c] sm:$0xf] %vm104_vm4, %v241_v41 }
  0xb1   :  { %248 = vst.msk [vmem:[#allocation2 + $0x64] sm:$0xff] %vm100_vm3, %v239_v42  ;;  %v339_v45 = vpack.c.bf16 %v309_v44, %v308_v43  ;;  %4039 = vperm.xlu1 %5508, %v4017_v51  }
  0xb2   :  { %4044 = vperm.xlu0 %5507, %v4018_v57  }
  0xb3   :  { %575 = vmatpush1.bf16.msra.mxu0 %v339_v45  ;;  %v261_v48 = vpop.permute.xlu1 %260 }
  0xb4   :  { %v259_v49 = vpop.permute.xlu0 %258  ;;  %576 = vmatprep.subr.bf16.mxu0 %v5657_v6  ;;  %271 = vst.msk [vmem:[#allocation2 + $0x78] sm:$0xff] %vm73_vm0, %v261_v48 }
  0xb5   :  { %270 = vst.msk [vmem:[#allocation2 + $0x70] sm:$0xff] %vm73_vm0, %v259_v49  ;;  %4049 = vperm.xlu1 %5508, %v4019_v58  }
  0xb6   :  { %4054 = vperm.xlu0 %5507, %v4020_v61  }
  0xb7   :  { %v285_v52 = vpop.permute.xlu1 %284 }
  0xb8   :  { %v283_v53 = vpop.permute.xlu0 %282  ;;  %v310_v54 = vld [vmem:[#allocation2 + $0x60] sm:$0xff]  ;;  %v311_v55 = vld [vmem:[#allocation2 + $0x68] sm:$0xff]  ;;  %295 = vst.msk [vmem:[#allocation2 + $0x78] sm:$0xff] %vm100_vm3, %v285_v52 }
  0xb9   :  { %294 = vst.msk [vmem:[#allocation2 + $0x70] sm:$0xff] %vm100_vm3, %v283_v53  ;;  %v340_v56 = vpack.c.bf16 %v311_v55, %v310_v54  ;;  %4059 = vperm.xlu1 %5508, %v4021_v62  }
  0xba   :  { %4181 = vperm.xlu0 %5507, %v4177_v4  }
  0xbb   :  { %577 = vmatpush1.bf16.msra.mxu0 %v340_v56  ;;  %v265_v59 = vpop.permute.xlu1 %264 }
  0xbc   :  { %v263_v60 = vpop.permute.xlu0 %262  ;;  %578 = vmatprep.subr.bf16.mxu0 %v5657_v6  ;;  %273 = vst.msk [vmem:[#allocation2 + $0x88] sm:$0xf] %vm77_vm1, %v265_v59 }
  0xbd   :  { %272 = vst.msk [vmem:[#allocation2 + $0x80] sm:$0xff] %vm73_vm0, %v263_v60  ;;  %4186 = vperm.xlu1 %5508, %v4178_v5  }
  0xbf   :  { %v289_v63 = vpop.permute.xlu1 %288  ;;  %v313_v2 = vld [vmem:[#allocation2 + $0x78] sm:$0xff] }
  0xc0   :  { %v287_v0 = vpop.permute.xlu0 %286  ;;  %v312_v1 = vld [vmem:[#allocation2 + $0x70] sm:$0xff]  ;;  %297 = vst.msk [vmem:[#allocation2 + $0x88] sm:$0xf] %vm104_vm4, %v289_v63 }
  0xc1   :  { %296 = vst.msk [vmem:[#allocation2 + $0x80] sm:$0xff] %vm100_vm3, %v287_v0  ;;  %v341_v3 = vpack.c.bf16 %v313_v2, %v312_v1 }
  0xc3   :  { %579 = vmatpush1.bf16.msra.mxu0 %v341_v3 }
  0xc4   :  { %580 = vmatprep.subr.bf16.mxu0 %v5657_v6 }
  0xc7   :  { %v315_v8 = vld [vmem:[#allocation2 + $0x88] sm:$0xf] }
  0xc8   :  { %v314_v7 = vld [vmem:[#allocation2 + $0x80] sm:$0xff] }
  0xc9   :  { %v342_v9 = vpack.c.bf16 %v315_v8, %v314_v7 }
  0xcb   :  { %v562_v10 = vsel %vm560_vm5, %v342_v9, 0 }
  0xcc   :  { %581 = vmatpush1.bf16.msra.mxu0 %v562_v10 }
  0xcf   :  { %597 = vmatmul.mubr.bf16.vlgmr.msra.gmra.mrb[0].mxu0 %v5509_v11 }
  0xd0   :  { %4289 = vmatprep.mubr.msk.bf16.mxu0 %vm532_vm2, %v5512_v12  ;;  %v369_v33 = vpop.permute.xlu1 %368 }
  0xd1   :  { %v364_v29 = vpop.permute.xlu0 %363 }
  0xd4   :  { %v374_v40 = vpop.permute.xlu1 %373 }
  0xd5   :  { %v379_v44 = vpop.permute.xlu0 %378 }
  0xd7   :  { %605 = vmatmul.mubr.bf16.gmra.mrb[4].mxu0 %v5514_v13 }
  0xd8   :  { %4290 = vmatprep.mubr.msk.bf16.mxu0 %vm532_vm2, %v5515_v14  ;;  %v384_v51 = vpop.permute.xlu1 %383 }
  0xd9   :  { %v389_v55 = vpop.permute.xlu0 %388 }
  0xdc   :  { %v394_v62 = vpop.permute.xlu1 %393 }
  0xdd   :  { %v399_v2 = vpop.permute.xlu0 %398 }
  0xdf   :  { %613 = vmatmul.mubr.bf16.gmra.mrb[8].mxu0 %v5517_v15 }
  0xe0   :  { %4291 = vmatprep.mubr.msk.bf16.mxu0 %vm532_vm2, %v5518_v16  ;;  %v404_v10 = vpop.permute.xlu1 %403 }
  0xe1   :  { %v409_v14 = vpop.permute.xlu0 %408 }
  0xe7   :  { %621 = vmatmul.mubr.bf16.gmra.mrb[12].mxu0 %v5520_v17 }
  0xe8   :  { %4292 = vmatprep.mubr.msk.bf16.mxu0 %vm532_vm2, %v5521_v18 }
  0xef   :  { %629 = vmatmul.mubr.bf16.gmra.mrb[16].mxu0 %v5523_v19 }
  0xf0   :  { %4293 = vmatprep.mubr.msk.bf16.mxu0 %vm532_vm2, %v5524_v20 }
  0xf7   :  { %637 = vmatmul.mubr.bf16.gmra.mrb[20].mxu0 %v5526_v21  ;;  %v414_v21 = vpop.permute.xlu1 %413 }
  0xf8   :  { %4294 = vmatprep.mubr.msk.bf16.mxu0 %vm532_vm2, %v5527_v22 }
  0xff   :  { %645 = vmatmul.mubr.bf16.gmra.mrb[24].mxu0 %v5529_v23 }
 0x100   :  { %4295 = vmatprep.mubr.msk.bf16.mxu0 %vm532_vm2, %v5530_v24 }
 0x107   :  { %653 = vmatmul.mubr.bf16.gmra.mrb[28].mxu0 %v5532_v25  ;;  %v419_v25 = vpop.permute.xlu0 %418 }
 0x108   :  { %4296 = vmatprep.mubr.msk.bf16.mxu0 %vm532_vm2, %v5533_v26 }
 0x10f   :  { %661 = vmatmul.mubr.bf16.gmra.mrb[32].mxu0 %v5535_v27 }
 0x1a2   :  { %v598_v30 = vpop.f32.mrb[0].mxu0 }
 0x1a3   :  { %v599_v31 = vadd.f32 %v598_v30, %v364_v29  ;;  %v600_v32 = vpop.f32.mrb[1].mxu0 }
 0x1a4   :  { %v601_v34 = vpop.f32.mrb[2].mxu0  ;;  %v424_v32 = vpop.permute.xlu1 %423 }
 0x1a5   :  { %v602_v35 = vadd.f32 %v601_v34, %v369_v33  ;;  %v603_v36 = vpop.f32.mrb[3].mxu0  ;;  %v669_v37 = vmax.f32 %v599_v31, 0.0 }
 0x1a6   :  { %v429_v36 = vpop.permute.xlu0 %428 }
 0x1a7   :  { %v670_v38 = vmax.f32 %v602_v35, 0.0 }
 0x1a9   :  { %v6121_v39 = vpack.c.bf16 %v670_v38, %v669_v37 }
 0x1aa   :  { %v606_v41 = vpop.f32.mrb[4].mxu0 }
 0x1ab   :  { %v607_v42 = vadd.f32 %v606_v41, %v374_v40  ;;  %v608_v43 = vpop.f32.mrb[5].mxu0  ;;  %764 = vmatpush1.bf16.msra.mxu1 %v6121_v39 }
 0x1ac   :  { %v609_v45 = vpop.f32.mrb[6].mxu0  ;;  %765 = vmatprep.subr.bf16.mxu1 %v5657_v6 }
 0x1ad   :  { %v610_v46 = vadd.f32 %v609_v45, %v379_v44  ;;  %v611_v47 = vpop.f32.mrb[7].mxu0  ;;  %v671_v48 = vmax.f32 %v607_v42, 0.0  ;;  %v434_v44 = vpop.permute.xlu1 %433 }
 0x1af   :  { %v672_v49 = vmax.f32 %v610_v46, 0.0 }
 0x1b1   :  { %v6125_v50 = vpack.c.bf16 %v672_v49, %v671_v48  ;;  %v439_v48 = vpop.permute.xlu0 %438 }
 0x1b2   :  { %v614_v52 = vpop.f32.mrb[8].mxu0 }
 0x1b3   :  { %v615_v53 = vadd.f32 %v614_v52, %v384_v51  ;;  %v616_v54 = vpop.f32.mrb[9].mxu0  ;;  %766 = vmatpush1.bf16.msra.mxu1 %v6125_v50 }
 0x1b4   :  { %v617_v56 = vpop.f32.mrb[10].mxu0  ;;  %767 = vmatprep.subr.bf16.mxu1 %v5657_v6 }
 0x1b5   :  { %v618_v57 = vadd.f32 %v617_v56, %v389_v55  ;;  %v619_v58 = vpop.f32.mrb[11].mxu0  ;;  %v673_v59 = vmax.f32 %v615_v53, 0.0  ;;  %v444_v56 = vpop.permute.xlu1 %443 }
 0x1b7   :  { %v674_v60 = vmax.f32 %v618_v57, 0.0 }
 0x1b9   :  { %v6129_v61 = vpack.c.bf16 %v674_v60, %v673_v59  ;;  %v449_v60 = vpop.permute.xlu0 %448 }
 0x1ba   :  { %v622_v63 = vpop.f32.mrb[12].mxu0 }
 0x1bb   :  { %v623_v0 = vadd.f32 %v622_v63, %v394_v62  ;;  %v624_v1 = vpop.f32.mrb[13].mxu0  ;;  %768 = vmatpush1.bf16.msra.mxu1 %v6129_v61 }
 0x1bc   :  { %v625_v3 = vpop.f32.mrb[14].mxu0  ;;  %769 = vmatprep.subr.bf16.mxu1 %v5657_v6 }
 0x1bd   :  { %v626_v4 = vadd.f32 %v625_v3, %v399_v2  ;;  %v627_v5 = vpop.f32.mrb[15].mxu0  ;;  %v675_v7 = vmax.f32 %v623_v0, 0.0 }
 0x1be   :  { %v5539_v5 = vld [vmem:[%s6858_s3 + $0x14] ss:$8 sps:$4 sm:$0xff]  }
 0x1bf   :  { %v676_v8 = vmax.f32 %v626_v4, 0.0  ;;  %v5536_v4 = vld [vmem:[%s6858_s3] ss:$8 sps:$4 sm:$0xff]  }
 0x1c1   :  { %v6133_v9 = vpack.c.bf16 %v676_v8, %v675_v7  ;;  %v5541_v7 = vld [vmem:[%s6858_s3 + $0x10] ss:$8 sps:$4 sm:$0xff]   ;;  %v5542_v8 = vld [vmem:[%s6858_s3 + $0x24] ss:$8 sps:$4 sm:$0xff]  }
 0x1c2   :  { %v630_v11 = vpop.f32.mrb[16].mxu0 }
 0x1c3   :  { %v631_v12 = vadd.f32 %v630_v11, %v404_v10  ;;  %v632_v13 = vpop.f32.mrb[17].mxu0  ;;  %770 = vmatpush1.bf16.msra.mxu1 %v6133_v9 }
 0x1c4   :  { %v633_v15 = vpop.f32.mrb[18].mxu0  ;;  %771 = vmatprep.subr.bf16.mxu1 %v5657_v6  ;;  %v5550_v13 = vld [vmem:[%s6859_s4] ss:$8 sps:$4 sm:$0xff]  }
 0x1c5   :  { %v634_v16 = vadd.f32 %v633_v15, %v409_v14  ;;  %v635_v17 = vpop.f32.mrb[19].mxu0  ;;  %v677_v18 = vmax.f32 %v631_v12, 0.0  ;;  %v5552_v12 = vld [vmem:[%s6859_s4 + $0x4] ss:$8 sps:$4 sm:$0xff]   ;;  %v5553_v14 = vld [vmem:[%s6859_s4 + $0x14] ss:$8 sps:$4 sm:$0xff]  }
 0x1c6   :  { %v5555_v15 = vld [vmem:[%s6859_s4 + $0x10] ss:$8 sps:$4 sm:$0xff]   ;;  %v5559_v17 = vld [vmem:[%s6859_s4 + $0x34] ss:$8 sps:$4 sm:$0xff]  }
 0x1c7   :  { %v678_v19 = vmax.f32 %v634_v16, 0.0  ;;  %v5558_v16 = vld [vmem:[%s6859_s4 + $0x20] ss:$8 sps:$4 sm:$0xff]  }
 0x1c9   :  { %v6137_v20 = vpack.c.bf16 %v678_v19, %v677_v18  ;;  %v843_v18 = vld [vmem:[%s6859_s4 + $0x40] sm:$0xff]  ;;  %v5561_v19 = vld [vmem:[%s6859_s4 + $0x30] ss:$8 sps:$4 sm:$0xff]  }
 0x1ca   :  { %v638_v22 = vpop.f32.mrb[20].mxu0 }
 0x1cb   :  { %v639_v23 = vadd.f32 %v638_v22, %v414_v21  ;;  %v640_v24 = vpop.f32.mrb[21].mxu0  ;;  %772 = vmatpush1.bf16.msra.mxu1 %v6137_v20  ;;  %v4320_v21 = vcombine.low %v843_v18, %v843_v18  ;;  %v5665_v22 = vmov 0.0  }
 0x1cc   :  { %v641_v26 = vpop.f32.mrb[22].mxu0  ;;  %773 = vmatprep.subr.bf16.mxu1 %v5657_v6  ;;  %4861 = vmatprep.subr.bf16.mxu0 %v5665_v22  ;;  %v5565_v24 = vld [vmem:[%s6860_s5 + $0x8] sm:$0xff]  }
 0x1cd   :  { %v642_v27 = vadd.f32 %v641_v26, %v419_v25  ;;  %v643_v28 = vpop.f32.mrb[23].mxu0  ;;  %v679_v29 = vmax.f32 %v639_v23, 0.0  ;;  %v5564_v23 = vld [vmem:[%s6860_s5] sm:$0xff]   ;;  %v5566_v25 = vld [vmem:[%s6860_s5 + $0x10] sm:$0xff]   ;;  %4867 = vmatprep.mubr.msk.bf16.mxu0 %vm5666_vm7, %v5665_v22 }
 0x1ce   :  { %4862 = vmatpush3.bf16.msra.mxu0 %v5564_v23 }
 0x1cf   :  { %v680_v30 = vmax.f32 %v642_v27, 0.0  ;;  %4863 = vmatprep.subr.bf16.mxu0 %v5665_v22 }
 0x1d1   :  { %v6141_v31 = vpack.c.bf16 %v680_v30, %v679_v29 }
 0x1d2   :  { %v646_v33 = vpop.f32.mrb[24].mxu0  ;;  %4864 = vmatpush3.bf16.msra.mxu0 %v5565_v24 }
 0x1d3   :  { %v647_v34 = vadd.f32 %v646_v33, %v424_v32  ;;  %v648_v35 = vpop.f32.mrb[25].mxu0  ;;  %774 = vmatpush1.bf16.msra.mxu1 %v6141_v31  ;;  %4865 = vmatprep.subr.bf16.mxu0 %v5665_v22 }
 0x1d4   :  { %v649_v37 = vpop.f32.mrb[26].mxu0  ;;  %775 = vmatprep.subr.bf16.mxu1 %v5657_v6 }
 0x1d5   :  { %v650_v38 = vadd.f32 %v649_v37, %v429_v36  ;;  %v651_v40 = vpop.f32.mrb[27].mxu0  ;;  %v681_v41 = vmax.f32 %v647_v34, 0.0 }
 0x1d6   :  { %4866 = vmatpush3.bf16.msra.mxu0 %v5566_v25 }
 0x1d7   :  { %v682_v42 = vmax.f32 %v650_v38, 0.0  ;;  %4913 = vmatprep.subr.bf16.mxu0 %v5665_v22 }
 0x1d9   :  { %v702_v43 = vpack.c.bf16 %v682_v42, %v681_v41 }
 0x1da   :  { %v654_v45 = vpop.f32.mrb[28].mxu0 }
 0x1db   :  { %v655_v46 = vadd.f32 %v654_v45, %v434_v44  ;;  %v656_v47 = vpop.f32.mrb[29].mxu0  ;;  %776 = vmatpush1.bf16.msra.mxu1 %v702_v43 }
 0x1dc   :  { %v657_v49 = vpop.f32.mrb[30].mxu0  ;;  %777 = vmatprep.subr.bf16.mxu1 %v5657_v6 }
 0x1dd   :  { %v658_v51 = vadd.f32 %v657_v49, %v439_v48  ;;  %v659_v52 = vpop.f32.mrb[31].mxu0  ;;  %v683_v53 = vmax.f32 %v655_v46, 0.0 }
 0x1df   :  { %v684_v54 = vmax.f32 %v658_v51, 0.0 }
 0x1e1   :  { %v703_v55 = vpack.c.bf16 %v684_v54, %v683_v53 }
 0x1e2   :  { %v662_v57 = vpop.f32.mrb[32].mxu0 }
 0x1e3   :  { %v663_v58 = vadd.f32 %v662_v57, %v444_v56  ;;  %v664_v59 = vpop.f32.mrb[33].mxu0  ;;  %778 = vmatpush1.bf16.msra.mxu1 %v703_v55 }
 0x1e4   :  { %v665_v62 = vpop.f32.mrb[34].mxu0  ;;  %779 = vmatprep.subr.bf16.mxu1 %v5657_v6 }
 0x1e5   :  { %v666_v63 = vadd.f32 %v665_v62, %v449_v60  ;;  %v667_v0 = vpop.f32.mrb[35].mxu0  ;;  %v685_v1 = vmax.f32 %v663_v58, 0.0 }
 0x1e7   :  { %v686_v2 = vmax.f32 %v666_v63, 0.0 }
 0x1e9   :  { %v704_v3 = vpack.c.bf16 %v686_v2, %v685_v1 }
 0x1eb   :  { %780 = vmatpush1.bf16.msra.mxu1 %v704_v3 }
 0x1ec   :  { %901 = vmatprep.subr.bf16.mxu1 %v5657_v6 }
 0x1ee   :  { %796 = vmatmul.mubr.bf16.vlgmr.msra.gmra.mrb[0].mxu1 %v5536_v4 }
 0x1ef   :  { %902 = vmatpush1.bf16.msra.mxu1 %v6121_v39  ;;  %4308 = vmatprep.mubr.msk.bf16.mxu1 %vm747_vm6, %v5539_v5  ;;  %v5544_v39 = vld [vmem:[%s6858_s3 + $0x20] ss:$8 sps:$4 sm:$0xff]  }
 0x1f0   :  { %903 = vmatprep.subr.bf16.mxu1 %v5657_v6 }
 0x1f3   :  { %904 = vmatpush1.bf16.msra.mxu1 %v6125_v50  ;;  %v5545_v50 = vld [vmem:[%s6858_s3 + $0x34] ss:$8 sps:$4 sm:$0xff]  }
 0x1f4   :  { %905 = vmatprep.subr.bf16.mxu1 %v5657_v6 }
 0x1f6   :  { %804 = vmatmul.mubr.bf16.gmra.mrb[4].mxu1 %v5541_v7 }
 0x1f7   :  { %906 = vmatpush1.bf16.msra.mxu1 %v6129_v61  ;;  %4309 = vmatprep.mubr.msk.bf16.mxu1 %vm747_vm6, %v5542_v8  ;;  %v695_v61 = vld [vmem:[%s6858_s3 + $0x40] sm:$0xff] }
 0x1f8   :  { %907 = vmatprep.subr.bf16.mxu1 %v5657_v6  ;;  %v4306_v10 = vcombine.high %v695_v61, %v695_v61  ;;  %v4305_v11 = vcombine.low %v695_v61, %v695_v61 }
 0x1fb   :  { %908 = vmatpush1.bf16.msra.mxu1 %v6133_v9  ;;  %v5547_v9 = vld [vmem:[%s6858_s3 + $0x30] ss:$8 sps:$4 sm:$0xff]  }
 0x1fc   :  { %909 = vmatprep.subr.bf16.mxu1 %v5657_v6 }
 0x1fe   :  { %812 = vmatmul.mubr.bf16.gmra.mrb[8].mxu1 %v5544_v39 }
 0x1ff   :  { %910 = vmatpush1.bf16.msra.mxu1 %v6137_v20  ;;  %4310 = vmatprep.mubr.msk.bf16.mxu1 %vm747_vm6, %v5545_v50  ;;  %v4321_v20 = vcombine.high %v843_v18, %v843_v18 }
 0x200   :  { %911 = vmatprep.subr.bf16.mxu1 %v5657_v6 }
 0x203   :  { %912 = vmatpush1.bf16.msra.mxu1 %v6141_v31 }
 0x204   :  { %913 = vmatprep.subr.bf16.mxu1 %v5657_v6 }
 0x206   :  { %820 = vmatmul.mubr.bf16.gmra.mrb[12].mxu1 %v5547_v9 }
 0x207   :  { %914 = vmatpush1.bf16.msra.mxu1 %v702_v43  ;;  %4311 = vmatprep.mubr.msk.bf16.mxu1 %vm747_vm6, %v4306_v10  ;;  %v5567_v10 = vld [vmem:[%s6861_s6] sm:$0xff]  }
 0x208   :  { %915 = vmatprep.subr.bf16.mxu1 %v5657_v6 }
 0x20b   :  { %916 = vmatpush1.bf16.msra.mxu1 %v703_v55 }
 0x20c   :  { %917 = vmatprep.subr.bf16.mxu1 %v5657_v6  ;;  %v5556_v6 = vld [vmem:[%s6859_s4 + $0x24] ss:$8 sps:$4 sm:$0xff]  }
 0x20e   :  { %828 = vmatmul.mubr.bf16.gmra.mrb[16].mxu1 %v4305_v11 }
 0x20f   :  { %918 = vmatpush1.bf16.msra.mxu1 %v704_v3  ;;  %4322 = vmatprep.mubr.msk.bf16.mxu1 %vm747_vm6, %v5552_v12 }
 0x210   :  { %5399 = vmatprep.subr.bf16.mxu1 %v5665_v22 }
 0x216   :  { %934 = vmatmul.mubr.bf16.vlgmr.msra.gmra.mrb[20].mxu1 %v5550_v13  ;;  %v5568_v13 = vld [vmem:[%s6861_s6 + $0x8] sm:$0xff]  }
 0x217   :  { %4323 = vmatprep.mubr.msk.bf16.mxu1 %vm747_vm6, %v5553_v14  ;;  %5402 = vmatpush3.bf16.msra.mxu1 %v5564_v23  ;;  %v5573_v23 = vld [vmem:[%s6862_s8 + $0x14] ss:$0 sps:$4 sm:$0xff]  }
 0x218   :  { %5400 = vmatprep.subr.bf16.mxu1 %v5665_v22 }
 0x21b   :  { %5403 = vmatpush3.bf16.msra.mxu1 %v5565_v24 }
 0x21c   :  { %5401 = vmatprep.subr.bf16.mxu1 %v5665_v22 }
 0x21e   :  { %942 = vmatmul.mubr.bf16.gmra.mrb[24].mxu1 %v5555_v15 }
 0x21f   :  { %4324 = vmatprep.mubr.msk.bf16.mxu1 %vm747_vm6, %v5556_v6  ;;  %5404 = vmatpush3.bf16.msra.mxu1 %v5566_v25  ;;  %v1343_v25 = vsel %vm1236_vm9, %v5573_v23, 0  ;;  %v5578_v23 = vld [vmem:[%s6862_s8 + $0x30] sm:$0xff]  }
 0x220   :  { %4887 = vmatprep.subr.bf16.mxu1 %v5665_v22 }
 0x226   :  { %950 = vmatmul.mubr.bf16.gmra.mrb[28].mxu1 %v5558_v16 }
 0x227   :  { %4325 = vmatprep.mubr.msk.bf16.mxu1 %vm747_vm6, %v5559_v17  ;;  %v5569_v17 = vld [vmem:[%s6861_s6 + $0x10] sm:$0xff]  }
 0x22e   :  { %958 = vmatmul.mubr.bf16.gmra.mrb[32].mxu1 %v5561_v19  ;;  %v5570_v19 = vld [vmem:[%s6862_s8 + $0xc] sm:$0xff]  }
 0x22f   :  { %4326 = vmatprep.mubr.msk.bf16.mxu1 %vm747_vm6, %v4321_v20  ;;  %v5571_v20 = vld [vmem:[%s6862_s8] sm:$0xff]  }
 0x236   :  { %966 = vmatmul.mubr.bf16.gmra.mrb[36].mxu1 %v4320_v21  ;;  %v5572_v21 = vld [vmem:[%s6862_s8 + $0x8] ss:$0 sps:$4 sm:$0xff]  }
 0x237   :  { %4879 = vmatprep.mubr.msk.bf16.mxu1 %vm5666_vm7, %v5665_v22  ;;  %v1238_v24 = vsel %vm1236_vm9, %v5572_v21, 0 }
 0x2c1   :  { %v797_v26 = vpop.f32.mrb[0].mxu1 }
 0x2c2   :  { %v799_v27 = vpop.f32.mrb[1].mxu1 }
 0x2c3   :  { %v800_v28 = vpop.f32.mrb[2].mxu1 }
 0x2c4   :  { %v802_v29 = vpop.f32.mrb[3].mxu1 }
 0x2c9   :  { %v805_v30 = vpop.f32.mrb[4].mxu1 }
 0x2ca   :  { %v807_v31 = vpop.f32.mrb[5].mxu1 }
 0x2cb   :  { %v808_v32 = vpop.f32.mrb[6].mxu1 }
 0x2cc   :  { %v810_v33 = vpop.f32.mrb[7].mxu1 }
 0x2d1   :  { %v813_v34 = vpop.f32.mrb[8].mxu1 }
 0x2d2   :  { %v815_v35 = vpop.f32.mrb[9].mxu1 }
 0x2d3   :  { %v816_v36 = vpop.f32.mrb[10].mxu1 }
 0x2d4   :  { %v818_v37 = vpop.f32.mrb[11].mxu1 }
 0x2d9   :  { %v821_v38 = vpop.f32.mrb[12].mxu1 }
 0x2da   :  { %v823_v40 = vpop.f32.mrb[13].mxu1 }
 0x2db   :  { %v824_v41 = vpop.f32.mrb[14].mxu1 }
 0x2dc   :  { %v826_v42 = vpop.f32.mrb[15].mxu1 }
 0x2e1   :  { %v829_v43 = vpop.f32.mrb[16].mxu1 }
 0x2e2   :  { %v831_v44 = vpop.f32.mrb[17].mxu1 }
 0x2e3   :  { %v832_v45 = vpop.f32.mrb[18].mxu1 }
 0x2e4   :  { %v833_v46 = vpop.f32.mrb[19].mxu1 }
 0x2e9   :  { %v935_v47 = vpop.f32.mrb[20].mxu1 }
 0x2ea   :  { %v973_v48 = vmax.f32 %v797_v26, %v935_v47  ;;  %v937_v49 = vpop.f32.mrb[21].mxu1 }
 0x2eb   :  { %v938_v51 = vpop.f32.mrb[22].mxu1 }
 0x2ec   :  { %v974_v52 = vmax.f32 %v800_v28, %v938_v51  ;;  %v940_v53 = vpop.f32.mrb[23].mxu1 }
 0x2ee   :  { %v988_v54 = vpack.c.bf16 %v974_v52, %v973_v48 }
 0x2f0   :  { %4868 = vmatmul.mubr.msk.bf16.vlgmr.msra.gmra.mrb[36].mxu0 %vm1011_vm8, %v988_v54 }
 0x2f1   :  { %v943_v55 = vpop.f32.mrb[24].mxu1  ;;  %4871 = vmatprep.mubr.msk.bf16.mxu0 %vm5666_vm7, %v5665_v22  ;;  %4914 = vmatpush3.bf16.msra.mxu0 %v5571_v20  ;;  %v5577_v20 = vld [vmem:[%s6862_s8 + $0x2c] ss:$0 sps:$4 sm:$0xff]  }
 0x2f2   :  { %v975_v56 = vmax.f32 %v805_v30, %v943_v55  ;;  %v945_v57 = vpop.f32.mrb[25].mxu1  ;;  %4915 = vmatprep.subr.bf16.mxu0 %v5665_v22  ;;  %v5574_v55 = vld [vmem:[%s6862_s8 + $0x18] sm:$0xff]   ;;  %v1964_v21 = vsel %vm1236_vm9, %v5577_v20, 0  ;;  %v5583_v20 = vld [vmem:[%s6863_s7 + $0x48] sm:$0xff]  }
 0x2f3   :  { %v946_v58 = vpop.f32.mrb[26].mxu1 }
 0x2f4   :  { %v976_v59 = vmax.f32 %v808_v32, %v946_v58  ;;  %v948_v60 = vpop.f32.mrb[27].mxu1 }
 0x2f5   :  { %4916 = vmatpush3.bf16.msra.mxu0 %v1238_v24  ;;  %v5579_v24 = vld [vmem:[%s6862_s8 + $0x38] ss:$0 sps:$4 sm:$0xff]  }
 0x2f6   :  { %v989_v62 = vpack.c.bf16 %v976_v59, %v975_v56  ;;  %v5575_v56 = vld [vmem:[%s6862_s8 + $0x20] ss:$0 sps:$4 sm:$0xff]  }
 0x2f8   :  { %4872 = vmatmul.mubr.msk.bf16.gmra.mrb[40].mxu0 %vm1011_vm8, %v989_v62 }
 0x2f9   :  { %v951_v63 = vpop.f32.mrb[28].mxu1  ;;  %4875 = vmatprep.mubr.msk.bf16.mxu0 %vm5666_vm7, %v5665_v22 }
 0x2fa   :  { %v977_v0 = vmax.f32 %v813_v34, %v951_v63  ;;  %v953_v1 = vpop.f32.mrb[29].mxu1 }
 0x2fb   :  { %v954_v2 = vpop.f32.mrb[30].mxu1 }
 0x2fc   :  { %v978_v3 = vmax.f32 %v816_v36, %v954_v2  ;;  %v956_v4 = vpop.f32.mrb[31].mxu1 }
 0x2fe   :  { %v990_v5 = vpack.c.bf16 %v978_v3, %v977_v0 }
 0x300   :  { %4876 = vmatmul.mubr.msk.bf16.gmra.mrb[44].mxu0 %vm1011_vm8, %v990_v5 }
 0x301   :  { %v959_v7 = vpop.f32.mrb[32].mxu1  ;;  %4917 = vmatprep.mubr.msk.bf16.mxu0 %vm5666_vm7, %v5665_v22 }
 0x302   :  { %v979_v8 = vmax.f32 %v821_v38, %v959_v7  ;;  %v961_v39 = vpop.f32.mrb[33].mxu1 }
 0x303   :  { %v962_v50 = vpop.f32.mrb[34].mxu1 }
 0x304   :  { %v980_v61 = vmax.f32 %v824_v41, %v962_v50  ;;  %v964_v9 = vpop.f32.mrb[35].mxu1 }
 0x306   :  { %v991_v11 = vpack.c.bf16 %v980_v61, %v979_v8 }
 0x308   :  { %4880 = vmatmul.mubr.msk.bf16.vlgmr.msra.gmra.mrb[40].mxu1 %vm1011_vm8, %v991_v11 }
 0x309   :  { %v967_v12 = vpop.f32.mrb[36].mxu1  ;;  %4888 = vmatpush3.bf16.msra.mxu1 %v5567_v10  ;;  %4883 = vmatprep.mubr.msk.bf16.mxu1 %vm5666_vm7, %v5665_v22 }
 0x30a   :  { %v981_v14 = vmax.f32 %v829_v43, %v967_v12  ;;  %v969_v15 = vpop.f32.mrb[37].mxu1  ;;  %4889 = vmatprep.subr.bf16.mxu1 %v5665_v22 }
 0x30b   :  { %v970_v6 = vpop.f32.mrb[38].mxu1 }
 0x30c   :  { %v971_v16 = vpop.f32.mrb[39].mxu1  ;;  %v992_v18 = vpack.c.bf16 %v981_v14, %v981_v14 }
 0x30d   :  { %4890 = vmatpush3.bf16.msra.mxu1 %v5568_v13 }
 0x30e   :  { %4891 = vmatprep.subr.bf16.mxu1 %v5665_v22 }
 0x310   :  { %4884 = vmatmul.mubr.msk.bf16.gmra.mrb[44].mxu1 %vm1011_vm8, %v992_v18 }
 0x311   :  { %4892 = vmatpush3.bf16.msra.mxu1 %v5569_v17  ;;  %4893 = vmatprep.mubr.msk.bf16.mxu1 %vm5666_vm7, %v5665_v22 }
 0x312   :  { %4937 = vmatprep.subr.bf16.mxu1 %v5665_v22 }
 0x318   :  { %4894 = vmatmul.mubr.msk.bf16.vlgmr.msra.gmra.mrb[48].mxu1 %vm1011_vm8, %v988_v54 }
 0x319   :  { %4897 = vmatprep.mubr.msk.bf16.mxu1 %vm5666_vm7, %v5665_v22  ;;  %4938 = vmatpush3.bf16.msra.mxu1 %v5570_v19  ;;  %v5576_v19 = vld [vmem:[%s6862_s8 + $0x24] sm:$0xff]  }
 0x31a   :  { %4939 = vmatprep.subr.bf16.mxu1 %v5665_v22 }
 0x31d   :  { %4940 = vmatpush3.bf16.msra.mxu1 %v1343_v25  ;;  %v2214_v25 = vsel %vm1236_vm9, %v5579_v24, 0 }
 0x31e   :  { %5005 = vmatprep.subr.bf16.mxu1 %v5665_v22 }
 0x320   :  { %4898 = vmatmul.mubr.msk.bf16.gmra.mrb[52].mxu1 %vm1011_vm8, %v989_v62  ;;  %v1714_v62 = vsel %vm1236_vm9, %v5575_v56, 0 }
 0x321   :  { %4901 = vmatprep.mubr.msk.bf16.mxu1 %vm5666_vm7, %v5665_v22 }
 0x328   :  { %4902 = vmatmul.mubr.msk.bf16.gmra.mrb[56].mxu1 %vm1011_vm8, %v990_v5 }
 0x329   :  { %4905 = vmatprep.mubr.msk.bf16.mxu1 %vm5666_vm7, %v5665_v22 }
 0x330   :  { %4906 = vmatmul.mubr.msk.bf16.gmra.mrb[60].mxu1 %vm1011_vm8, %v991_v11 }
 0x331   :  { %4909 = vmatprep.mubr.msk.bf16.mxu1 %vm5666_vm7, %v5665_v22 }
 0x338   :  { %4910 = vmatmul.mubr.msk.bf16.gmra.mrb[64].mxu1 %vm1011_vm8, %v992_v18 }
 0x339   :  { %4941 = vmatprep.mubr.msk.bf16.mxu1 %vm5666_vm7, %v5665_v22 }
 0x3c3   :  { %v1061_v26 = vpop.f32.mrb[36].mxu0 }
 0x3c4   :  { %v4869_v27 = vpop.f32.mrb[37].mxu0 }
 0x3c5   :  { %v1064_v28 = vpop.f32.mrb[38].mxu0 }
 0x3c6   :  { %v4870_v29 = vpop.f32.mrb[39].mxu0 }
 0x3cb   :  { %v1069_v30 = vpop.f32.mrb[40].mxu0 }
 0x3cc   :  { %v4873_v31 = vpop.f32.mrb[41].mxu0 }
 0x3cd   :  { %v1072_v32 = vpop.f32.mrb[42].mxu0 }
 0x3ce   :  { %v4874_v33 = vpop.f32.mrb[43].mxu0 }
 0x3d3   :  { %v1077_v34 = vpop.f32.mrb[44].mxu0 }
 0x3d4   :  { %v4877_v35 = vpop.f32.mrb[45].mxu0 }
 0x3d5   :  { %v1080_v36 = vpop.f32.mrb[46].mxu0 }
 0x3d6   :  { %v4878_v37 = vpop.f32.mrb[47].mxu0 }
 0x3db   :  { %v1085_v38 = vpop.f32.mrb[40].mxu1 }
 0x3dc   :  { %v4881_v40 = vpop.f32.mrb[41].mxu1 }
 0x3dd   :  { %v1088_v41 = vpop.f32.mrb[42].mxu1 }
 0x3de   :  { %v4882_v42 = vpop.f32.mrb[43].mxu1 }
 0x3e3   :  { %v1093_v43 = vpop.f32.mrb[44].mxu1 }
 0x3e4   :  { %v4885_v44 = vpop.f32.mrb[45].mxu1 }
 0x3e5   :  { %v1096_v45 = vpop.f32.mrb[46].mxu1 }
 0x3e6   :  { %v4886_v46 = vpop.f32.mrb[47].mxu1 }
 0x3eb   :  { %v1157_v47 = vpop.f32.mrb[48].mxu1 }
 0x3ec   :  { %v1195_v48 = vmax.f32 %v1061_v26, %v1157_v47  ;;  %v4895_v49 = vpop.f32.mrb[49].mxu1  ;;  %v5580_v26 = vld [vmem:[%s6863_s7 + $0x30] sm:$0xff]  }
 0x3ed   :  { %v1160_v51 = vpop.f32.mrb[50].mxu1 }
 0x3ee   :  { %v1196_v52 = vmax.f32 %v1064_v28, %v1160_v51  ;;  %v4896_v53 = vpop.f32.mrb[51].mxu1 }
 0x3f0   :  { %v6302_v54 = vpack.c.bf16 %v1196_v52, %v1195_v48 }
 0x3f2   :  { %4918 = vmatmul.mubr.msk.bf16.vlgmr.msra.gmra.mrb[48].mxu0 %vm73_vm0, %v6302_v54  ;;  %4942 = vmatmul.mubr.msk.bf16.vlgmr.msra.gmra.mrb[68].mxu1 %vm73_vm0, %v6302_v54 }
 0x3f3   :  { %v1165_v57 = vpop.f32.mrb[52].mxu1  ;;  %4921 = vmatprep.mubr.msk.bf16.mxu0 %vm5666_vm7, %v5665_v22  ;;  %4945 = vmatprep.mubr.msk.bf16.mxu1 %vm5666_vm7, %v5665_v22 }
 0x3f4   :  { %v1197_v58 = vmax.f32 %v1069_v30, %v1165_v57  ;;  %v4899_v59 = vpop.f32.mrb[53].mxu1  ;;  %5006 = vmatpush3.bf16.msra.mxu1 %v5574_v55 }
 0x3f5   :  { %v1168_v60 = vpop.f32.mrb[54].mxu1  ;;  %5007 = vmatprep.subr.bf16.mxu1 %v5665_v22 }
 0x3f6   :  { %v1198_v63 = vmax.f32 %v1072_v32, %v1168_v60  ;;  %v4900_v0 = vpop.f32.mrb[55].mxu1 }
 0x3f8   :  { %v6320_v1 = vpack.c.bf16 %v1198_v63, %v1197_v58  ;;  %5008 = vmatpush3.bf16.msra.mxu1 %v1714_v62 }
 0x3f9   :  { %5051 = vmatprep.subr.bf16.mxu1 %v5665_v22 }
 0x3fa   :  { %4922 = vmatmul.mubr.msk.bf16.gmra.mrb[52].mxu0 %vm73_vm0, %v6320_v1  ;;  %4946 = vmatmul.mubr.msk.bf16.gmra.mrb[72].mxu1 %vm73_vm0, %v6320_v1 }
 0x3fb   :  { %v1173_v2 = vpop.f32.mrb[56].mxu1  ;;  %4925 = vmatprep.mubr.msk.bf16.mxu0 %vm5666_vm7, %v5665_v22  ;;  %4949 = vmatprep.mubr.msk.bf16.mxu1 %vm5666_vm7, %v5665_v22 }
 0x3fc   :  { %v1199_v3 = vmax.f32 %v1077_v34, %v1173_v2  ;;  %v4903_v4 = vpop.f32.mrb[57].mxu1 }
 0x3fd   :  { %v1176_v5 = vpop.f32.mrb[58].mxu1 }
 0x3fe   :  { %v1200_v7 = vmax.f32 %v1080_v36, %v1176_v5  ;;  %v4904_v8 = vpop.f32.mrb[59].mxu1 }
 0x400   :  { %v6331_v39 = vpack.c.bf16 %v1200_v7, %v1199_v3 }
 0x402   :  { %4926 = vmatmul.mubr.msk.bf16.gmra.mrb[56].mxu0 %vm73_vm0, %v6331_v39  ;;  %4950 = vmatmul.mubr.msk.bf16.gmra.mrb[76].mxu1 %vm73_vm0, %v6331_v39 }
 0x403   :  { %v1181_v50 = vpop.f32.mrb[60].mxu1  ;;  %4929 = vmatprep.mubr.msk.bf16.mxu0 %vm5666_vm7, %v5665_v22  ;;  %4953 = vmatprep.mubr.msk.bf16.mxu1 %vm5666_vm7, %v5665_v22 }
 0x404   :  { %v1201_v61 = vmax.f32 %v1085_v38, %v1181_v50  ;;  %v4907_v9 = vpop.f32.mrb[61].mxu1 }
 0x405   :  { %v1184_v10 = vpop.f32.mrb[62].mxu1 }
 0x406   :  { %v1202_v11 = vmax.f32 %v1088_v41, %v1184_v10  ;;  %v4908_v12 = vpop.f32.mrb[63].mxu1 }
 0x408   :  { %v1210_v13 = vpack.c.bf16 %v1202_v11, %v1201_v61 }
 0x40a   :  { %4930 = vmatmul.mubr.msk.bf16.gmra.mrb[60].mxu0 %vm73_vm0, %v1210_v13  ;;  %4954 = vmatmul.mubr.msk.bf16.gmra.mrb[80].mxu1 %vm73_vm0, %v1210_v13 }
 0x40b   :  { %v1189_v14 = vpop.f32.mrb[64].mxu1  ;;  %4933 = vmatprep.mubr.msk.bf16.mxu0 %vm5666_vm7, %v5665_v22  ;;  %4957 = vmatprep.mubr.msk.bf16.mxu1 %vm5666_vm7, %v5665_v22 }
 0x40c   :  { %v1203_v15 = vmax.f32 %v1093_v43, %v1189_v14  ;;  %v4911_v6 = vpop.f32.mrb[65].mxu1  ;;  %v5581_v14 = vld [vmem:[%s6863_s7 + $0x38] sm:$0xff]  }
 0x40d   :  { %v1192_v16 = vpop.f32.mrb[66].mxu1 }
 0x40e   :  { %v4912_v17 = vpop.f32.mrb[67].mxu1  ;;  %v1211_v18 = vpack.c.bf16 %v1203_v15, %v1203_v15  ;;  %v5582_v15 = vld [vmem:[%s6863_s7 + $0x40] sm:$0xff]  }
 0x412   :  { %4934 = vmatmul.mubr.msk.bf16.gmra.mrb[64].mxu0 %vm73_vm0, %v1211_v18  ;;  %4958 = vmatmul.mubr.msk.bf16.gmra.mrb[84].mxu1 %vm73_vm0, %v1211_v18 }
 0x413   :  { %5009 = vmatprep.mubr.msk.bf16.mxu1 %vm5666_vm7, %v5665_v22  ;;  %4971 = vmatprep.mubr.msk.bf16.mxu0 %vm1465_vm10, %v5580_v26 }
 0x41a   :  { %5010 = vmatmul.mubr.msk.bf16.vlgmr.msra.gmra.mrb[88].mxu1 %vm73_vm0, %v6302_v54 }
 0x41b   :  { %5013 = vmatprep.mubr.msk.bf16.mxu1 %vm5666_vm7, %v5665_v22  ;;  %5052 = vmatpush3.bf16.msra.mxu1 %v5576_v19 }
 0x41c   :  { %5053 = vmatprep.subr.bf16.mxu1 %v5665_v22 }
 0x41f   :  { %5054 = vmatpush3.bf16.msra.mxu1 %v1964_v21  ;;  %v5584_v21 = vld [vmem:[%s6863_s7 + $0x50] sm:$0xff]  }
 0x420   :  { %5097 = vmatprep.subr.bf16.mxu1 %v5665_v22 }
 0x422   :  { %5014 = vmatmul.mubr.msk.bf16.gmra.mrb[92].mxu1 %vm73_vm0, %v6320_v1 }
 0x423   :  { %5017 = vmatprep.mubr.msk.bf16.mxu1 %vm5666_vm7, %v5665_v22 }
 0x42a   :  { %5018 = vmatmul.mubr.msk.bf16.gmra.mrb[96].mxu1 %vm73_vm0, %v6331_v39 }
 0x42b   :  { %5021 = vmatprep.mubr.msk.bf16.mxu1 %vm5666_vm7, %v5665_v22 }
 0x432   :  { %5022 = vmatmul.mubr.msk.bf16.gmra.mrb[100].mxu1 %vm73_vm0, %v1210_v13 }
 0x433   :  { %5025 = vmatprep.mubr.msk.bf16.mxu1 %vm5666_vm7, %v5665_v22 }
 0x43a   :  { %5026 = vmatmul.mubr.msk.bf16.gmra.mrb[104].mxu1 %vm73_vm0, %v1211_v18 }
 0x43b   :  { %5055 = vmatprep.mubr.msk.bf16.mxu1 %vm5666_vm7, %v5665_v22 }
 0x442   :  { %5056 = vmatmul.mubr.msk.bf16.vlgmr.msra.gmra.mrb[108].mxu1 %vm73_vm0, %v6302_v54 }
 0x443   :  { %5059 = vmatprep.mubr.msk.bf16.mxu1 %vm5666_vm7, %v5665_v22  ;;  %5098 = vmatpush3.bf16.msra.mxu1 %v5578_v23 }
 0x444   :  { %5099 = vmatprep.subr.bf16.mxu1 %v5665_v22 }
 0x447   :  { %5100 = vmatpush3.bf16.msra.mxu1 %v2214_v25 }
 0x448   :  { %5167 = vmatprep.subr.bf16.mxu1 %v5665_v22 }
 0x44a   :  { %5060 = vmatmul.mubr.msk.bf16.gmra.mrb[112].mxu1 %vm73_vm0, %v6320_v1 }
 0x44b   :  { %5063 = vmatprep.mubr.msk.bf16.mxu1 %vm5666_vm7, %v5665_v22 }
 0x452   :  { %5064 = vmatmul.mubr.msk.bf16.gmra.mrb[116].mxu1 %vm73_vm0, %v6331_v39 }
 0x453   :  { %5067 = vmatprep.mubr.msk.bf16.mxu1 %vm5666_vm7, %v5665_v22 }
 0x45a   :  { %5068 = vmatmul.mubr.msk.bf16.gmra.mrb[120].mxu1 %vm73_vm0, %v1210_v13 }
 0x45b   :  { %5071 = vmatprep.mubr.msk.bf16.mxu1 %vm5666_vm7, %v5665_v22 }
 0x462   :  { %5072 = vmatmul.mubr.msk.bf16.gmra.mrb[124].mxu1 %vm73_vm0, %v1211_v18 }
 0x463   :  { %5101 = vmatprep.mubr.msk.bf16.mxu1 %vm5666_vm7, %v5665_v22 }
 0x46a   :  { %5102 = vmatmul.mubr.msk.bf16.vlgmr.msra.gmra.mrb[128].mxu1 %vm73_vm0, %v6302_v54 }
 0x46b   :  { %5105 = vmatprep.mubr.msk.bf16.mxu1 %vm5666_vm7, %v5665_v22 }
 0x472   :  { %5106 = vmatmul.mubr.msk.bf16.gmra.mrb[132].mxu1 %vm73_vm0, %v6320_v1 }
 0x473   :  { %5109 = vmatprep.mubr.msk.bf16.mxu1 %vm5666_vm7, %v5665_v22 }
 0x47a   :  { %5110 = vmatmul.mubr.msk.bf16.gmra.mrb[136].mxu1 %vm73_vm0, %v6331_v39 }
 0x47b   :  { %5113 = vmatprep.mubr.msk.bf16.mxu1 %vm5666_vm7, %v5665_v22 }
 0x482   :  { %5114 = vmatmul.mubr.msk.bf16.gmra.mrb[140].mxu1 %vm73_vm0, %v1210_v13 }
 0x483   :  { %5117 = vmatprep.mubr.msk.bf16.mxu1 %vm5666_vm7, %v5665_v22 }
 0x48a   :  { %5118 = vmatmul.mubr.msk.bf16.gmra.mrb[144].mxu1 %vm73_vm0, %v1211_v18  ;;  %vm4244_vm0 = vcmask 9216  }
 0x48b   :  { %5179 = vmatprep.mubr.msk.bf16.mxu1 %vm5666_vm7, %v5665_v22 }
 0x4c5   :  { %v1274_v27 = vpop.f32.mrb[48].mxu0  ;;  %v1379_v28 = vpop.f32.mrb[68].mxu1 }
 0x4c6   :  { %v4919_v29 = vpop.f32.mrb[49].mxu0  ;;  %v4943_v30 = vpop.f32.mrb[69].mxu1 }
 0x4c7   :  { %v1277_v31 = vpop.f32.mrb[50].mxu0  ;;  %v1382_v32 = vpop.f32.mrb[70].mxu1  ;;  %v5585_v29 = vld [vmem:[%s6863_s7 + $0x58] sm:$0xff]   ;;  %v5586_v30 = vld [vmem:[%s6863_s7] sm:$0xff]  }
 0x4c8   :  { %v1324_v33 = vpack.c.bf16 %v1277_v31, %v1274_v27  ;;  %v1430_v34 = vpack.c.bf16 %v1382_v32, %v1379_v28  ;;  %v4920_v35 = vpop.f32.mrb[51].mxu0  ;;  %v4944_v36 = vpop.f32.mrb[71].mxu1 }
 0x4ca   :  { %4961 = vmatprep.subr.bf16.mxu0 %v1430_v34 }
 0x4cb   :  { %4962 = vmatpush3.bf16.msra.mxu0 %v1430_v34 }
 0x4cd   :  { %v1282_v37 = vpop.f32.mrb[52].mxu0  ;;  %v1387_v38 = vpop.f32.mrb[72].mxu1 }
 0x4ce   :  { %v4923_v40 = vpop.f32.mrb[53].mxu0  ;;  %v4947_v41 = vpop.f32.mrb[73].mxu1 }
 0x4cf   :  { %v1285_v42 = vpop.f32.mrb[54].mxu0  ;;  %v1390_v43 = vpop.f32.mrb[74].mxu1 }
 0x4d0   :  { %v1325_v44 = vpack.c.bf16 %v1285_v42, %v1282_v37  ;;  %v1431_v45 = vpack.c.bf16 %v1390_v43, %v1387_v38  ;;  %v4924_v46 = vpop.f32.mrb[55].mxu0  ;;  %v4948_v47 = vpop.f32.mrb[75].mxu1  ;;  %v5587_v37 = vld [vmem:[%s6863_s7 + $0x8] sm:$0xff]   ;;  %v5588_v38 = vld [vmem:[%s6863_s7 + $0x10] sm:$0xff]  }
 0x4d1   :  { %v5590_v46 = vld [vmem:[%s6863_s7 + $0x20] sm:$0xff]  }
 0x4d2   :  { %4963 = vmatprep.subr.bf16.mxu0 %v1431_v45 }
 0x4d3   :  { %4964 = vmatpush3.bf16.msra.mxu0 %v1431_v45  ;;  %v5589_v45 = vld [vmem:[%s6863_s7 + $0x18] sm:$0xff]  }
 0x4d5   :  { %v1290_v48 = vpop.f32.mrb[56].mxu0  ;;  %v1395_v49 = vpop.f32.mrb[76].mxu1 }
 0x4d6   :  { %v4927_v51 = vpop.f32.mrb[57].mxu0  ;;  %v4951_v52 = vpop.f32.mrb[77].mxu1 }
 0x4d7   :  { %v1293_v53 = vpop.f32.mrb[58].mxu0  ;;  %v1398_v54 = vpop.f32.mrb[78].mxu1 }
 0x4d8   :  { %v1326_v55 = vpack.c.bf16 %v1293_v53, %v1290_v48  ;;  %v1432_v56 = vpack.c.bf16 %v1398_v54, %v1395_v49  ;;  %v4928_v57 = vpop.f32.mrb[59].mxu0  ;;  %v4952_v58 = vpop.f32.mrb[79].mxu1  ;;  %v5591_v53 = vld [vmem:[%s6863_s7 + $0x28] sm:$0xff]   ;;  %v5592_v54 = vld [vmem:[%s6863_s7 + $0x60] sm:$0xff]  }
 0x4da   :  { %4965 = vmatprep.subr.bf16.mxu0 %v1432_v56 }
 0x4db   :  { %4966 = vmatpush3.bf16.msra.mxu0 %v1432_v56 }
 0x4dd   :  { %v1298_v59 = vpop.f32.mrb[60].mxu0  ;;  %v1403_v60 = vpop.f32.mrb[80].mxu1 }
 0x4de   :  { %v4931_v62 = vpop.f32.mrb[61].mxu0  ;;  %v4955_v63 = vpop.f32.mrb[81].mxu1 }
 0x4df   :  { %v1301_v0 = vpop.f32.mrb[62].mxu0  ;;  %v1406_v1 = vpop.f32.mrb[82].mxu1  ;;  %v5593_v62 = vld [vmem:[%s6863_s7 + $0x68] sm:$0xff]   ;;  %v5594_v63 = vld [vmem:[%s6863_s7 + $0x70] sm:$0xff]  }
 0x4e0   :  { %v1327_v2 = vpack.c.bf16 %v1301_v0, %v1298_v59  ;;  %v1433_v3 = vpack.c.bf16 %v1406_v1, %v1403_v60  ;;  %v4932_v4 = vpop.f32.mrb[63].mxu0  ;;  %v4956_v5 = vpop.f32.mrb[83].mxu1 }
 0x4e1   :  { %v5595_v5 = vld [vmem:[%s6863_s7 + $0x78] sm:$0xff]  }
 0x4e2   :  { %4967 = vmatprep.subr.bf16.mxu0 %v1433_v3 }
 0x4e3   :  { %4968 = vmatpush3.bf16.msra.mxu0 %v1433_v3 }
 0x4e5   :  { %v1306_v7 = vpop.f32.mrb[64].mxu0  ;;  %v1411_v8 = vpop.f32.mrb[84].mxu1 }
 0x4e6   :  { %v1434_v39 = vpack.c.bf16 %v1411_v8, %v1411_v8  ;;  %v4935_v50 = vpop.f32.mrb[65].mxu0  ;;  %v4959_v61 = vpop.f32.mrb[85].mxu1  ;;  %v1328_v26 = vpack.c.bf16 %v1306_v7, %v1306_v7  ;;  %v5596_v7 = vld [vmem:[%s6863_s7 + $0x80] sm:$0xff]  }
 0x4e7   :  { %v1309_v9 = vpop.f32.mrb[66].mxu0  ;;  %v1414_v10 = vpop.f32.mrb[86].mxu1 }
 0x4e8   :  { %v1485_v11 = vsel %vm1236_vm9, %v1434_v39, 0  ;;  %v4936_v12 = vpop.f32.mrb[67].mxu0  ;;  %v4960_v13 = vpop.f32.mrb[87].mxu1  ;;  %5489 = vmatprep.subr.msk.bf16.mxu0 %vm1236_vm9, %v1434_v39  ;;  %v1617_v31 = vsel %vm1236_vm9, %v1328_v26, 0  ;;  %v5597_v10 = vld [vmem:[%s6863_s7 + $0x88] sm:$0xff]  }
 0x4e9   :  { %4970 = vmatpush3.bf16.msra.mxu0 %v1485_v11  ;;  %v5598_v11 = vld [vmem:[%s6863_s7 + $0x90] sm:$0xff]  }
 0x4ea   :  { %4983 = vmatprep.subr.bf16.mxu0 %v1324_v33 }
 0x4ec   :  { %4972 = vmatmul.mubr.msk.bf16.vlgmr.msra.gmra.mrb[68].mxu0 %vm1465_vm10, %v5581_v14 }
 0x4ed   :  { %4984 = vmatpush3.bf16.msra.mxu0 %v1324_v33  ;;  %v1750_v6 = vpop.f32.mrb[88].mxu1  ;;  %4975 = vmatprep.mubr.msk.bf16.mxu0 %vm1465_vm10, %v5582_v15 }
 0x4ee   :  { %4985 = vmatprep.subr.bf16.mxu0 %v1325_v44  ;;  %v5011_v16 = vpop.f32.mrb[89].mxu1 }
 0x4ef   :  { %v1753_v17 = vpop.f32.mrb[90].mxu1 }
 0x4f0   :  { %v1801_v18 = vpack.c.bf16 %v1753_v17, %v1750_v6  ;;  %v5012_v19 = vpop.f32.mrb[91].mxu1 }
 0x4f1   :  { %4986 = vmatpush3.bf16.msra.mxu0 %v1325_v44 }
 0x4f2   :  { %4987 = vmatprep.subr.bf16.mxu0 %v1326_v55 }
 0x4f4   :  { %4976 = vmatmul.mubr.msk.bf16.gmra.mrb[72].mxu0 %vm1465_vm10, %v5583_v20 }
 0x4f5   :  { %4988 = vmatpush3.bf16.msra.mxu0 %v1326_v55  ;;  %v1758_v23 = vpop.f32.mrb[92].mxu1  ;;  %4979 = vmatprep.mubr.msk.bf16.mxu0 %vm1465_vm10, %v5584_v21 }
 0x4f6   :  { %4989 = vmatprep.subr.bf16.mxu0 %v1327_v2  ;;  %v5015_v24 = vpop.f32.mrb[93].mxu1 }
 0x4f7   :  { %v1761_v25 = vpop.f32.mrb[94].mxu1  ;;  %v5600_v24 = vld [vmem:[%s6863_s7 + $0xa0] sm:$0xff]  }
 0x4f8   :  { %v1802_v27 = vpack.c.bf16 %v1761_v25, %v1758_v23  ;;  %v5016_v28 = vpop.f32.mrb[95].mxu1  ;;  %v5599_v23 = vld [vmem:[%s6863_s7 + $0x98] sm:$0xff]  }
 0x4f9   :  { %4990 = vmatpush3.bf16.msra.mxu0 %v1327_v2 }
 0x4fa   :  { %5490 = vmatprep.subr.msk.bf16.mxu0 %vm1236_vm9, %v1328_v26 }
 0x4fc   :  { %4980 = vmatmul.mubr.msk.bf16.gmra.mrb[76].mxu0 %vm1465_vm10, %v5585_v29 }
 0x4fd   :  { %4992 = vmatpush3.bf16.msra.mxu0 %v1617_v31  ;;  %v1766_v32 = vpop.f32.mrb[96].mxu1  ;;  %4993 = vmatprep.mubr.msk.bf16.mxu0 %vm1465_vm10, %v5586_v30  ;;  %v5601_v30 = vld [vmem:[%s6863_s7 + $0xa8] sm:$0xff]   ;;  %v5602_v31 = vld [vmem:[%s6863_s7 + $0xb0] sm:$0xff]  }
 0x4fe   :  { %v5019_v33 = vpop.f32.mrb[97].mxu1  ;;  %5029 = vmatprep.subr.bf16.mxu0 %v1801_v18 }
 0x4ff   :  { %v1769_v34 = vpop.f32.mrb[98].mxu1 }
 0x500   :  { %v1803_v35 = vpack.c.bf16 %v1769_v34, %v1766_v32  ;;  %v5020_v36 = vpop.f32.mrb[99].mxu1 }
 0x504   :  { %4994 = vmatmul.mubr.msk.bf16.vlgmr.msra.gmra.mrb[68].mxu0 %vm1465_vm10, %v5587_v37  ;;  %v5603_v37 = vld [vmem:[%s6863_s7 + $0xb8] sm:$0xff]  }
 0x505   :  { %5030 = vmatpush3.bf16.msra.mxu0 %v1801_v18  ;;  %v1774_v40 = vpop.f32.mrb[100].mxu1  ;;  %4997 = vmatprep.mubr.msk.bf16.mxu0 %vm1465_vm10, %v5588_v38  ;;  %v5604_v38 = vld [vmem:[%s6863_s7 + $0xc0] sm:$0xff]  }
 0x506   :  { %5031 = vmatprep.subr.bf16.mxu0 %v1802_v27  ;;  %v5023_v41 = vpop.f32.mrb[101].mxu1 }
 0x507   :  { %v1777_v42 = vpop.f32.mrb[102].mxu1 }
 0x508   :  { %v1804_v43 = vpack.c.bf16 %v1777_v42, %v1774_v40  ;;  %v5024_v44 = vpop.f32.mrb[103].mxu1 }
 0x509   :  { %5032 = vmatpush3.bf16.msra.mxu0 %v1802_v27 }
 0x50a   :  { %5033 = vmatprep.subr.bf16.mxu0 %v1803_v35 }
 0x50c   :  { %4998 = vmatmul.mubr.msk.bf16.gmra.mrb[72].mxu0 %vm1465_vm10, %v5589_v45 }
 0x50d   :  { %5034 = vmatpush3.bf16.msra.mxu0 %v1803_v35  ;;  %v1782_v47 = vpop.f32.mrb[104].mxu1  ;;  %5001 = vmatprep.mubr.msk.bf16.mxu0 %vm1465_vm10, %v5590_v46 }
 0x50e   :  { %v1805_v48 = vpack.c.bf16 %v1782_v47, %v1782_v47  ;;  %5035 = vmatprep.subr.bf16.mxu0 %v1804_v43  ;;  %v5027_v49 = vpop.f32.mrb[105].mxu1 }
 0x50f   :  { %v1785_v51 = vpop.f32.mrb[106].mxu1 }
 0x510   :  { %v5028_v52 = vpop.f32.mrb[107].mxu1  ;;  %v1855_v55 = vsel %vm1236_vm9, %v1805_v48, 0 }
 0x511   :  { %5036 = vmatpush3.bf16.msra.mxu0 %v1804_v43 }
 0x512   :  { %5491 = vmatprep.subr.msk.bf16.mxu0 %vm1236_vm9, %v1805_v48 }
 0x514   :  { %5002 = vmatmul.mubr.msk.bf16.gmra.mrb[76].mxu0 %vm1465_vm10, %v5591_v53 }
 0x515   :  { %5038 = vmatpush3.bf16.msra.mxu0 %v1855_v55  ;;  %v2000_v56 = vpop.f32.mrb[108].mxu1  ;;  %5039 = vmatprep.mubr.msk.bf16.mxu0 %vm1465_vm10, %v5592_v54 }
 0x516   :  { %v5057_v57 = vpop.f32.mrb[109].mxu1 }
 0x517   :  { %v2003_v58 = vpop.f32.mrb[110].mxu1  ;;  %v5605_v57 = vld [vmem:[%s6863_s7 + $0xc8] sm:$0xff]  }
 0x518   :  { %v2051_v59 = vpack.c.bf16 %v2003_v58, %v2000_v56  ;;  %v5058_v60 = vpop.f32.mrb[111].mxu1  ;;  %v5606_v58 = vld [vmem:[%s6863_s7 + $0xd0] sm:$0xff]  }
 0x519   :  { %v5608_v60 = vld [vmem:[%s6863_s7 + $0xe0] sm:$0xff]  }
 0x51a   :  { %5075 = vmatprep.subr.bf16.mxu0 %v2051_v59 }
 0x51c   :  { %5040 = vmatmul.mubr.msk.bf16.vlgmr.msra.gmra.mrb[68].mxu0 %vm1465_vm10, %v5593_v62  ;;  %v5609_v62 = vld [vmem:[%s6863_s7 + $0xe8] sm:$0xff]  }
 0x51d   :  { %5076 = vmatpush3.bf16.msra.mxu0 %v2051_v59  ;;  %v2008_v0 = vpop.f32.mrb[112].mxu1  ;;  %5043 = vmatprep.mubr.msk.bf16.mxu0 %vm1465_vm10, %v5594_v63  ;;  %v5607_v59 = vld [vmem:[%s6863_s7 + $0xd8] sm:$0xff]   ;;  %v2465_v63 = vpop.permute.xlu1 %2464 }
 0x51e   :  { %v5061_v1 = vpop.f32.mrb[113].mxu1 }
 0x51f   :  { %v2011_v2 = vpop.f32.mrb[114].mxu1 }
 0x520   :  { %v2052_v3 = vpack.c.bf16 %v2011_v2, %v2008_v0  ;;  %v5062_v4 = vpop.f32.mrb[115].mxu1  ;;  %v2470_v0 = vpop.permute.xlu0 %2469 }
 0x521   :  { %v2475_v1 = vpop.permute.xlu1 %2474 }
 0x522   :  { %5077 = vmatprep.subr.bf16.mxu0 %v2052_v3 }
 0x523   :  { %5078 = vmatpush3.bf16.msra.mxu0 %v2052_v3 }
 0x524   :  { %5044 = vmatmul.mubr.msk.bf16.gmra.mrb[72].mxu0 %vm1465_vm10, %v5595_v5  ;;  %v2480_v2 = vpop.permute.xlu0 %2479 }
 0x525   :  { %v2016_v8 = vpop.f32.mrb[116].mxu1  ;;  %5047 = vmatprep.mubr.msk.bf16.mxu0 %vm1465_vm10, %v5596_v7  ;;  %v2485_v3 = vpop.permute.xlu1 %2484 }
 0x526   :  { %v5065_v39 = vpop.f32.mrb[117].mxu1 }
 0x527   :  { %v2019_v50 = vpop.f32.mrb[118].mxu1 }
 0x528   :  { %v2053_v61 = vpack.c.bf16 %v2019_v50, %v2016_v8  ;;  %v5066_v9 = vpop.f32.mrb[119].mxu1  ;;  %v2490_v4 = vpop.permute.xlu0 %2489 }
 0x52a   :  { %5079 = vmatprep.subr.bf16.mxu0 %v2053_v61 }
 0x52b   :  { %5080 = vmatpush3.bf16.msra.mxu0 %v2053_v61 }
 0x52c   :  { %5048 = vmatmul.mubr.msk.bf16.gmra.mrb[76].mxu0 %vm1465_vm10, %v5597_v10  ;;  %v2495_v10 = vpop.permute.xlu1 %2494 }
 0x52d   :  { %v2024_v12 = vpop.f32.mrb[120].mxu1  ;;  %5085 = vmatprep.mubr.msk.bf16.mxu0 %vm1465_vm10, %v5598_v11 }
 0x52e   :  { %v5069_v13 = vpop.f32.mrb[121].mxu1 }
 0x52f   :  { %v2027_v14 = vpop.f32.mrb[122].mxu1 }
 0x530   :  { %v2054_v15 = vpack.c.bf16 %v2027_v14, %v2024_v12  ;;  %v5070_v6 = vpop.f32.mrb[123].mxu1  ;;  %v2500_v14 = vpop.permute.xlu0 %2499 }
 0x532   :  { %5081 = vmatprep.subr.bf16.mxu0 %v2054_v15 }
 0x533   :  { %5082 = vmatpush3.bf16.msra.mxu0 %v2054_v15 }
 0x535   :  { %v2032_v16 = vpop.f32.mrb[124].mxu1 }
 0x536   :  { %v2055_v17 = vpack.c.bf16 %v2032_v16, %v2032_v16  ;;  %v5073_v18 = vpop.f32.mrb[125].mxu1 }
 0x537   :  { %v2035_v19 = vpop.f32.mrb[126].mxu1 }
 0x538   :  { %v2105_v20 = vsel %vm1236_vm9, %v2055_v17, 0  ;;  %v5074_v21 = vpop.f32.mrb[127].mxu1  ;;  %5492 = vmatprep.subr.msk.bf16.mxu0 %vm1236_vm9, %v2055_v17 }
 0x539   :  { %5084 = vmatpush3.bf16.msra.mxu0 %v2105_v20  ;;  %v2505_v21 = vpop.permute.xlu1 %2504 }
 0x53c   :  { %5086 = vmatmul.mubr.msk.bf16.vlgmr.msra.gmra.mrb[68].mxu0 %vm1465_vm10, %v5599_v23 }
 0x53d   :  { %v2250_v25 = vpop.f32.mrb[128].mxu1  ;;  %5089 = vmatprep.mubr.msk.bf16.mxu0 %vm1465_vm10, %v5600_v24 }
 0x53e   :  { %v5103_v26 = vpop.f32.mrb[129].mxu1 }
 0x53f   :  { %v2253_v27 = vpop.f32.mrb[130].mxu1 }
 0x540   :  { %v2301_v28 = vpack.c.bf16 %v2253_v27, %v2250_v25  ;;  %v5104_v29 = vpop.f32.mrb[131].mxu1  ;;  %v2510_v27 = vpop.permute.xlu0 %2509 }
 0x542   :  { %5121 = vmatprep.subr.bf16.mxu0 %v2301_v28 }
 0x543   :  { %5122 = vmatpush3.bf16.msra.mxu0 %v2301_v28 }
 0x544   :  { %5090 = vmatmul.mubr.msk.bf16.gmra.mrb[72].mxu0 %vm1465_vm10, %v5601_v30 }
 0x545   :  { %v2258_v32 = vpop.f32.mrb[132].mxu1  ;;  %5093 = vmatprep.mubr.msk.bf16.mxu0 %vm1465_vm10, %v5602_v31 }
 0x546   :  { %v5107_v33 = vpop.f32.mrb[133].mxu1 }
 0x547   :  { %v2261_v34 = vpop.f32.mrb[134].mxu1 }
 0x548   :  { %v2302_v35 = vpack.c.bf16 %v2261_v34, %v2258_v32  ;;  %v5108_v36 = vpop.f32.mrb[135].mxu1  ;;  %v2515_v34 = vpop.permute.xlu1 %2514 }
 0x54a   :  { %5123 = vmatprep.subr.bf16.mxu0 %v2302_v35 }
 0x54b   :  { %5124 = vmatpush3.bf16.msra.mxu0 %v2302_v35 }
 0x54c   :  { %5094 = vmatmul.mubr.msk.bf16.gmra.mrb[76].mxu0 %vm1465_vm10, %v5603_v37 }
 0x54d   :  { %v2266_v40 = vpop.f32.mrb[136].mxu1  ;;  %5131 = vmatprep.mubr.msk.bf16.mxu0 %vm1465_vm10, %v5604_v38 }
 0x54e   :  { %v5111_v41 = vpop.f32.mrb[137].mxu1 }
 0x54f   :  { %v2269_v42 = vpop.f32.mrb[138].mxu1 }
 0x550   :  { %v2303_v43 = vpack.c.bf16 %v2269_v42, %v2266_v40  ;;  %v5112_v44 = vpop.f32.mrb[139].mxu1  ;;  %v2520_v40 = vpop.permute.xlu0 %2519 }
 0x552   :  { %5125 = vmatprep.subr.bf16.mxu0 %v2303_v43 }
 0x553   :  { %5126 = vmatpush3.bf16.msra.mxu0 %v2303_v43 }
 0x555   :  { %v2274_v45 = vpop.f32.mrb[140].mxu1 }
 0x556   :  { %v5115_v46 = vpop.f32.mrb[141].mxu1 }
 0x557   :  { %v2277_v47 = vpop.f32.mrb[142].mxu1 }
 0x558   :  { %v2304_v48 = vpack.c.bf16 %v2277_v47, %v2274_v45  ;;  %v5116_v49 = vpop.f32.mrb[143].mxu1 }
 0x55a   :  { %5127 = vmatprep.subr.bf16.mxu0 %v2304_v48 }
 0x55b   :  { %5128 = vmatpush3.bf16.msra.mxu0 %v2304_v48 }
 0x55d   :  { %v2282_v51 = vpop.f32.mrb[144].mxu1 }
 0x55e   :  { %v2305_v52 = vpack.c.bf16 %v2282_v51, %v2282_v51  ;;  %v5119_v53 = vpop.f32.mrb[145].mxu1 }
 0x55f   :  { %v2285_v54 = vpop.f32.mrb[146].mxu1  ;;  %v5610_v53 = vld [vmem:[%s6864_s10] sm:$0xff]  }
 0x560   :  { %v2355_v55 = vsel %vm1236_vm9, %v2305_v52, 0  ;;  %v5120_v56 = vpop.f32.mrb[147].mxu1  ;;  %5493 = vmatprep.subr.msk.bf16.mxu0 %vm1236_vm9, %v2305_v52  ;;  %v5611_v54 = vld [vmem:[%s6865_s11] sm:$0xff]  }
 0x561   :  { %5130 = vmatpush3.bf16.msra.mxu0 %v2355_v55  ;;  %v5612_v55 = vld [vmem:[%s6864_s10 + $0x8] sm:$0xff]  }
 0x562   :  { %5143 = vmatprep.subr.bf16.mxu0 %v5665_v22  ;;  %v5613_v56 = vld [vmem:[%s6865_s11 + $0x8] sm:$0xff]  }
 0x564   :  { %5132 = vmatmul.mubr.msk.bf16.vlgmr.msra.gmra.mrb[68].mxu0 %vm1465_vm10, %v5605_v57  ;;  %v5614_v57 = vld [vmem:[%s6864_s10 + $0x10] sm:$0xff]  }
 0x565   :  { %5135 = vmatprep.mubr.msk.bf16.mxu0 %vm1465_vm10, %v5606_v58  ;;  %v5615_v58 = vld [vmem:[%s6865_s11 + $0x10] sm:$0xff]  }
 0x56c   :  { %5136 = vmatmul.mubr.msk.bf16.gmra.mrb[72].mxu0 %vm1465_vm10, %v5607_v59  ;;  %v5616_v59 = vld [vmem:[%s6866_s12] sm:$0xff]  }
 0x56d   :  { %5139 = vmatprep.mubr.msk.bf16.mxu0 %vm1465_vm10, %v5608_v60  ;;  %v5617_v60 = vld [vmem:[%s6867_s13] sm:$0xff]  }
 0x574   :  { %5140 = vmatmul.mubr.msk.bf16.gmra.mrb[76].mxu0 %vm1465_vm10, %v5609_v62 }
 0x575   :  { %5155 = vmatprep.mubr.msk.bf16.mxu0 %vm5666_vm7, %v5665_v22 }
 0x637   :  { %v5133_v5 = vpop.f32.mrb[68].mxu0 }
 0x638   :  { %v2524_v7 = vadd.f32 %v5133_v5, %v2475_v1  ;;  %v2391_v8 = vpop.f32.mrb[69].mxu0 }
 0x639   :  { %v2522_v39 = vadd.f32 %v2465_v63, %v2391_v8  ;;  %v5134_v50 = vpop.f32.mrb[70].mxu0 }
 0x63a   :  { %v2525_v61 = vadd.f32 %v5134_v50, %v2480_v2  ;;  %v2394_v9 = vpop.f32.mrb[71].mxu0  ;;  %v2536_v12 = vmax.f32 %v2524_v7, 0.0 }
 0x63b   :  { %v2523_v11 = vadd.f32 %v2470_v0, %v2394_v9  ;;  %v2534_v15 = vmax.f32 %v2522_v39, 0.0 }
 0x63c   :  { %v2537_v13 = vmax.f32 %v2525_v61, 0.0 }
 0x63d   :  { %v2535_v6 = vmax.f32 %v2523_v11, 0.0 }
 0x63e   :  { %v2553_v16 = vpack.c.bf16 %v2537_v13, %v2536_v12 }
 0x63f   :  { %v2552_v17 = vpack.c.bf16 %v2535_v6, %v2534_v15  ;;  %v5137_v18 = vpop.f32.mrb[72].mxu0 }
 0x640   :  { %v2528_v19 = vadd.f32 %v5137_v18, %v2495_v10  ;;  %v2407_v20 = vpop.f32.mrb[73].mxu0 }
 0x641   :  { %v2526_v23 = vadd.f32 %v2485_v3, %v2407_v20  ;;  %v5138_v24 = vpop.f32.mrb[74].mxu0  ;;  %5144 = vmatpush3.bf16.msra.mxu0 %v2552_v17  ;;  %5168 = vmatpush3.bf16.msra.mxu1 %v2552_v17 }
 0x642   :  { %v2529_v25 = vadd.f32 %v5138_v24, %v2500_v14  ;;  %v2410_v26 = vpop.f32.mrb[75].mxu0  ;;  %5145 = vmatprep.subr.bf16.mxu0 %v5665_v22  ;;  %5169 = vmatprep.subr.bf16.mxu1 %v5665_v22  ;;  %v2540_v29 = vmax.f32 %v2528_v19, 0.0 }
 0x643   :  { %v2527_v28 = vadd.f32 %v2490_v4, %v2410_v26  ;;  %v2538_v31 = vmax.f32 %v2526_v23, 0.0 }
 0x644   :  { %v2541_v30 = vmax.f32 %v2529_v25, 0.0 }
 0x645   :  { %v2539_v32 = vmax.f32 %v2527_v28, 0.0  ;;  %5146 = vmatpush3.bf16.msra.mxu0 %v2553_v16  ;;  %5170 = vmatpush3.bf16.msra.mxu1 %v2553_v16 }
 0x646   :  { %v2555_v33 = vpack.c.bf16 %v2541_v30, %v2540_v29  ;;  %5147 = vmatprep.subr.bf16.mxu0 %v5665_v22  ;;  %5171 = vmatprep.subr.bf16.mxu1 %v5665_v22  ;;  %v4521_v29 = vld [vmem:[%s6868_s15 + $0x4] sm:$0xf] }
 0x647   :  { %v2554_v35 = vpack.c.bf16 %v2539_v32, %v2538_v31  ;;  %v5141_v36 = vpop.f32.mrb[76].mxu0  ;;  %v2976_v30 = vsel %vm1236_vm9, %v4521_v29, 0  ;;  %v2881_v31 = vld [vmem:[%s6868_s15] sm:$0xf] }
 0x648   :  { %v2532_v37 = vadd.f32 %v5141_v36, %v2515_v34  ;;  %v2423_v38 = vpop.f32.mrb[77].mxu0  ;;  %v2896_v32 = vsel %vm1236_vm9, %v2881_v31, 0 }
 0x649   :  { %v2530_v41 = vadd.f32 %v2505_v21, %v2423_v38  ;;  %v5142_v42 = vpop.f32.mrb[78].mxu0  ;;  %5148 = vmatpush3.bf16.msra.mxu0 %v2554_v35  ;;  %5172 = vmatpush3.bf16.msra.mxu1 %v2554_v35 }
 0x64a   :  { %v2533_v43 = vadd.f32 %v5142_v42, %v2520_v40  ;;  %v2426_v44 = vpop.f32.mrb[79].mxu0  ;;  %5149 = vmatprep.subr.bf16.mxu0 %v5665_v22  ;;  %5173 = vmatprep.subr.bf16.mxu1 %v5665_v22  ;;  %v2544_v46 = vmax.f32 %v2532_v37, 0.0 }
 0x64b   :  { %v2531_v45 = vadd.f32 %v2510_v27, %v2426_v44  ;;  %v2542_v48 = vmax.f32 %v2530_v41, 0.0  ;;  %v4572_v44 = vld [vmem:[%s6868_s15 + $0x8] sm:$0xf] }
 0x64c   :  { %v2545_v47 = vmax.f32 %v2533_v43, 0.0 }
 0x64d   :  { %v2543_v49 = vmax.f32 %v2531_v45, 0.0  ;;  %5150 = vmatpush3.bf16.msra.mxu0 %v2555_v33  ;;  %5174 = vmatpush3.bf16.msra.mxu1 %v2555_v33 }
 0x64e   :  { %v2557_v51 = vpack.c.bf16 %v2545_v47, %v2544_v46  ;;  %5151 = vmatprep.subr.bf16.mxu0 %v5665_v22  ;;  %5175 = vmatprep.subr.bf16.mxu1 %v5665_v22  ;;  %v3373_v46 = vsel %vm1236_vm9, %v4572_v44, 0 }
 0x64f   :  { %v2556_v52 = vpack.c.bf16 %v2543_v49, %v2542_v48 }
 0x651   :  { %5152 = vmatpush3.bf16.msra.mxu0 %v2556_v52  ;;  %5176 = vmatpush3.bf16.msra.mxu1 %v2556_v52 }
 0x652   :  { %5153 = vmatprep.subr.bf16.mxu0 %v5665_v22  ;;  %5177 = vmatprep.subr.bf16.mxu1 %v5665_v22 }
 0x655   :  { %5154 = vmatpush3.bf16.msra.mxu0 %v2557_v51  ;;  %5178 = vmatpush3.bf16.msra.mxu1 %v2557_v51 }
 0x656   :  { %5191 = vmatprep.subr.bf16.mxu0 %v5665_v22  ;;  %5205 = vmatprep.subr.bf16.mxu1 %v5665_v22 }
 0x658   :  { %5156 = vmatmul.mubr.msk.bf16.vlgmr.msra.gmra.mrb[80].mxu0 %vm2573_vm11, %v5610_v53  ;;  %5180 = vmatmul.mubr.msk.bf16.vlgmr.msra.gmra.mrb[148].mxu1 %vm2573_vm11, %v5611_v54 }
 0x659   :  { %5159 = vmatprep.mubr.msk.bf16.mxu0 %vm5666_vm7, %v5665_v22  ;;  %5183 = vmatprep.mubr.msk.bf16.mxu1 %vm5666_vm7, %v5665_v22 }
 0x65a   :  { %5192 = vmatpush3.bf16.msra.mxu0 %v5616_v59  ;;  %5206 = vmatpush3.bf16.msra.mxu1 %v5617_v60 }
 0x65b   :  { %5219 = vmatprep.subr.bf16.mxu0 %v5665_v22  ;;  %5233 = vmatprep.subr.bf16.mxu1 %v5665_v22 }
 0x660   :  { %5160 = vmatmul.mubr.msk.bf16.gmra.mrb[84].mxu0 %vm2573_vm11, %v5612_v55  ;;  %5184 = vmatmul.mubr.msk.bf16.gmra.mrb[152].mxu1 %vm2573_vm11, %v5613_v56 }
 0x661   :  { %5163 = vmatprep.mubr.msk.bf16.mxu0 %vm5666_vm7, %v5665_v22  ;;  %5187 = vmatprep.mubr.msk.bf16.mxu1 %vm5666_vm7, %v5665_v22 }
 0x668   :  { %5164 = vmatmul.mubr.msk.bf16.gmra.mrb[88].mxu0 %vm2573_vm11, %v5614_v57  ;;  %5188 = vmatmul.mubr.msk.bf16.gmra.mrb[156].mxu1 %vm2573_vm11, %v5615_v58 }
 0x669   :  { %5193 = vmatprep.mubr.msk.bf16.mxu0 %vm5666_vm7, %v5665_v22  ;;  %5207 = vmatprep.mubr.msk.bf16.mxu1 %vm5666_vm7, %v5665_v22 }
 0x72b   :  { %v2617_v62 = vpop.f32.mrb[80].mxu0  ;;  %v2704_v63 = vpop.f32.mrb[148].mxu1 }
 0x72c   :  { %v2727_v0 = vmax.f32 %v2617_v62, %v2704_v63  ;;  %v5157_v1 = vpop.f32.mrb[81].mxu0  ;;  %v5181_v2 = vpop.f32.mrb[149].mxu1 }
 0x72d   :  { %v2620_v3 = vpop.f32.mrb[82].mxu0  ;;  %v2707_v4 = vpop.f32.mrb[150].mxu1 }
 0x72e   :  { %v2728_v5 = vmax.f32 %v2620_v3, %v2707_v4  ;;  %v5158_v7 = vpop.f32.mrb[83].mxu0  ;;  %v5182_v8 = vpop.f32.mrb[151].mxu1 }
 0x72f   :  { %v4607_v8 = vld [vmem:[%s6868_s15 + $0xc] sm:$0xf] }
 0x730   :  { %v2735_v39 = vpack.c.bf16 %v2728_v5, %v2727_v0 }
 0x732   :  { %5194 = vmatmul.mubr.msk.bf16.vlgmr.msra.gmra.mrb[92].mxu0 %vm747_vm6, %v2735_v39  ;;  %5208 = vmatmul.mubr.msk.bf16.vlgmr.msra.gmra.mrb[160].mxu1 %vm747_vm6, %v2735_v39  ;;  %v3627_v39 = vsel %vm1236_vm9, %v4607_v8, 0 }
 0x733   :  { %v2625_v50 = vpop.f32.mrb[84].mxu0  ;;  %v2712_v61 = vpop.f32.mrb[152].mxu1  ;;  %5197 = vmatprep.mubr.msk.bf16.mxu0 %vm5666_vm7, %v5665_v22  ;;  %5211 = vmatprep.mubr.msk.bf16.mxu1 %vm5666_vm7, %v5665_v22 }
 0x734   :  { %v2729_v9 = vmax.f32 %v2625_v50, %v2712_v61  ;;  %v5161_v10 = vpop.f32.mrb[85].mxu0  ;;  %v5185_v11 = vpop.f32.mrb[153].mxu1  ;;  %5234 = vmatpush3.bf16.msra.mxu1 %v2976_v30  ;;  %5220 = vmatpush3.bf16.msra.mxu0 %v2896_v32  ;;  %v5618_v50 = vld [vmem:[%s6869_s14 + $0x3c] sm:$0xff]  }
 0x735   :  { %v2628_v12 = vpop.f32.mrb[86].mxu0  ;;  %v2715_v13 = vpop.f32.mrb[154].mxu1  ;;  %5291 = vmatprep.subr.bf16.mxu1 %v5665_v22 }
 0x736   :  { %v2730_v14 = vmax.f32 %v2628_v12, %v2715_v13  ;;  %v5162_v15 = vpop.f32.mrb[87].mxu0  ;;  %v5186_v6 = vpop.f32.mrb[155].mxu1 }
 0x738   :  { %v2736_v16 = vpack.c.bf16 %v2730_v14, %v2729_v9 }
 0x73a   :  { %5198 = vmatmul.mubr.msk.bf16.gmra.mrb[96].mxu0 %vm747_vm6, %v2736_v16  ;;  %5212 = vmatmul.mubr.msk.bf16.gmra.mrb[164].mxu1 %vm747_vm6, %v2736_v16 }
 0x73b   :  { %v2633_v17 = vpop.f32.mrb[88].mxu0  ;;  %v2720_v18 = vpop.f32.mrb[156].mxu1  ;;  %5201 = vmatprep.mubr.msk.bf16.mxu0 %vm5666_vm7, %v5665_v22  ;;  %5215 = vmatprep.mubr.msk.bf16.mxu1 %vm5666_vm7, %v5665_v22 }
 0x73c   :  { %v2731_v19 = vmax.f32 %v2633_v17, %v2720_v18  ;;  %v5165_v20 = vpop.f32.mrb[89].mxu0  ;;  %v5189_v21 = vpop.f32.mrb[157].mxu1 }
 0x73d   :  { %v2636_v23 = vpop.f32.mrb[90].mxu0  ;;  %v2723_v24 = vpop.f32.mrb[158].mxu1 }
 0x73e   :  { %v2732_v25 = vmax.f32 %v2636_v23, %v2723_v24  ;;  %v5166_v26 = vpop.f32.mrb[91].mxu0  ;;  %v5190_v27 = vpop.f32.mrb[159].mxu1 }
 0x740   :  { %v2737_v28 = vpack.c.bf16 %v2732_v25, %v2731_v19 }
 0x742   :  { %5202 = vmatmul.mubr.msk.bf16.gmra.mrb[100].mxu0 %vm747_vm6, %v2737_v28  ;;  %5216 = vmatmul.mubr.msk.bf16.gmra.mrb[168].mxu1 %vm747_vm6, %v2737_v28 }
 0x743   :  { %5235 = vmatprep.mubr.msk.bf16.mxu1 %vm5666_vm7, %v5665_v22  ;;  %5221 = vmatprep.mubr.msk.bf16.mxu0 %vm5666_vm7, %v5665_v22 }
 0x805   :  { %v2787_v33 = vpop.f32.mrb[92].mxu0  ;;  %v2852_v34 = vpop.f32.mrb[160].mxu1 }
 0x806   :  { %v2875_v35 = vmax.f32 %v2787_v33, %v2852_v34  ;;  %v5195_v36 = vpop.f32.mrb[93].mxu0  ;;  %v5209_v37 = vpop.f32.mrb[161].mxu1 }
 0x807   :  { %v2790_v38 = vpop.f32.mrb[94].mxu0  ;;  %v2855_v40 = vpop.f32.mrb[162].mxu1 }
 0x808   :  { %v2876_v41 = vmax.f32 %v2790_v38, %v2855_v40  ;;  %v5196_v42 = vpop.f32.mrb[95].mxu0  ;;  %v5210_v43 = vpop.f32.mrb[163].mxu1  ;;  %v5619_v38 = vld [vmem:[%s6869_s14 + $0x44] sm:$0xff]   ;;  %v5620_v40 = vld [vmem:[%s6869_s14 + $0x4c] sm:$0xff]  }
 0x80a   :  { %v2882_v45 = vpack.c.bf16 %v2876_v41, %v2875_v35 }
 0x80c   :  { %5236 = vmatmul.mubr.msk.bf16.vlgmr.msra.gmra.mrb[172].mxu1 %vm2885_vm12, %v2882_v45  ;;  %5222 = vmatmul.mubr.msk.bf16.vlgmr.msra.gmra.mrb[104].mxu0 %vm2885_vm12, %v2882_v45 }
 0x80d   :  { %v2795_v47 = vpop.f32.mrb[96].mxu0  ;;  %v2860_v48 = vpop.f32.mrb[164].mxu1  ;;  %5239 = vmatprep.mubr.msk.bf16.mxu1 %vm5666_vm7, %v5665_v22  ;;  %5225 = vmatprep.mubr.msk.bf16.mxu0 %vm5666_vm7, %v5665_v22 }
 0x80e   :  { %v2877_v49 = vmax.f32 %v2795_v47, %v2860_v48  ;;  %v5199_v51 = vpop.f32.mrb[97].mxu0  ;;  %v5213_v52 = vpop.f32.mrb[165].mxu1  ;;  %5292 = vmatpush3.bf16.msra.mxu1 %v3373_v46  ;;  %v5621_v46 = vld [vmem:[%s6869_s14 + $0x54] sm:$0xff]   ;;  %v5622_v47 = vld [vmem:[%s6869_s14 + $0x5c] sm:$0xff]  }
 0x80f   :  { %v2798_v53 = vpop.f32.mrb[98].mxu0  ;;  %v2863_v54 = vpop.f32.mrb[166].mxu1  ;;  %5327 = vmatprep.subr.bf16.mxu1 %v5665_v22 }
 0x810   :  { %v2878_v55 = vmax.f32 %v2798_v53, %v2863_v54  ;;  %v5200_v56 = vpop.f32.mrb[99].mxu0  ;;  %v5214_v57 = vpop.f32.mrb[167].mxu1  ;;  %v5623_v54 = vld [vmem:[%s6869_s14 + $0x64] sm:$0xff]  }
 0x812   :  { %v2883_v58 = vpack.c.bf16 %v2878_v55, %v2877_v49  ;;  %v5624_v55 = vld [vmem:[%s6869_s14 + $0x6c] sm:$0xff]  }
 0x814   :  { %5240 = vmatmul.mubr.msk.bf16.gmra.mrb[176].mxu1 %vm2885_vm12, %v2883_v58  ;;  %5226 = vmatmul.mubr.msk.bf16.gmra.mrb[108].mxu0 %vm2885_vm12, %v2883_v58 }
 0x815   :  { %v2803_v59 = vpop.f32.mrb[100].mxu0  ;;  %v2868_v60 = vpop.f32.mrb[168].mxu1  ;;  %5243 = vmatprep.mubr.msk.bf16.mxu1 %vm5666_vm7, %v5665_v22  ;;  %5229 = vmatprep.mubr.msk.bf16.mxu0 %vm5666_vm7, %v5665_v22 }
 0x816   :  { %v2879_v62 = vmax.f32 %v2803_v59, %v2868_v60  ;;  %v5203_v63 = vpop.f32.mrb[101].mxu0  ;;  %v5217_v0 = vpop.f32.mrb[169].mxu1 }
 0x817   :  { %v2806_v1 = vpop.f32.mrb[102].mxu0  ;;  %v2871_v2 = vpop.f32.mrb[170].mxu1  ;;  %v5626_v63 = vld [vmem:[%s6869_s14] sm:$0xff]  }
 0x818   :  { %v2880_v3 = vmax.f32 %v2806_v1, %v2871_v2  ;;  %v5204_v4 = vpop.f32.mrb[103].mxu0  ;;  %v5218_v5 = vpop.f32.mrb[171].mxu1 }
 0x819   :  { %v5627_v5 = vld [vmem:[%s6869_s14 + $0x8] sm:$0xff]  }
 0x81a   :  { %v2884_v7 = vpack.c.bf16 %v2880_v3, %v2879_v62  ;;  %v5625_v62 = vld [vmem:[%s6869_s14 + $0x74] ss:$0 sps:$4 sm:$0xff]  }
 0x81c   :  { %5244 = vmatmul.mubr.msk.bf16.gmra.mrb[180].mxu1 %vm2885_vm12, %v2884_v7  ;;  %5230 = vmatmul.mubr.msk.bf16.gmra.mrb[112].mxu0 %vm2885_vm12, %v2884_v7 }
 0x81d   :  { %5293 = vmatprep.mubr.msk.bf16.mxu1 %vm5666_vm7, %v5665_v22  ;;  %5253 = vmatprep.mubr.msk.bf16.mxu0 %vm1011_vm8, %v5618_v50 }
 0x824   :  { %5294 = vmatmul.mubr.msk.bf16.vlgmr.msra.gmra.mrb[184].mxu1 %vm2885_vm12, %v2882_v45 }
 0x825   :  { %5297 = vmatprep.mubr.msk.bf16.mxu1 %vm5666_vm7, %v5665_v22  ;;  %5328 = vmatpush3.bf16.msra.mxu1 %v3627_v39 }
 0x82c   :  { %5298 = vmatmul.mubr.msk.bf16.gmra.mrb[188].mxu1 %vm2885_vm12, %v2883_v58 }
 0x82d   :  { %5301 = vmatprep.mubr.msk.bf16.mxu1 %vm5666_vm7, %v5665_v22 }
 0x834   :  { %5302 = vmatmul.mubr.msk.bf16.gmra.mrb[192].mxu1 %vm2885_vm12, %v2884_v7 }
 0x835   :  { %5329 = vmatprep.mubr.msk.bf16.mxu1 %vm5666_vm7, %v5665_v22 }
 0x83c   :  { %5330 = vmatmul.mubr.msk.bf16.vlgmr.msra.gmra.mrb[196].mxu1 %vm2885_vm12, %v2882_v45 }
 0x83d   :  { %5333 = vmatprep.mubr.msk.bf16.mxu1 %vm5666_vm7, %v5665_v22 }
 0x844   :  { %5334 = vmatmul.mubr.msk.bf16.gmra.mrb[200].mxu1 %vm2885_vm12, %v2883_v58 }
 0x845   :  { %5337 = vmatprep.mubr.msk.bf16.mxu1 %vm5666_vm7, %v5665_v22 }
 0x84c   :  { %5338 = vmatmul.mubr.msk.bf16.gmra.mrb[204].mxu1 %vm2885_vm12, %v2884_v7  ;;  %v5628_v7 = vld [vmem:[%s6869_s14 + $0x10] sm:$0xff]  }
 0x8df   :  { %v2932_v61 = vpop.f32.mrb[104].mxu0  ;;  %v3012_v9 = vpop.f32.mrb[172].mxu1 }
 0x8e0   :  { %v5223_v10 = vpop.f32.mrb[105].mxu0  ;;  %v5237_v11 = vpop.f32.mrb[173].mxu1 }
 0x8e1   :  { %v2935_v12 = vpop.f32.mrb[106].mxu0  ;;  %v3015_v13 = vpop.f32.mrb[174].mxu1  ;;  %v5629_v10 = vld [vmem:[%s6869_s14 + $0x18] sm:$0xff]   ;;  %v5630_v11 = vld [vmem:[%s6869_s14 + $0x20] sm:$0xff]  }
 0x8e2   :  { %v2970_v14 = vpack.c.bf16 %v2935_v12, %v2932_v61  ;;  %v3051_v15 = vpack.c.bf16 %v3015_v13, %v3012_v9  ;;  %v5224_v6 = vpop.f32.mrb[107].mxu0  ;;  %v5238_v16 = vpop.f32.mrb[175].mxu1 }
 0x8e3   :  { %v5631_v16 = vld [vmem:[%s6869_s14 + $0x28] sm:$0xff]  }
 0x8e4   :  { %5247 = vmatprep.subr.bf16.mxu0 %v3051_v15 }
 0x8e5   :  { %5248 = vmatpush3.bf16.msra.mxu0 %v3051_v15 }
 0x8e7   :  { %v3020_v17 = vpop.f32.mrb[176].mxu1  ;;  %v2940_v18 = vpop.f32.mrb[108].mxu0 }
 0x8e8   :  { %v5241_v19 = vpop.f32.mrb[177].mxu1  ;;  %v5227_v20 = vpop.f32.mrb[109].mxu0 }
 0x8e9   :  { %v3023_v21 = vpop.f32.mrb[178].mxu1  ;;  %v2943_v23 = vpop.f32.mrb[110].mxu0  ;;  %v5634_v19 = vld [vmem:[%s6869_s14 + $0x78] sm:$0xff]   ;;  %v5635_v20 = vld [vmem:[%s6869_s14 + $0x80] sm:$0xff]  }
 0x8ea   :  { %v3052_v24 = vpack.c.bf16 %v3023_v21, %v3020_v17  ;;  %v2971_v25 = vpack.c.bf16 %v2943_v23, %v2940_v18  ;;  %v5242_v26 = vpop.f32.mrb[179].mxu1  ;;  %v5228_v27 = vpop.f32.mrb[111].mxu0  ;;  %v5632_v17 = vld [vmem:[%s6869_s14 + $0x30] sm:$0xff]   ;;  %v5633_v18 = vld [vmem:[%s6869_s14 + $0x38] ss:$0 sps:$4 sm:$0xff]   ;;  %v5636_v21 = vld [vmem:[%s6869_s14 + $0x88] sm:$0xff]  }
 0x8eb   :  { %v5637_v23 = vld [vmem:[%s6869_s14 + $0x90] sm:$0xff]   ;;  %v5640_v26 = vld [vmem:[%s6869_s14 + $0xa8] sm:$0xff]  }
 0x8ec   :  { %5249 = vmatprep.subr.bf16.mxu0 %v3052_v24  ;;  %v5641_v27 = vld [vmem:[%s6869_s14 + $0xb0] ss:$0 sps:$4 sm:$0xff]  }
 0x8ed   :  { %5250 = vmatpush3.bf16.msra.mxu0 %v3052_v24  ;;  %v5638_v24 = vld [vmem:[%s6869_s14 + $0x98] sm:$0xff]  }
 0x8ef   :  { %v3028_v28 = vpop.f32.mrb[180].mxu1  ;;  %v2948_v29 = vpop.f32.mrb[112].mxu0 }
 0x8f0   :  { %v5245_v30 = vpop.f32.mrb[181].mxu1  ;;  %v5231_v31 = vpop.f32.mrb[113].mxu0 }
 0x8f1   :  { %v3031_v32 = vpop.f32.mrb[182].mxu1  ;;  %v2951_v33 = vpop.f32.mrb[114].mxu0  ;;  %v5644_v30 = vld [vmem:[%s6869_s14 + $0xc4] sm:$0xff]   ;;  %v5645_v31 = vld [vmem:[%s6869_s14 + $0xcc] sm:$0xff]  }
 0x8f2   :  { %v3053_v34 = vpack.c.bf16 %v3031_v32, %v3028_v28  ;;  %v2972_v35 = vpack.c.bf16 %v2951_v33, %v2948_v29  ;;  %v5246_v36 = vpop.f32.mrb[183].mxu1  ;;  %v5232_v37 = vpop.f32.mrb[115].mxu0  ;;  %v5642_v28 = vld [vmem:[%s6869_s14 + $0xb4] sm:$0xff]   ;;  %v5643_v29 = vld [vmem:[%s6869_s14 + $0xbc] sm:$0xff]  }
 0x8f3   :  { %v5646_v32 = vld [vmem:[%s6869_s14 + $0xd4] sm:$0xff]   ;;  %v5647_v33 = vld [vmem:[%s6869_s14 + $0xdc] sm:$0xff]  }
 0x8f4   :  { %5251 = vmatprep.subr.bf16.mxu0 %v3053_v34  ;;  %v5650_v36 = vld [vmem:[%s6870_s17] sm:$0xff]  }
 0x8f5   :  { %5252 = vmatpush3.bf16.msra.mxu0 %v3053_v34  ;;  %v5648_v34 = vld [vmem:[%s6869_s14 + $0xe4] sm:$0xff]   ;;  %5379 = vmatprep.mubr.msk.bf16.mxu1 %vm4082_vm13, %v5650_v36 }
 0x8f6   :  { %5269 = vmatprep.subr.bf16.mxu0 %v2970_v14 }
 0x8f7   :  { %v3409_v41 = vpop.f32.mrb[184].mxu1 }
 0x8f8   :  { %5254 = vmatmul.mubr.msk.bf16.vlgmr.msra.gmra.mrb[116].mxu0 %vm1011_vm8, %v5619_v38  ;;  %v5295_v42 = vpop.f32.mrb[185].mxu1 }
 0x8f9   :  { %5270 = vmatpush3.bf16.msra.mxu0 %v2970_v14  ;;  %v3412_v43 = vpop.f32.mrb[186].mxu1  ;;  %5257 = vmatprep.mubr.msk.bf16.mxu0 %vm1011_vm8, %v5620_v40 }
 0x8fa   :  { %v3448_v44 = vpack.c.bf16 %v3412_v43, %v3409_v41  ;;  %5271 = vmatprep.subr.bf16.mxu0 %v2971_v25  ;;  %v5296_v45 = vpop.f32.mrb[187].mxu1 }
 0x8fd   :  { %5272 = vmatpush3.bf16.msra.mxu0 %v2971_v25  ;;  %v5639_v25 = vld [vmem:[%s6869_s14 + $0xa0] sm:$0xff]  }
 0x8fe   :  { %5273 = vmatprep.subr.bf16.mxu0 %v2972_v35 }
 0x8ff   :  { %v3417_v48 = vpop.f32.mrb[188].mxu1 }
 0x900   :  { %5258 = vmatmul.mubr.msk.bf16.gmra.mrb[120].mxu0 %vm1011_vm8, %v5621_v46  ;;  %v5299_v49 = vpop.f32.mrb[189].mxu1 }
 0x901   :  { %5274 = vmatpush3.bf16.msra.mxu0 %v2972_v35  ;;  %v3420_v51 = vpop.f32.mrb[190].mxu1  ;;  %5261 = vmatprep.mubr.msk.bf16.mxu0 %vm1011_vm8, %v5622_v47  ;;  %v5649_v35 = vld [vmem:[%s6869_s14 + $0xec] ss:$0 sps:$4 sm:$0xff]   ;;  %v3896_v49 = vpop.permute.xlu1 %3895 }
 0x902   :  { %v3449_v52 = vpack.c.bf16 %v3420_v51, %v3417_v48  ;;  %v5300_v53 = vpop.f32.mrb[191].mxu1  ;;  %5305 = vmatprep.subr.bf16.mxu0 %v3448_v44  ;;  %v3901_v51 = vpop.permute.xlu0 %3900 }
 0x907   :  { %v3425_v56 = vpop.f32.mrb[192].mxu1 }
 0x908   :  { %5262 = vmatmul.mubr.msk.bf16.gmra.mrb[124].mxu0 %vm1011_vm8, %v5623_v54  ;;  %v5303_v57 = vpop.f32.mrb[193].mxu1 }
 0x909   :  { %v3428_v58 = vpop.f32.mrb[194].mxu1  ;;  %5265 = vmatprep.mubr.msk.bf16.mxu0 %vm1011_vm8, %v5624_v55 }
 0x90a   :  { %v3450_v59 = vpack.c.bf16 %v3428_v58, %v3425_v56  ;;  %v5304_v60 = vpop.f32.mrb[195].mxu1  ;;  %v3911_v56 = vpop.permute.xlu0 %3910 }
 0x90f   :  { %v3663_v0 = vpop.f32.mrb[196].mxu1 }
 0x910   :  { %5266 = vmatmul.mubr.msk.bf16.gmra.mrb[128].mxu0 %vm1011_vm8, %v5625_v62  ;;  %v5331_v1 = vpop.f32.mrb[197].mxu1 }
 0x911   :  { %v3666_v2 = vpop.f32.mrb[198].mxu1  ;;  %5275 = vmatprep.mubr.msk.bf16.mxu0 %vm1011_vm8, %v5626_v63  ;;  %v3921_v63 = vpop.permute.xlu0 %3920 }
 0x912   :  { %v3702_v3 = vpack.c.bf16 %v3666_v2, %v3663_v0  ;;  %v5332_v4 = vpop.f32.mrb[199].mxu1 }
 0x917   :  { %v3671_v8 = vpop.f32.mrb[200].mxu1 }
 0x918   :  { %5276 = vmatmul.mubr.msk.bf16.vlgmr.msra.gmra.mrb[116].mxu0 %vm1011_vm8, %v5627_v5  ;;  %v5335_v39 = vpop.f32.mrb[201].mxu1 }
 0x919   :  { %5306 = vmatpush3.bf16.msra.mxu0 %v3448_v44  ;;  %v3674_v50 = vpop.f32.mrb[202].mxu1  ;;  %5279 = vmatprep.mubr.msk.bf16.mxu0 %vm1011_vm8, %v5628_v7 }
 0x91a   :  { %5307 = vmatprep.subr.bf16.mxu0 %v3449_v52  ;;  %v3703_v61 = vpack.c.bf16 %v3674_v50, %v3671_v8  ;;  %v5336_v9 = vpop.f32.mrb[203].mxu1 }
 0x91b   :  { %v3931_v9 = vpop.permute.xlu0 %3930 }
 0x91d   :  { %5308 = vmatpush3.bf16.msra.mxu0 %v3449_v52  ;;  %v3906_v52 = vpop.permute.xlu1 %3905 }
 0x91e   :  { %5309 = vmatprep.subr.bf16.mxu0 %v3450_v59 }
 0x91f   :  { %v3679_v12 = vpop.f32.mrb[204].mxu1 }
 0x920   :  { %5280 = vmatmul.mubr.msk.bf16.gmra.mrb[120].mxu0 %vm1011_vm8, %v5629_v10  ;;  %v5339_v13 = vpop.f32.mrb[205].mxu1 }
 0x921   :  { %5310 = vmatpush3.bf16.msra.mxu0 %v3450_v59  ;;  %v3682_v14 = vpop.f32.mrb[206].mxu1  ;;  %5283 = vmatprep.mubr.msk.bf16.mxu0 %vm1011_vm8, %v5630_v11  ;;  %v3916_v62 = vpop.permute.xlu1 %3915 }
 0x922   :  { %v3704_v15 = vpack.c.bf16 %v3682_v14, %v3679_v12  ;;  %5341 = vmatprep.subr.bf16.mxu0 %v3702_v3  ;;  %v5340_v6 = vpop.f32.mrb[207].mxu1 }
 0x925   :  { %v3926_v5 = vpop.permute.xlu1 %3925 }
 0x928   :  { %5284 = vmatmul.mubr.msk.bf16.gmra.mrb[124].mxu0 %vm1011_vm8, %v5631_v16 }
 0x929   :  { %5287 = vmatprep.mubr.msk.bf16.mxu0 %vm1011_vm8, %v5632_v17 }
 0x930   :  { %5288 = vmatmul.mubr.msk.bf16.gmra.mrb[132].mxu0 %vm1011_vm8, %v5633_v18 }
 0x931   :  { %5311 = vmatprep.mubr.msk.bf16.mxu0 %vm1011_vm8, %v5634_v19 }
 0x938   :  { %5312 = vmatmul.mubr.msk.bf16.vlgmr.msra.gmra.mrb[116].mxu0 %vm1011_vm8, %v5635_v20 }
 0x939   :  { %5342 = vmatpush3.bf16.msra.mxu0 %v3702_v3  ;;  %5315 = vmatprep.mubr.msk.bf16.mxu0 %vm1011_vm8, %v5636_v21  ;;  %v3941_v21 = vpop.permute.xlu0 %3940 }
 0x93a   :  { %5343 = vmatprep.subr.bf16.mxu0 %v3703_v61 }
 0x93d   :  { %5344 = vmatpush3.bf16.msra.mxu0 %v3703_v61 }
 0x93e   :  { %5345 = vmatprep.subr.bf16.mxu0 %v3704_v15 }
 0x940   :  { %5316 = vmatmul.mubr.msk.bf16.gmra.mrb[120].mxu0 %vm1011_vm8, %v5637_v23 }
 0x941   :  { %5346 = vmatpush3.bf16.msra.mxu0 %v3704_v15  ;;  %5319 = vmatprep.mubr.msk.bf16.mxu0 %vm1011_vm8, %v5638_v24  ;;  %v3936_v15 = vpop.permute.xlu1 %3935 }
 0x948   :  { %5320 = vmatmul.mubr.msk.bf16.gmra.mrb[124].mxu0 %vm1011_vm8, %v5639_v25 }
 0x949   :  { %5323 = vmatprep.mubr.msk.bf16.mxu0 %vm1011_vm8, %v5640_v26 }
 0x950   :  { %5324 = vmatmul.mubr.msk.bf16.gmra.mrb[136].mxu0 %vm1011_vm8, %v5641_v27 }
 0x951   :  { %5347 = vmatprep.mubr.msk.bf16.mxu0 %vm1011_vm8, %v5642_v28  ;;  %v3946_v28 = vpop.permute.xlu1 %3945 }
 0x958   :  { %5348 = vmatmul.mubr.msk.bf16.vlgmr.msra.gmra.mrb[116].mxu0 %vm1011_vm8, %v5643_v29 }
 0x959   :  { %5351 = vmatprep.mubr.msk.bf16.mxu0 %vm1011_vm8, %v5644_v30 }
 0x960   :  { %5352 = vmatmul.mubr.msk.bf16.gmra.mrb[120].mxu0 %vm1011_vm8, %v5645_v31 }
 0x961   :  { %5355 = vmatprep.mubr.msk.bf16.mxu0 %vm1011_vm8, %v5646_v32 }
 0x968   :  { %5356 = vmatmul.mubr.msk.bf16.gmra.mrb[124].mxu0 %vm1011_vm8, %v5647_v33 }
 0x969   :  { %5359 = vmatprep.mubr.msk.bf16.mxu0 %vm1011_vm8, %v5648_v34  ;;  %v3951_v34 = vpop.permute.xlu0 %3950 }
 0x970   :  { %5360 = vmatmul.mubr.msk.bf16.gmra.mrb[140].mxu0 %vm1011_vm8, %v5649_v35 }
 0x9e3   :  { %v5267_v37 = vpop.f32.mrb[128].mxu0 }
 0x9e4   :  { %v3198_v38 = vpop.f32.mrb[129].mxu0 }
 0x9e5   :  { %v5268_v40 = vpop.f32.mrb[130].mxu0 }
 0x9e6   :  { %v3201_v41 = vpop.f32.mrb[131].mxu0 }
 0xa03   :  { %v5289_v42 = vpop.f32.mrb[132].mxu0 }
 0xa04   :  { %v3365_v43 = vadd.f32 %v5289_v42, %v5267_v37  ;;  %v3356_v44 = vpop.f32.mrb[133].mxu0 }
 0xa05   :  { %v3357_v45 = vadd.f32 %v3356_v44, %v3198_v38  ;;  %v5290_v46 = vpop.f32.mrb[134].mxu0 }
 0xa06   :  { %v3359_v47 = vpop.f32.mrb[135].mxu0 }
 0xa07   :  { %v3360_v48 = vadd.f32 %v3359_v47, %v3201_v41  ;;  %v3956_v41 = vpop.permute.xlu1 %3955 }
 0xa23   :  { %v5325_v53 = vpop.f32.mrb[136].mxu0 }
 0xa24   :  { %v6812_v54 = vadd.f32 %v5325_v53, %v3365_v43  ;;  %v3595_v55 = vpop.f32.mrb[137].mxu0 }
 0xa25   :  { %v6814_v57 = vadd.f32 %v3595_v55, %v3357_v45  ;;  %v5326_v58 = vpop.f32.mrb[138].mxu0  ;;  %v3966_v55 = vpop.permute.xlu1 %3965 }
 0xa26   :  { %v3598_v59 = vpop.f32.mrb[139].mxu0 }
 0xa27   :  { %v6816_v60 = vadd.f32 %v3598_v59, %v3360_v48 }
 0xa2b   :  { %v5349_v0 = vpop.f32.mrb[116].mxu0 }
 0xa2c   :  { %v3970_v1 = vadd.f32 %v5349_v0, %v3906_v52  ;;  %v3801_v2 = vpop.f32.mrb[117].mxu0 }
 0xa2d   :  { %v3968_v3 = vadd.f32 %v3896_v49, %v3801_v2  ;;  %v5350_v4 = vpop.f32.mrb[118].mxu0 }
 0xa2e   :  { %v3971_v7 = vadd.f32 %v5350_v4, %v3911_v56  ;;  %v3804_v8 = vpop.f32.mrb[119].mxu0  ;;  %v3985_v50 = vmax.f32 %v3970_v1, 0.0 }
 0xa2f   :  { %v3969_v39 = vadd.f32 %v3901_v51, %v3804_v8  ;;  %v3983_v10 = vmax.f32 %v3968_v3, 0.0 }
 0xa30   :  { %v3986_v61 = vmax.f32 %v3971_v7, 0.0  ;;  %v5653_v7 = vld [vmem:[%s6870_s17 + $0x18] sm:$0x3f]  }
 0xa31   :  { %v3984_v11 = vmax.f32 %v3969_v39, 0.0  ;;  %v4030_v39 = vpop.permute.xlu1 %4029 }
 0xa32   :  { %v4007_v12 = vpack.c.bf16 %v3986_v61, %v3985_v50 }
 0xa33   :  { %v4006_v13 = vpack.c.bf16 %v3984_v11, %v3983_v10  ;;  %v5353_v14 = vpop.f32.mrb[120].mxu0 }
 0xa34   :  { %v3974_v6 = vadd.f32 %v5353_v14, %v3926_v5  ;;  %v3817_v16 = vpop.f32.mrb[121].mxu0  ;;  %v5651_v5 = vld [vmem:[%s6870_s17 + $0x8] sm:$0xff]  }
 0xa35   :  { %v3972_v17 = vadd.f32 %v3916_v62, %v3817_v16  ;;  %v5354_v18 = vpop.f32.mrb[122].mxu0  ;;  %5363 = vmatprep.subr.bf16.mxu1 %v4006_v13  ;;  %v4040_v61 = vpop.permute.xlu1 %4039 }
 0xa36   :  { %v3975_v19 = vadd.f32 %v5354_v18, %v3931_v9  ;;  %v3820_v20 = vpop.f32.mrb[123].mxu0  ;;  %5364 = vmatpush3.bf16.msra.mxu1 %v4006_v13  ;;  %v3989_v24 = vmax.f32 %v3974_v6, 0.0 }
 0xa37   :  { %v3973_v23 = vadd.f32 %v3921_v63, %v3820_v20  ;;  %5365 = vmatprep.subr.bf16.mxu1 %v4007_v12  ;;  %v3987_v26 = vmax.f32 %v3972_v17, 0.0  ;;  %v3961_v63 = vpop.permute.xlu0 %3960 }
 0xa38   :  { %v3990_v25 = vmax.f32 %v3975_v19, 0.0 }
 0xa39   :  { %v3988_v27 = vmax.f32 %v3973_v23, 0.0  ;;  %v4050_v16 = vpop.permute.xlu1 %4049 }
 0xa3a   :  { %v4009_v29 = vpack.c.bf16 %v3990_v25, %v3989_v24  ;;  %5366 = vmatpush3.bf16.msra.mxu1 %v4007_v12 }
 0xa3b   :  { %v4008_v30 = vpack.c.bf16 %v3988_v27, %v3987_v26  ;;  %v5357_v31 = vpop.f32.mrb[124].mxu0  ;;  %v4025_v8 = vpop.permute.xlu0 %4024 }
 0xa3c   :  { %v3978_v32 = vadd.f32 %v5357_v31, %v3946_v28  ;;  %v3833_v33 = vpop.f32.mrb[125].mxu0 }
 0xa3d   :  { %v3976_v35 = vadd.f32 %v3936_v15, %v3833_v33  ;;  %v5358_v36 = vpop.f32.mrb[126].mxu0  ;;  %5367 = vmatprep.subr.bf16.mxu1 %v4008_v30 }
 0xa3e   :  { %v3979_v37 = vadd.f32 %v5358_v36, %v3951_v34  ;;  %v3836_v38 = vpop.f32.mrb[127].mxu0  ;;  %5368 = vmatpush3.bf16.msra.mxu1 %v4008_v30  ;;  %v3993_v42 = vmax.f32 %v3978_v32, 0.0 }
 0xa3f   :  { %v3977_v40 = vadd.f32 %v3941_v21, %v3836_v38  ;;  %5369 = vmatprep.subr.bf16.mxu1 %v4009_v29  ;;  %v3991_v44 = vmax.f32 %v3976_v35, 0.0  ;;  %v4035_v50 = vpop.permute.xlu0 %4034 }
 0xa40   :  { %v3994_v43 = vmax.f32 %v3979_v37, 0.0 }
 0xa41   :  { %v3992_v45 = vmax.f32 %v3977_v40, 0.0 }
 0xa42   :  { %v4011_v46 = vpack.c.bf16 %v3994_v43, %v3993_v42  ;;  %5370 = vmatpush3.bf16.msra.mxu1 %v4009_v29  ;;  %v4060_v29 = vpop.permute.xlu1 %4059  ;;  %v5654_v43 = vld [vmem:[%s6871_s19] sm:$0x1f]  }
 0xa43   :  { %v4010_v47 = vpack.c.bf16 %v3992_v45, %v3991_v44  ;;  %v5361_v48 = vpop.f32.mrb[140].mxu0  ;;  %v4045_v12 = vpop.permute.xlu0 %4044 }
 0xa44   :  { %v3877_v49 = vadd.f32 %v5361_v48, %v6812_v54  ;;  %v3849_v51 = vpop.f32.mrb[141].mxu0 }
 0xa45   :  { %v3875_v52 = vadd.f32 %v3849_v51, %v6814_v57  ;;  %v5362_v53 = vpop.f32.mrb[142].mxu0  ;;  %5371 = vmatprep.subr.bf16.mxu1 %v4010_v47 }
 0xa46   :  { %v3852_v56 = vpop.f32.mrb[143].mxu0  ;;  %5372 = vmatpush3.bf16.msra.mxu1 %v4010_v47  ;;  %v3982_v58 = vadd.f32 %v3966_v55, %v3877_v49  ;;  %v4187_v48 = vpop.permute.xlu1 %4186 }
 0xa47   :  { %v3980_v59 = vadd.f32 %v3956_v41, %v3875_v52  ;;  %v3876_v62 = vadd.f32 %v3852_v56, %v6816_v60  ;;  %5373 = vmatprep.subr.bf16.mxu1 %v4011_v46  ;;  %v5652_v60 = vld [vmem:[%s6870_s17 + $0x10] sm:$0xff]   ;;  %v4055_v24 = vpop.permute.xlu0 %4054 }
 0xa48   :  { %v3997_v1 = vmax.f32 %v3982_v58, 0.0 }
 0xa49   :  { %v3981_v0 = vadd.f32 %v3961_v63, %v3876_v62  ;;  %v3995_v2 = vmax.f32 %v3980_v59, 0.0 }
 0xa4a   :  { %5374 = vmatpush3.bf16.msra.mxu1 %v4011_v46  ;;  %v4013_v4 = vpack.c.bf16 %v3997_v1, %v3997_v1 }
 0xa4b   :  { %v3996_v3 = vmax.f32 %v3981_v0, 0.0  ;;  %v4182_v44 = vpop.permute.xlu0 %4181 }
 0xa4c   :  { %v4096_v57 = vsel %vm1236_vm9, %v4013_v4, 0 }
 0xa4d   :  { %v4012_v54 = vpack.c.bf16 %v3996_v3, %v3995_v2 }
 0xa4f   :  { %5375 = vmatprep.subr.bf16.mxu1 %v4012_v54 }
 0xa50   :  { %5376 = vmatpush3.bf16.msra.mxu1 %v4012_v54 }
 0xa51   :  { %5494 = vmatprep.subr.msk.bf16.mxu1 %vm1236_vm9, %v4013_v4 }
 0xa54   :  { %5378 = vmatpush3.bf16.msra.mxu1 %v4096_v57 }
 0xa55   :  { %5387 = vmatprep.subr.bf16.mxu1 %v5665_v22 }
 0xa57   :  { %5380 = vmatmul.mubr.msk.bf16.vlgmr.msra.gmra.mrb[208].mxu1 %vm4082_vm13, %v5651_v5 }
 0xa58   :  { %5383 = vmatprep.mubr.msk.bf16.mxu1 %vm4082_vm13, %v5652_v60 }
 0xa5f   :  { %5384 = vmatmul.mubr.msk.bf16.gmra.mrb[212].mxu1 %vm4082_vm13, %v5653_v7 }
 0xa60   :  { %5395 = vmatprep.mubr.msk.bf16.mxu1 %vm5666_vm7, %v5665_v22 }
 0xb2a   :  { %v5381_v9 = vpop.f32.mrb[208].mxu1 }
 0xb2b   :  { %v4141_v10 = vadd.f32 %v5381_v9, %v4035_v50  ;;  %v4132_v11 = vpop.f32.mrb[209].mxu1 }
 0xb2c   :  { %v4133_v13 = vadd.f32 %v4132_v11, %v4025_v8  ;;  %v5382_v14 = vpop.f32.mrb[210].mxu1 }
 0xb2d   :  { %v4144_v15 = vadd.f32 %v5382_v14, %v4040_v61  ;;  %v4135_v6 = vpop.f32.mrb[211].mxu1  ;;  %v4165_v18 = vmax.f32 %v4141_v10, 0.0 }
 0xb2e   :  { %v4136_v17 = vadd.f32 %v4135_v6, %v4030_v39  ;;  %v4163_v20 = vmax.f32 %v4133_v13, 0.0 }
 0xb2f   :  { %v4166_v19 = vmax.f32 %v4144_v15, 0.0 }
 0xb30   :  { %v4164_v21 = vmax.f32 %v4136_v17, 0.0 }
 0xb31   :  { %v4174_v23 = vpack.c.bf16 %v4166_v19, %v4165_v18 }
 0xb32   :  { %v4173_v25 = vpack.c.bf16 %v4164_v21, %v4163_v20  ;;  %v5385_v26 = vpop.f32.mrb[212].mxu1 }
 0xb33   :  { %v4157_v27 = vadd.f32 %v5385_v26, %v4055_v24  ;;  %v4148_v28 = vpop.f32.mrb[213].mxu1 }
 0xb34   :  { %v4149_v30 = vadd.f32 %v4148_v28, %v4045_v12  ;;  %v5386_v31 = vpop.f32.mrb[214].mxu1  ;;  %5388 = vmatpush3.bf16.msra.mxu1 %v4173_v25 }
 0xb35   :  { %v4160_v32 = vadd.f32 %v5386_v31, %v4060_v29  ;;  %v4151_v33 = vpop.f32.mrb[215].mxu1  ;;  %5389 = vmatprep.subr.bf16.mxu1 %v5665_v22  ;;  %v4169_v35 = vmax.f32 %v4157_v27, 0.0 }
 0xb36   :  { %v4152_v34 = vadd.f32 %v4151_v33, %v4050_v16  ;;  %v4167_v37 = vmax.f32 %v4149_v30, 0.0 }
 0xb37   :  { %v4170_v36 = vmax.f32 %v4160_v32, 0.0 }
 0xb38   :  { %v4168_v38 = vmax.f32 %v4152_v34, 0.0  ;;  %5390 = vmatpush3.bf16.msra.mxu1 %v4174_v23 }
 0xb39   :  { %v4176_v40 = vpack.c.bf16 %v4170_v36, %v4169_v35  ;;  %5391 = vmatprep.subr.bf16.mxu1 %v5665_v22 }
 0xb3a   :  { %v4175_v41 = vpack.c.bf16 %v4168_v38, %v4167_v37 }
 0xb3b   :  { %v4199_v42 = vsel %vm560_vm5, %v4176_v40, 0 }
 0xb3c   :  { %5392 = vmatpush3.bf16.msra.mxu1 %v4175_v41 }
 0xb3d   :  { %5393 = vmatprep.subr.bf16.mxu1 %v5665_v22 }
 0xb40   :  { %5394 = vmatpush3.bf16.msra.mxu1 %v4199_v42 }
 0xb43   :  { %5396 = vmatmul.mubr.msk.bf16.vlgmr.msra.gmra.mrb[216].mxu1 %vm4194_vm14, %v5654_v43 }
 0xc16   :  { %v4235_v45 = vpop.f32.mrb[216].mxu1 }
 0xc17   :  { %v4236_v46 = vadd.f32 %v4235_v45, %v4182_v44  ;;  %v5397_v47 = vpop.f32.mrb[217].mxu1 }
 0xc18   :  { %v4238_v49 = vpop.f32.mrb[218].mxu1 }
 0xc19   :  { %4243 = vst.msk [vmem:[%s6872_s21] sm:$0xff] %vm4242_vm15, %v4236_v46  ;;  %v4239_v22 = vadd.f32 %v4238_v49, %v4187_v48  ;;  %v5398_v51 = vpop.f32.mrb[219].mxu1 }
 0xc1b   :  { %4245 = vst.msk [vmem:[%s6872_s21 + $0x8] sm:$0x3] %vm4244_vm0, %v4239_v22 }

</bundles_post_ra>
